<compile_context>
chip_gen: v6e
topology: v6e:2x2x1
jax: 0.10.0
libtpu: 0.0.40
codegen_flags: <defaults>
</compile_context>

<pallas_src>
import jax
import jax.numpy as jnp
from jax.experimental import pallas as pl
from jax.experimental.pallas import tpu as pltpu

# ----------------------------- config (small, forward-consistent) -----------------------------
BATCH = 2
SEQ = 8
ROWS = BATCH * SEQ        # flattened (B, S) row axis for all dense layers
HIDDEN = 128              # stands in for 768
NUM_HEADS = 4
HEAD_DIM = HIDDEN // NUM_HEADS
INTERMEDIATE = 4 * HIDDEN
NUM_LAYERS = 2
VOCAB = 64
NUM_CLASSES = 4
OUT_PAD = 128             # lane-dense classifier output slab (sliced to NUM_CLASSES outside)
LN_EPS = 1e-12            # BERT's LayerNorm eps


def _layernorm(x, gamma, beta):
    # x: (R, H) f32, gamma/beta: (1, H) f32 -- kept in f32 (v5e has no bf16 VPU path).
    mean = jnp.mean(x, axis=-1, keepdims=True)
    var = jnp.mean((x - mean) ** 2, axis=-1, keepdims=True)
    return (x - mean) * jax.lax.rsqrt(var + LN_EPS) * gamma + beta


# ----------------------------- fused BERT kernel (single invocation, no grid) -----------------------------
def bert_kernel(x_ref, embg_ref, embb_ref,
                wqkv_ref, bqkv_ref, wo_ref, bo_ref, ln1g_ref, ln1b_ref,
                wi_ref, bi_ref, wo2_ref, bo2_ref, ln2g_ref, ln2b_ref,
                wp_ref, bp_ref, wc_ref, bc_ref,
                out_ref, ctx_ref):
    scale = 1.0 / (HEAD_DIM ** 0.5)

    # Embedding LayerNorm fused in; hidden states stay in vregs/VMEM for the whole forward pass.
    h = _layernorm(x_ref[...], embg_ref[...], embb_ref[...])          # (ROWS, H) f32

    for layer in range(NUM_LAYERS):                                   # static unroll, weights resident
        xb = h.astype(jnp.bfloat16)                                    # bf16 MXU operands, f32 accumulation

        # --- fused QKV projection: one full-width (16,128)@(128,384) dot ---
        qkv = jnp.dot(xb, wqkv_ref[layer],
                      preferred_element_type=jnp.float32) + bqkv_ref[layer]   # (ROWS, 3H) f32

        # --- per-head attention core (tiny 8x8 scores), contexts packed lane-dense into scratch ---
        for hd in range(NUM_HEADS):
            q = qkv[:, hd * HEAD_DIM:(hd + 1) * HEAD_DIM].reshape(BATCH, SEQ, HEAD_DIM)
            k = qkv[:, HIDDEN + hd * HEAD_DIM:HIDDEN + (hd + 1) * HEAD_DIM].reshape(BATCH, SEQ, HEAD_DIM)
            v = qkv[:, 2 * HIDDEN + hd * HEAD_DIM:2 * HIDDEN + (hd + 1) * HEAD_DIM].reshape(BATCH, SEQ, HEAD_DIM)
            s = jnp.einsum("bqd,bkd->bqk", q, k,
                           preferred_element_type=jnp.float32) * scale
            s = s - jnp.max(s, axis=-1, keepdims=True)
            p = jnp.exp(s)
            p = p * pl.reciprocal(jnp.sum(p, axis=-1, keepdims=True), approx=True)
            c = jnp.einsum("bqk,bkd->bqd", p, v, preferred_element_type=jnp.float32)
            ctx_ref[:, hd * HEAD_DIM:(hd + 1) * HEAD_DIM] = (
                c.reshape(ROWS, HEAD_DIM).astype(jnp.bfloat16))

        # --- fused attention output projection: one (16,128)@(128,128) dot, bias added once ---
        attn = jnp.dot(ctx_ref[...], wo_ref[layer],
                       preferred_element_type=jnp.float32) + bo_ref[layer]

        h1 = _layernorm(h + attn, ln1g_ref[layer], ln1b_ref[layer])

        # --- FFN ---
        ffn = jnp.dot(h1.astype(jnp.bfloat16), wi_ref[layer],
                      preferred_element_type=jnp.float32) + bi_ref[layer]
        # TODO(synk): PyTorch BERT uses exact erf-GELU; tanh approximation kept for clean TPU lowering.
        ffn = jax.nn.gelu(ffn, approximate=True)
        ffn_out = jnp.dot(ffn.astype(jnp.bfloat16), wo2_ref[layer],
                          preferred_element_type=jnp.float32) + bo2_ref[layer]

        h = _layernorm(h1 + ffn_out, ln2g_ref[layer], ln2b_ref[layer])

    # Pooler (tanh on [CLS]) -> Dropout(p=0.5) eval-mode identity -> Linear(H,4) -> Sigmoid.
    cls = h.reshape(BATCH, SEQ, HIDDEN)[:, 0, :]                       # (B, H) [CLS] rows
    pooled = jnp.tanh(jnp.dot(cls.astype(jnp.bfloat16), wp_ref[...],
                              preferred_element_type=jnp.float32) + bp_ref[...])
    logits = jnp.dot(pooled.astype(jnp.bfloat16), wc_ref[...],
                     preferred_element_type=jnp.float32) + bc_ref[...]   # (B, 128) lane-dense slab
    out_ref[...] = jax.nn.sigmoid(logits)                              # module's self.relu is nn.Sigmoid()


def fused_bert_forward(x2d, p):
    operands = (x2d, p["emb_ln_g"], p["emb_ln_b"],
                p["wqkv"], p["bqkv"], p["wo"], p["bo"], p["ln1_g"], p["ln1_b"],
                p["wi"], p["bi"], p["wo2"], p["bo2"], p["ln2_g"], p["ln2_b"],
                p["pooler_w"], p["pooler_b"], p["cls_w"], p["cls_b"])

    # Advisory cost estimate for XLA's scheduler around the custom call.
    flops = (NUM_LAYERS * (2 * ROWS * HIDDEN * (3 * HIDDEN)            # fused QKV projection
                           + 4 * BATCH * NUM_HEADS * SEQ * SEQ * HEAD_DIM   # scores + context
                           + 2 * ROWS * HIDDEN * HIDDEN                # fused output projection
                           + 4 * ROWS * HIDDEN * INTERMEDIATE)         # FFN in + out
             + 2 * BATCH * HIDDEN * HIDDEN + 2 * BATCH * HIDDEN * OUT_PAD)  # pooler + classifier
    transcendentals = (NUM_LAYERS * (BATCH * NUM_HEADS * SEQ * SEQ + ROWS * INTERMEDIATE)
                       + BATCH * HIDDEN + BATCH * OUT_PAD)
    bytes_accessed = (sum(int(o.size) * o.dtype.itemsize for o in operands)
                      + BATCH * OUT_PAD * 4)

    vmem_full = pl.BlockSpec(memory_space=pltpu.MemorySpace.VMEM)      # whole-array VMEM blocks

    out = pl.pallas_call(
        bert_kernel,
        out_shape=jax.ShapeDtypeStruct((BATCH, OUT_PAD), jnp.float32),
        in_specs=[vmem_full] * len(operands),
        out_specs=pl.BlockSpec(memory_space=pltpu.MemorySpace.VMEM),
        scratch_shapes=[pltpu.VMEM((ROWS, HIDDEN), jnp.bfloat16)],     # lane-dense per-layer ctx buffer
        cost_estimate=pl.CostEstimate(flops=flops,
                                      transcendentals=transcendentals,
                                      bytes_accessed=bytes_accessed),
    )(*operands)
    return out[:, :NUM_CLASSES]                                        # drop the zero-padded lanes


# ----------------------------- parameter init (deterministic, synthetic) -----------------------------
def init_params(key):
    keys = iter(jax.random.split(key, 64))
    std = 0.02

    def w(shape):
        return jax.random.normal(next(keys), shape, jnp.float32) * std

    per_layer = []
    for _ in range(NUM_LAYERS):
        wq, wk, wv, wo = (w((HIDDEN, HIDDEN)) for _ in range(4))
        bq, bk, bv = (w((1, HIDDEN)) for _ in range(3))
        per_layer.append(dict(
            # lane-dense fused QKV: x @ wqkv == [x@wq | x@wk | x@wv]
            wqkv=jnp.concatenate([wq, wk, wv], axis=1),                # (H, 3H)
            bqkv=jnp.concatenate([bq, bk, bv], axis=1),                # (1, 3H)
            wo=wo,                                                     # (H, H)
            bo=w((1, HIDDEN)),
            ln1_g=jnp.ones((1, HIDDEN), jnp.float32),
            ln1_b=jnp.zeros((1, HIDDEN), jnp.float32),
            wi=w((HIDDEN, INTERMEDIATE)),
            bi=w((1, INTERMEDIATE)),
            wo2=w((INTERMEDIATE, HIDDEN)),
            bo2=w((1, HIDDEN)),
            ln2_g=jnp.ones((1, HIDDEN), jnp.float32),
            ln2_b=jnp.zeros((1, HIDDEN), jnp.float32),
        ))

    def stack(name, dtype):
        return jnp.stack([lyr[name] for lyr in per_layer]).astype(dtype)

    cls_w = w((HIDDEN, NUM_CLASSES))
    cls_b = w((1, NUM_CLASSES))
    cls_w_pad = jnp.zeros((HIDDEN, OUT_PAD), jnp.float32).at[:, :NUM_CLASSES].set(cls_w)
    cls_b_pad = jnp.zeros((1, OUT_PAD), jnp.float32).at[:, :NUM_CLASSES].set(cls_b)

    params = {
        "word_emb": w((VOCAB, HIDDEN)),
        "pos_emb": w((SEQ, HIDDEN)),
        "type_emb": w((2, HIDDEN)),
        "emb_ln_g": jnp.ones((1, HIDDEN), jnp.float32),
        "emb_ln_b": jnp.zeros((1, HIDDEN), jnp.float32),
        # weights in bf16 (MXU-native, half the DMA bytes); biases / LN params stay f32
        "wqkv": stack("wqkv", jnp.bfloat16), "bqkv": stack("bqkv", jnp.float32),
        "wo": stack("wo", jnp.bfloat16), "bo": stack("bo", jnp.float32),
        "ln1_g": stack("ln1_g", jnp.float32), "ln1_b": stack("ln1_b", jnp.float32),
        "wi": stack("wi", jnp.bfloat16), "bi": stack("bi", jnp.float32),
        "wo2": stack("wo2", jnp.bfloat16), "bo2": stack("bo2", jnp.float32),
        "ln2_g": stack("ln2_g", jnp.float32), "ln2_b": stack("ln2_b", jnp.float32),
        "pooler_w": w((HIDDEN, HIDDEN)).astype(jnp.bfloat16),
        "pooler_b": w((1, HIDDEN)),
        "cls_w": cls_w_pad.astype(jnp.bfloat16),                       # (H, 128) zero-padded
        "cls_b": cls_b_pad,                                            # (1, 128) zero-padded
    }
    return params


# ----------------------------- forward -----------------------------
@jax.jit
def bert_classifier_forward(params, input_ids):
    # Embedding gather is glue, kept in plain JAX; the embedding LayerNorm is fused into the kernel.
    emb = (params["word_emb"][input_ids]
           + params["pos_emb"][None, :, :]
           + params["type_emb"][0][None, None, :])            # (B, S, H)
    x2d = emb.reshape(ROWS, HIDDEN)                           # flatten (B, S) -> rows
    return fused_bert_forward(x2d, params)                    # (B, 4)


if __name__ == "__main__":
    key = jax.random.PRNGKey(0)
    pkey, dkey = jax.random.split(key)
    params = init_params(pkey)
    input_ids = jax.random.randint(dkey, (BATCH, SEQ), 0, VOCAB, dtype=jnp.int32)

    out = bert_classifier_forward(params, input_ids)
    out = jax.block_until_ready(out)

    assert out.shape == (BATCH, NUM_CLASSES)
    assert bool(jnp.all(jnp.isfinite(out)))
    assert bool(jnp.all((out >= 0.0) & (out <= 1.0)))   # sigmoid range
    print("KERNEL_OK")
</pallas_src>

<mosaic_0001>
module attributes {stable_mosaic.version = 11 : i64} {
  func.func @bert_kernel(%arg0: memref<16x128xf32, #tpu.memory_space<vmem>>, %arg1: memref<1x128xf32, #tpu.memory_space<vmem>>, %arg2: memref<1x128xf32, #tpu.memory_space<vmem>>, %arg3: memref<2x128x384xbf16, #tpu.memory_space<vmem>>, %arg4: memref<2x1x384xf32, #tpu.memory_space<vmem>>, %arg5: memref<2x128x128xbf16, #tpu.memory_space<vmem>>, %arg6: memref<2x1x128xf32, #tpu.memory_space<vmem>>, %arg7: memref<2x1x128xf32, #tpu.memory_space<vmem>>, %arg8: memref<2x1x128xf32, #tpu.memory_space<vmem>>, %arg9: memref<2x128x512xbf16, #tpu.memory_space<vmem>>, %arg10: memref<2x1x512xf32, #tpu.memory_space<vmem>>, %arg11: memref<2x512x128xbf16, #tpu.memory_space<vmem>>, %arg12: memref<2x1x128xf32, #tpu.memory_space<vmem>>, %arg13: memref<2x1x128xf32, #tpu.memory_space<vmem>>, %arg14: memref<2x1x128xf32, #tpu.memory_space<vmem>>, %arg15: memref<128x128xbf16, #tpu.memory_space<vmem>>, %arg16: memref<1x128xf32, #tpu.memory_space<vmem>>, %arg17: memref<128x128xbf16, #tpu.memory_space<vmem>>, %arg18: memref<1x128xf32, #tpu.memory_space<vmem>>, %arg19: memref<2x128xf32, #tpu.memory_space<vmem>>, %arg20: memref<16x128xbf16, #tpu.memory_space<vmem>>) attributes {dimension_semantics = [], scalar_prefetch = 0 : i64, scratch_operands = 1 : i64, tpu.core_type = #tpu.core_type<tc>} {
    %c0 = arith.constant 0 : index
    %c0_0 = arith.constant 0 : index
    %0 = vector.load %arg0[%c0, %c0_0] : memref<16x128xf32, #tpu.memory_space<vmem>>, vector<16x128xf32>
    %c0_1 = arith.constant 0 : index
    %c0_2 = arith.constant 0 : index
    %1 = vector.load %arg1[%c0_1, %c0_2] : memref<1x128xf32, #tpu.memory_space<vmem>>, vector<1x128xf32>
    %c0_3 = arith.constant 0 : index
    %c0_4 = arith.constant 0 : index
    %2 = vector.load %arg2[%c0_3, %c0_4] : memref<1x128xf32, #tpu.memory_space<vmem>>, vector<1x128xf32>
    %cst = arith.constant dense<0.000000e+00> : vector<16xf32>
    %3 = vector.multi_reduction <add>, %0, %cst [1] : vector<16x128xf32> to vector<16xf32>
    %4 = vector.shape_cast %3 : vector<16xf32> to vector<16x1xf32>
    %cst_5 = arith.constant 1.280000e+02 : f32
    %5 = vector.broadcast %cst_5 : f32 to vector<16x1xf32>
    %6 = arith.divf %4, %5 : vector<16x1xf32>
    %7 = vector.broadcast %6 : vector<16x1xf32> to vector<16x128xf32>
    %8 = arith.subf %0, %7 : vector<16x128xf32>
    %9 = arith.mulf %8, %8 : vector<16x128xf32>
    %cst_6 = arith.constant dense<0.000000e+00> : vector<16xf32>
    %10 = vector.multi_reduction <add>, %9, %cst_6 [1] : vector<16x128xf32> to vector<16xf32>
    %11 = vector.shape_cast %10 : vector<16xf32> to vector<16x1xf32>
    %cst_7 = arith.constant 1.280000e+02 : f32
    %12 = vector.broadcast %cst_7 : f32 to vector<16x1xf32>
    %13 = arith.divf %11, %12 : vector<16x1xf32>
    %14 = vector.broadcast %6 : vector<16x1xf32> to vector<16x128xf32>
    %15 = arith.subf %0, %14 : vector<16x128xf32>
    %cst_8 = arith.constant 9.99999996E-13 : f32
    %16 = vector.broadcast %cst_8 : f32 to vector<16x1xf32>
    %17 = arith.addf %13, %16 : vector<16x1xf32>
    %18 = math.rsqrt %17 : vector<16x1xf32>
    %19 = vector.broadcast %18 : vector<16x1xf32> to vector<16x128xf32>
    %20 = arith.mulf %15, %19 : vector<16x128xf32>
    %21 = vector.broadcast %1 : vector<1x128xf32> to vector<16x128xf32>
    %22 = arith.mulf %20, %21 : vector<16x128xf32>
    %23 = vector.broadcast %2 : vector<1x128xf32> to vector<16x128xf32>
    %24 = arith.addf %22, %23 : vector<16x128xf32>
    %25 = arith.truncf %24 : vector<16x128xf32> to vector<16x128xbf16>
    %c0_9 = arith.constant 0 : index
    %c0_10 = arith.constant 0 : index
    %c0_11 = arith.constant 0 : index
    %26 = vector.load %arg3[%c0_9, %c0_10, %c0_11] : memref<2x128x384xbf16, #tpu.memory_space<vmem>>, vector<1x128x384xbf16>
    %27 = vector.shape_cast %26 : vector<1x128x384xbf16> to vector<128x384xbf16>
    %cst_12 = arith.constant dense<0.000000e+00> : vector<16x384xf32>
    %28 = tpu.matmul %25, %27, %cst_12 {dimension_numbers = #tpu.dot_dimension_numbers<[1], [0], [0], [1], [0, 0, 1, 1], [], []>} : vector<16x128xbf16>, vector<128x384xbf16>, vector<16x384xf32> -> vector<16x384xf32>
    %c0_13 = arith.constant 0 : index
    %c0_14 = arith.constant 0 : index
    %c0_15 = arith.constant 0 : index
    %29 = vector.load %arg4[%c0_13, %c0_14, %c0_15] : memref<2x1x384xf32, #tpu.memory_space<vmem>>, vector<1x1x384xf32>
    %30 = vector.shape_cast %29 : vector<1x1x384xf32> to vector<1x384xf32>
    %31 = vector.broadcast %30 : vector<1x384xf32> to vector<16x384xf32>
    %32 = arith.addf %28, %31 : vector<16x384xf32>
    %33 = vector.extract_strided_slice %32 {offsets = [0, 0], sizes = [16, 32], strides = [1, 1]} : vector<16x384xf32> to vector<16x32xf32>
    %34 = vector.shape_cast %33 : vector<16x32xf32> to vector<2x8x32xf32>
    %35 = vector.extract_strided_slice %32 {offsets = [0, 128], sizes = [16, 32], strides = [1, 1]} : vector<16x384xf32> to vector<16x32xf32>
    %36 = vector.shape_cast %35 : vector<16x32xf32> to vector<2x8x32xf32>
    %37 = vector.extract_strided_slice %32 {offsets = [0, 256], sizes = [16, 32], strides = [1, 1]} : vector<16x384xf32> to vector<16x32xf32>
    %38 = vector.shape_cast %37 : vector<16x32xf32> to vector<2x8x32xf32>
    "tpu.trace_start"() <{level = 10 : i32, message = "bqd,bkd->bqk"}> : () -> ()
    %cst_16 = arith.constant dense<0.000000e+00> : vector<2x8x8xf32>
    %39 = tpu.matmul %34, %36, %cst_16 {dimension_numbers = #tpu.dot_dimension_numbers<[2], [2], [1], [1], [0, 0, 0, 1, 1, 1], [0], [0]>} : vector<2x8x32xf32>, vector<2x8x32xf32>, vector<2x8x8xf32> -> vector<2x8x8xf32>
    "tpu.trace_stop"() : () -> ()
    %cst_17 = arith.constant 0.176776692 : f32
    %40 = vector.broadcast %cst_17 : f32 to vector<2x8x8xf32>
    %41 = arith.mulf %39, %40 : vector<2x8x8xf32>
    %cst_18 = arith.constant dense<0xFF800000> : vector<2x8xf32>
    %42 = vector.multi_reduction <maximumf>, %41, %cst_18 [2] : vector<2x8x8xf32> to vector<2x8xf32>
    %43 = vector.shape_cast %42 : vector<2x8xf32> to vector<2x8x1xf32>
    %44 = vector.broadcast %43 : vector<2x8x1xf32> to vector<2x8x8xf32>
    %45 = arith.subf %41, %44 : vector<2x8x8xf32>
    %46 = math.exp %45 : vector<2x8x8xf32>
    %cst_19 = arith.constant dense<0.000000e+00> : vector<2x8xf32>
    %47 = vector.multi_reduction <add>, %46, %cst_19 [2] : vector<2x8x8xf32> to vector<2x8xf32>
    %48 = vector.shape_cast %47 : vector<2x8xf32> to vector<2x8x1xf32>
    %49 = tpu.reciprocal %48 {approx = true} : vector<2x8x1xf32> -> vector<2x8x1xf32>
    %50 = vector.broadcast %49 : vector<2x8x1xf32> to vector<2x8x8xf32>
    %51 = arith.mulf %46, %50 : vector<2x8x8xf32>
    "tpu.trace_start"() <{level = 10 : i32, message = "bqk,bkd->bqd"}> : () -> ()
    %cst_20 = arith.constant dense<0.000000e+00> : vector<2x8x32xf32>
    %52 = tpu.matmul %51, %38, %cst_20 {dimension_numbers = #tpu.dot_dimension_numbers<[2], [1], [1], [2], [0, 0, 0, 1, 1, 2], [0], [0]>} : vector<2x8x8xf32>, vector<2x8x32xf32>, vector<2x8x32xf32> -> vector<2x8x32xf32>
    "tpu.trace_stop"() : () -> ()
    %53 = vector.shape_cast %52 : vector<2x8x32xf32> to vector<16x32xf32>
    %54 = arith.truncf %53 : vector<16x32xf32> to vector<16x32xbf16>
    %c0_21 = arith.constant 0 : index
    %c0_22 = arith.constant 0 : index
    %55 = vector.load %arg20[%c0_21, %c0_22] : memref<16x128xbf16, #tpu.memory_space<vmem>>, vector<16x32xbf16>
    tpu.vector_store %arg20[%c0_21, %c0_22], %54 {strides = array<i32>} : memref<16x128xbf16, #tpu.memory_space<vmem>>, vector<16x32xbf16>,
    %56 = vector.extract_strided_slice %32 {offsets = [0, 32], sizes = [16, 32], strides = [1, 1]} : vector<16x384xf32> to vector<16x32xf32>
    %57 = vector.shape_cast %56 : vector<16x32xf32> to vector<2x8x32xf32>
    %58 = vector.extract_strided_slice %32 {offsets = [0, 160], sizes = [16, 32], strides = [1, 1]} : vector<16x384xf32> to vector<16x32xf32>
    %59 = vector.shape_cast %58 : vector<16x32xf32> to vector<2x8x32xf32>
    %60 = vector.extract_strided_slice %32 {offsets = [0, 288], sizes = [16, 32], strides = [1, 1]} : vector<16x384xf32> to vector<16x32xf32>
    %61 = vector.shape_cast %60 : vector<16x32xf32> to vector<2x8x32xf32>
    "tpu.trace_start"() <{level = 10 : i32, message = "bqd,bkd->bqk"}> : () -> ()
    %cst_23 = arith.constant dense<0.000000e+00> : vector<2x8x8xf32>
    %62 = tpu.matmul %57, %59, %cst_23 {dimension_numbers = #tpu.dot_dimension_numbers<[2], [2], [1], [1], [0, 0, 0, 1, 1, 1], [0], [0]>} : vector<2x8x32xf32>, vector<2x8x32xf32>, vector<2x8x8xf32> -> vector<2x8x8xf32>
    "tpu.trace_stop"() : () -> ()
    %cst_24 = arith.constant 0.176776692 : f32
    %63 = vector.broadcast %cst_24 : f32 to vector<2x8x8xf32>
    %64 = arith.mulf %62, %63 : vector<2x8x8xf32>
    %cst_25 = arith.constant dense<0xFF800000> : vector<2x8xf32>
    %65 = vector.multi_reduction <maximumf>, %64, %cst_25 [2] : vector<2x8x8xf32> to vector<2x8xf32>
    %66 = vector.shape_cast %65 : vector<2x8xf32> to vector<2x8x1xf32>
    %67 = vector.broadcast %66 : vector<2x8x1xf32> to vector<2x8x8xf32>
    %68 = arith.subf %64, %67 : vector<2x8x8xf32>
    %69 = math.exp %68 : vector<2x8x8xf32>
    %cst_26 = arith.constant dense<0.000000e+00> : vector<2x8xf32>
    %70 = vector.multi_reduction <add>, %69, %cst_26 [2] : vector<2x8x8xf32> to vector<2x8xf32>
    %71 = vector.shape_cast %70 : vector<2x8xf32> to vector<2x8x1xf32>
    %72 = tpu.reciprocal %71 {approx = true} : vector<2x8x1xf32> -> vector<2x8x1xf32>
    %73 = vector.broadcast %72 : vector<2x8x1xf32> to vector<2x8x8xf32>
    %74 = arith.mulf %69, %73 : vector<2x8x8xf32>
    "tpu.trace_start"() <{level = 10 : i32, message = "bqk,bkd->bqd"}> : () -> ()
    %cst_27 = arith.constant dense<0.000000e+00> : vector<2x8x32xf32>
    %75 = tpu.matmul %74, %61, %cst_27 {dimension_numbers = #tpu.dot_dimension_numbers<[2], [1], [1], [2], [0, 0, 0, 1, 1, 2], [0], [0]>} : vector<2x8x8xf32>, vector<2x8x32xf32>, vector<2x8x32xf32> -> vector<2x8x32xf32>
    "tpu.trace_stop"() : () -> ()
    %76 = vector.shape_cast %75 : vector<2x8x32xf32> to vector<16x32xf32>
    %77 = arith.truncf %76 : vector<16x32xf32> to vector<16x32xbf16>
    %c0_28 = arith.constant 0 : index
    %c32 = arith.constant 32 : index
    %78 = vector.load %arg20[%c0_28, %c32] : memref<16x128xbf16, #tpu.memory_space<vmem>>, vector<16x32xbf16>
    tpu.vector_store %arg20[%c0_28, %c32], %77 {strides = array<i32>} : memref<16x128xbf16, #tpu.memory_space<vmem>>, vector<16x32xbf16>,
    %79 = vector.extract_strided_slice %32 {offsets = [0, 64], sizes = [16, 32], strides = [1, 1]} : vector<16x384xf32> to vector<16x32xf32>
    %80 = vector.shape_cast %79 : vector<16x32xf32> to vector<2x8x32xf32>
    %81 = vector.extract_strided_slice %32 {offsets = [0, 192], sizes = [16, 32], strides = [1, 1]} : vector<16x384xf32> to vector<16x32xf32>
    %82 = vector.shape_cast %81 : vector<16x32xf32> to vector<2x8x32xf32>
    %83 = vector.extract_strided_slice %32 {offsets = [0, 320], sizes = [16, 32], strides = [1, 1]} : vector<16x384xf32> to vector<16x32xf32>
    %84 = vector.shape_cast %83 : vector<16x32xf32> to vector<2x8x32xf32>
    "tpu.trace_start"() <{level = 10 : i32, message = "bqd,bkd->bqk"}> : () -> ()
    %cst_29 = arith.constant dense<0.000000e+00> : vector<2x8x8xf32>
    %85 = tpu.matmul %80, %82, %cst_29 {dimension_numbers = #tpu.dot_dimension_numbers<[2], [2], [1], [1], [0, 0, 0, 1, 1, 1], [0], [0]>} : vector<2x8x32xf32>, vector<2x8x32xf32>, vector<2x8x8xf32> -> vector<2x8x8xf32>
    "tpu.trace_stop"() : () -> ()
    %cst_30 = arith.constant 0.176776692 : f32
    %86 = vector.broadcast %cst_30 : f32 to vector<2x8x8xf32>
    %87 = arith.mulf %85, %86 : vector<2x8x8xf32>
    %cst_31 = arith.constant dense<0xFF800000> : vector<2x8xf32>
    %88 = vector.multi_reduction <maximumf>, %87, %cst_31 [2] : vector<2x8x8xf32> to vector<2x8xf32>
    %89 = vector.shape_cast %88 : vector<2x8xf32> to vector<2x8x1xf32>
    %90 = vector.broadcast %89 : vector<2x8x1xf32> to vector<2x8x8xf32>
    %91 = arith.subf %87, %90 : vector<2x8x8xf32>
    %92 = math.exp %91 : vector<2x8x8xf32>
    %cst_32 = arith.constant dense<0.000000e+00> : vector<2x8xf32>
    %93 = vector.multi_reduction <add>, %92, %cst_32 [2] : vector<2x8x8xf32> to vector<2x8xf32>
    %94 = vector.shape_cast %93 : vector<2x8xf32> to vector<2x8x1xf32>
    %95 = tpu.reciprocal %94 {approx = true} : vector<2x8x1xf32> -> vector<2x8x1xf32>
    %96 = vector.broadcast %95 : vector<2x8x1xf32> to vector<2x8x8xf32>
    %97 = arith.mulf %92, %96 : vector<2x8x8xf32>
    "tpu.trace_start"() <{level = 10 : i32, message = "bqk,bkd->bqd"}> : () -> ()
    %cst_33 = arith.constant dense<0.000000e+00> : vector<2x8x32xf32>
    %98 = tpu.matmul %97, %84, %cst_33 {dimension_numbers = #tpu.dot_dimension_numbers<[2], [1], [1], [2], [0, 0, 0, 1, 1, 2], [0], [0]>} : vector<2x8x8xf32>, vector<2x8x32xf32>, vector<2x8x32xf32> -> vector<2x8x32xf32>
    "tpu.trace_stop"() : () -> ()
    %99 = vector.shape_cast %98 : vector<2x8x32xf32> to vector<16x32xf32>
    %100 = arith.truncf %99 : vector<16x32xf32> to vector<16x32xbf16>
    %c0_34 = arith.constant 0 : index
    %c64 = arith.constant 64 : index
    %101 = vector.load %arg20[%c0_34, %c64] : memref<16x128xbf16, #tpu.memory_space<vmem>>, vector<16x32xbf16>
    tpu.vector_store %arg20[%c0_34, %c64], %100 {strides = array<i32>} : memref<16x128xbf16, #tpu.memory_space<vmem>>, vector<16x32xbf16>,
    %102 = vector.extract_strided_slice %32 {offsets = [0, 96], sizes = [16, 32], strides = [1, 1]} : vector<16x384xf32> to vector<16x32xf32>
    %103 = vector.shape_cast %102 : vector<16x32xf32> to vector<2x8x32xf32>
    %104 = vector.extract_strided_slice %32 {offsets = [0, 224], sizes = [16, 32], strides = [1, 1]} : vector<16x384xf32> to vector<16x32xf32>
    %105 = vector.shape_cast %104 : vector<16x32xf32> to vector<2x8x32xf32>
    %106 = vector.extract_strided_slice %32 {offsets = [0, 352], sizes = [16, 32], strides = [1, 1]} : vector<16x384xf32> to vector<16x32xf32>
    %107 = vector.shape_cast %106 : vector<16x32xf32> to vector<2x8x32xf32>
    "tpu.trace_start"() <{level = 10 : i32, message = "bqd,bkd->bqk"}> : () -> ()
    %cst_35 = arith.constant dense<0.000000e+00> : vector<2x8x8xf32>
    %108 = tpu.matmul %103, %105, %cst_35 {dimension_numbers = #tpu.dot_dimension_numbers<[2], [2], [1], [1], [0, 0, 0, 1, 1, 1], [0], [0]>} : vector<2x8x32xf32>, vector<2x8x32xf32>, vector<2x8x8xf32> -> vector<2x8x8xf32>
    "tpu.trace_stop"() : () -> ()
    %cst_36 = arith.constant 0.176776692 : f32
    %109 = vector.broadcast %cst_36 : f32 to vector<2x8x8xf32>
    %110 = arith.mulf %108, %109 : vector<2x8x8xf32>
    %cst_37 = arith.constant dense<0xFF800000> : vector<2x8xf32>
    %111 = vector.multi_reduction <maximumf>, %110, %cst_37 [2] : vector<2x8x8xf32> to vector<2x8xf32>
    %112 = vector.shape_cast %111 : vector<2x8xf32> to vector<2x8x1xf32>
    %113 = vector.broadcast %112 : vector<2x8x1xf32> to vector<2x8x8xf32>
    %114 = arith.subf %110, %113 : vector<2x8x8xf32>
    %115 = math.exp %114 : vector<2x8x8xf32>
    %cst_38 = arith.constant dense<0.000000e+00> : vector<2x8xf32>
    %116 = vector.multi_reduction <add>, %115, %cst_38 [2] : vector<2x8x8xf32> to vector<2x8xf32>
    %117 = vector.shape_cast %116 : vector<2x8xf32> to vector<2x8x1xf32>
    %118 = tpu.reciprocal %117 {approx = true} : vector<2x8x1xf32> -> vector<2x8x1xf32>
    %119 = vector.broadcast %118 : vector<2x8x1xf32> to vector<2x8x8xf32>
    %120 = arith.mulf %115, %119 : vector<2x8x8xf32>
    "tpu.trace_start"() <{level = 10 : i32, message = "bqk,bkd->bqd"}> : () -> ()
    %cst_39 = arith.constant dense<0.000000e+00> : vector<2x8x32xf32>
    %121 = tpu.matmul %120, %107, %cst_39 {dimension_numbers = #tpu.dot_dimension_numbers<[2], [1], [1], [2], [0, 0, 0, 1, 1, 2], [0], [0]>} : vector<2x8x8xf32>, vector<2x8x32xf32>, vector<2x8x32xf32> -> vector<2x8x32xf32>
    "tpu.trace_stop"() : () -> ()
    %122 = vector.shape_cast %121 : vector<2x8x32xf32> to vector<16x32xf32>
    %123 = arith.truncf %122 : vector<16x32xf32> to vector<16x32xbf16>
    %c0_40 = arith.constant 0 : index
    %c96 = arith.constant 96 : index
    %124 = vector.load %arg20[%c0_40, %c96] : memref<16x128xbf16, #tpu.memory_space<vmem>>, vector<16x32xbf16>
    tpu.vector_store %arg20[%c0_40, %c96], %123 {strides = array<i32>} : memref<16x128xbf16, #tpu.memory_space<vmem>>, vector<16x32xbf16>,
    %c0_41 = arith.constant 0 : index
    %c0_42 = arith.constant 0 : index
    %125 = vector.load %arg20[%c0_41, %c0_42] : memref<16x128xbf16, #tpu.memory_space<vmem>>, vector<16x128xbf16>
    %c0_43 = arith.constant 0 : index
    %c0_44 = arith.constant 0 : index
    %c0_45 = arith.constant 0 : index
    %126 = vector.load %arg5[%c0_43, %c0_44, %c0_45] : memref<2x128x128xbf16, #tpu.memory_space<vmem>>, vector<1x128x128xbf16>
    %127 = vector.shape_cast %126 : vector<1x128x128xbf16> to vector<128x128xbf16>
    %cst_46 = arith.constant dense<0.000000e+00> : vector<16x128xf32>
    %128 = tpu.matmul %125, %127, %cst_46 {dimension_numbers = #tpu.dot_dimension_numbers<[1], [0], [0], [1], [0, 0, 1, 1], [], []>} : vector<16x128xbf16>, vector<128x128xbf16>, vector<16x128xf32> -> vector<16x128xf32>
    %c0_47 = arith.constant 0 : index
    %c0_48 = arith.constant 0 : index
    %c0_49 = arith.constant 0 : index
    %129 = vector.load %arg6[%c0_47, %c0_48, %c0_49] : memref<2x1x128xf32, #tpu.memory_space<vmem>>, vector<1x1x128xf32>
    %130 = vector.shape_cast %129 : vector<1x1x128xf32> to vector<1x128xf32>
    %131 = vector.broadcast %130 : vector<1x128xf32> to vector<16x128xf32>
    %132 = arith.addf %128, %131 : vector<16x128xf32>
    %133 = arith.addf %24, %132 : vector<16x128xf32>
    %c0_50 = arith.constant 0 : index
    %c0_51 = arith.constant 0 : index
    %c0_52 = arith.constant 0 : index
    %134 = vector.load %arg7[%c0_50, %c0_51, %c0_52] : memref<2x1x128xf32, #tpu.memory_space<vmem>>, vector<1x1x128xf32>
    %135 = vector.shape_cast %134 : vector<1x1x128xf32> to vector<1x128xf32>
    %c0_53 = arith.constant 0 : index
    %c0_54 = arith.constant 0 : index
    %c0_55 = arith.constant 0 : index
    %136 = vector.load %arg8[%c0_53, %c0_54, %c0_55] : memref<2x1x128xf32, #tpu.memory_space<vmem>>, vector<1x1x128xf32>
    %137 = vector.shape_cast %136 : vector<1x1x128xf32> to vector<1x128xf32>
    %cst_56 = arith.constant dense<0.000000e+00> : vector<16xf32>
    %138 = vector.multi_reduction <add>, %133, %cst_56 [1] : vector<16x128xf32> to vector<16xf32>
    %139 = vector.shape_cast %138 : vector<16xf32> to vector<16x1xf32>
    %cst_57 = arith.constant 1.280000e+02 : f32
    %140 = vector.broadcast %cst_57 : f32 to vector<16x1xf32>
    %141 = arith.divf %139, %140 : vector<16x1xf32>
    %142 = vector.broadcast %141 : vector<16x1xf32> to vector<16x128xf32>
    %143 = arith.subf %133, %142 : vector<16x128xf32>
    %144 = arith.mulf %143, %143 : vector<16x128xf32>
    %cst_58 = arith.constant dense<0.000000e+00> : vector<16xf32>
    %145 = vector.multi_reduction <add>, %144, %cst_58 [1] : vector<16x128xf32> to vector<16xf32>
    %146 = vector.shape_cast %145 : vector<16xf32> to vector<16x1xf32>
    %cst_59 = arith.constant 1.280000e+02 : f32
    %147 = vector.broadcast %cst_59 : f32 to vector<16x1xf32>
    %148 = arith.divf %146, %147 : vector<16x1xf32>
    %149 = vector.broadcast %141 : vector<16x1xf32> to vector<16x128xf32>
    %150 = arith.subf %133, %149 : vector<16x128xf32>
    %cst_60 = arith.constant 9.99999996E-13 : f32
    %151 = vector.broadcast %cst_60 : f32 to vector<16x1xf32>
    %152 = arith.addf %148, %151 : vector<16x1xf32>
    %153 = math.rsqrt %152 : vector<16x1xf32>
    %154 = vector.broadcast %153 : vector<16x1xf32> to vector<16x128xf32>
    %155 = arith.mulf %150, %154 : vector<16x128xf32>
    %156 = vector.broadcast %135 : vector<1x128xf32> to vector<16x128xf32>
    %157 = arith.mulf %155, %156 : vector<16x128xf32>
    %158 = vector.broadcast %137 : vector<1x128xf32> to vector<16x128xf32>
    %159 = arith.addf %157, %158 : vector<16x128xf32>
    %160 = arith.truncf %159 : vector<16x128xf32> to vector<16x128xbf16>
    %c0_61 = arith.constant 0 : index
    %c0_62 = arith.constant 0 : index
    %c0_63 = arith.constant 0 : index
    %161 = vector.load %arg9[%c0_61, %c0_62, %c0_63] : memref<2x128x512xbf16, #tpu.memory_space<vmem>>, vector<1x128x512xbf16>
    %162 = vector.shape_cast %161 : vector<1x128x512xbf16> to vector<128x512xbf16>
    %cst_64 = arith.constant dense<0.000000e+00> : vector<16x512xf32>
    %163 = tpu.matmul %160, %162, %cst_64 {dimension_numbers = #tpu.dot_dimension_numbers<[1], [0], [0], [1], [0, 0, 1, 1], [], []>} : vector<16x128xbf16>, vector<128x512xbf16>, vector<16x512xf32> -> vector<16x512xf32>
    %c0_65 = arith.constant 0 : index
    %c0_66 = arith.constant 0 : index
    %c0_67 = arith.constant 0 : index
    %164 = vector.load %arg10[%c0_65, %c0_66, %c0_67] : memref<2x1x512xf32, #tpu.memory_space<vmem>>, vector<1x1x512xf32>
    %165 = vector.shape_cast %164 : vector<1x1x512xf32> to vector<1x512xf32>
    %166 = vector.broadcast %165 : vector<1x512xf32> to vector<16x512xf32>
    %167 = arith.addf %163, %166 : vector<16x512xf32>
    %168 = arith.mulf %167, %167 : vector<16x512xf32>
    %169 = arith.mulf %167, %168 : vector<16x512xf32>
    %cst_68 = arith.constant 4.471500e-02 : f32
    %170 = vector.broadcast %cst_68 : f32 to vector<16x512xf32>
    %171 = arith.mulf %170, %169 : vector<16x512xf32>
    %172 = arith.addf %167, %171 : vector<16x512xf32>
    %cst_69 = arith.constant 0.797884583 : f32
    %173 = vector.broadcast %cst_69 : f32 to vector<16x512xf32>
    %174 = arith.mulf %173, %172 : vector<16x512xf32>
    %175 = math.tanh %174 : vector<16x512xf32>
    %cst_70 = arith.constant 1.000000e+00 : f32
    %176 = vector.broadcast %cst_70 : f32 to vector<16x512xf32>
    %177 = arith.addf %176, %175 : vector<16x512xf32>
    %cst_71 = arith.constant 5.000000e-01 : f32
    %178 = vector.broadcast %cst_71 : f32 to vector<16x512xf32>
    %179 = arith.mulf %178, %177 : vector<16x512xf32>
    %180 = arith.mulf %167, %179 : vector<16x512xf32>
    %181 = arith.truncf %180 : vector<16x512xf32> to vector<16x512xbf16>
    %c0_72 = arith.constant 0 : index
    %c0_73 = arith.constant 0 : index
    %c0_74 = arith.constant 0 : index
    %182 = vector.load %arg11[%c0_72, %c0_73, %c0_74] : memref<2x512x128xbf16, #tpu.memory_space<vmem>>, vector<1x512x128xbf16>
    %183 = vector.shape_cast %182 : vector<1x512x128xbf16> to vector<512x128xbf16>
    %cst_75 = arith.constant dense<0.000000e+00> : vector<16x128xf32>
    %184 = tpu.matmul %181, %183, %cst_75 {dimension_numbers = #tpu.dot_dimension_numbers<[1], [0], [0], [1], [0, 0, 1, 1], [], []>} : vector<16x512xbf16>, vector<512x128xbf16>, vector<16x128xf32> -> vector<16x128xf32>
    %c0_76 = arith.constant 0 : index
    %c0_77 = arith.constant 0 : index
    %c0_78 = arith.constant 0 : index
    %185 = vector.load %arg12[%c0_76, %c0_77, %c0_78] : memref<2x1x128xf32, #tpu.memory_space<vmem>>, vector<1x1x128xf32>
    %186 = vector.shape_cast %185 : vector<1x1x128xf32> to vector<1x128xf32>
    %187 = vector.broadcast %186 : vector<1x128xf32> to vector<16x128xf32>
    %188 = arith.addf %184, %187 : vector<16x128xf32>
    %189 = arith.addf %159, %188 : vector<16x128xf32>
    %c0_79 = arith.constant 0 : index
    %c0_80 = arith.constant 0 : index
    %c0_81 = arith.constant 0 : index
    %190 = vector.load %arg13[%c0_79, %c0_80, %c0_81] : memref<2x1x128xf32, #tpu.memory_space<vmem>>, vector<1x1x128xf32>
    %191 = vector.shape_cast %190 : vector<1x1x128xf32> to vector<1x128xf32>
    %c0_82 = arith.constant 0 : index
    %c0_83 = arith.constant 0 : index
    %c0_84 = arith.constant 0 : index
    %192 = vector.load %arg14[%c0_82, %c0_83, %c0_84] : memref<2x1x128xf32, #tpu.memory_space<vmem>>, vector<1x1x128xf32>
    %193 = vector.shape_cast %192 : vector<1x1x128xf32> to vector<1x128xf32>
    %cst_85 = arith.constant dense<0.000000e+00> : vector<16xf32>
    %194 = vector.multi_reduction <add>, %189, %cst_85 [1] : vector<16x128xf32> to vector<16xf32>
    %195 = vector.shape_cast %194 : vector<16xf32> to vector<16x1xf32>
    %cst_86 = arith.constant 1.280000e+02 : f32
    %196 = vector.broadcast %cst_86 : f32 to vector<16x1xf32>
    %197 = arith.divf %195, %196 : vector<16x1xf32>
    %198 = vector.broadcast %197 : vector<16x1xf32> to vector<16x128xf32>
    %199 = arith.subf %189, %198 : vector<16x128xf32>
    %200 = arith.mulf %199, %199 : vector<16x128xf32>
    %cst_87 = arith.constant dense<0.000000e+00> : vector<16xf32>
    %201 = vector.multi_reduction <add>, %200, %cst_87 [1] : vector<16x128xf32> to vector<16xf32>
    %202 = vector.shape_cast %201 : vector<16xf32> to vector<16x1xf32>
    %cst_88 = arith.constant 1.280000e+02 : f32
    %203 = vector.broadcast %cst_88 : f32 to vector<16x1xf32>
    %204 = arith.divf %202, %203 : vector<16x1xf32>
    %205 = vector.broadcast %197 : vector<16x1xf32> to vector<16x128xf32>
    %206 = arith.subf %189, %205 : vector<16x128xf32>
    %cst_89 = arith.constant 9.99999996E-13 : f32
    %207 = vector.broadcast %cst_89 : f32 to vector<16x1xf32>
    %208 = arith.addf %204, %207 : vector<16x1xf32>
    %209 = math.rsqrt %208 : vector<16x1xf32>
    %210 = vector.broadcast %209 : vector<16x1xf32> to vector<16x128xf32>
    %211 = arith.mulf %206, %210 : vector<16x128xf32>
    %212 = vector.broadcast %191 : vector<1x128xf32> to vector<16x128xf32>
    %213 = arith.mulf %211, %212 : vector<16x128xf32>
    %214 = vector.broadcast %193 : vector<1x128xf32> to vector<16x128xf32>
    %215 = arith.addf %213, %214 : vector<16x128xf32>
    %216 = arith.truncf %215 : vector<16x128xf32> to vector<16x128xbf16>
    %c1 = arith.constant 1 : index
    %c0_90 = arith.constant 0 : index
    %c0_91 = arith.constant 0 : index
    %217 = vector.load %arg3[%c1, %c0_90, %c0_91] : memref<2x128x384xbf16, #tpu.memory_space<vmem>>, vector<1x128x384xbf16>
    %218 = vector.shape_cast %217 : vector<1x128x384xbf16> to vector<128x384xbf16>
    %cst_92 = arith.constant dense<0.000000e+00> : vector<16x384xf32>
    %219 = tpu.matmul %216, %218, %cst_92 {dimension_numbers = #tpu.dot_dimension_numbers<[1], [0], [0], [1], [0, 0, 1, 1], [], []>} : vector<16x128xbf16>, vector<128x384xbf16>, vector<16x384xf32> -> vector<16x384xf32>
    %c1_93 = arith.constant 1 : index
    %c0_94 = arith.constant 0 : index
    %c0_95 = arith.constant 0 : index
    %220 = vector.load %arg4[%c1_93, %c0_94, %c0_95] : memref<2x1x384xf32, #tpu.memory_space<vmem>>, vector<1x1x384xf32>
    %221 = vector.shape_cast %220 : vector<1x1x384xf32> to vector<1x384xf32>
    %222 = vector.broadcast %221 : vector<1x384xf32> to vector<16x384xf32>
    %223 = arith.addf %219, %222 : vector<16x384xf32>
    %224 = vector.extract_strided_slice %223 {offsets = [0, 0], sizes = [16, 32], strides = [1, 1]} : vector<16x384xf32> to vector<16x32xf32>
    %225 = vector.shape_cast %224 : vector<16x32xf32> to vector<2x8x32xf32>
    %226 = vector.extract_strided_slice %223 {offsets = [0, 128], sizes = [16, 32], strides = [1, 1]} : vector<16x384xf32> to vector<16x32xf32>
    %227 = vector.shape_cast %226 : vector<16x32xf32> to vector<2x8x32xf32>
    %228 = vector.extract_strided_slice %223 {offsets = [0, 256], sizes = [16, 32], strides = [1, 1]} : vector<16x384xf32> to vector<16x32xf32>
    %229 = vector.shape_cast %228 : vector<16x32xf32> to vector<2x8x32xf32>
    "tpu.trace_start"() <{level = 10 : i32, message = "bqd,bkd->bqk"}> : () -> ()
    %cst_96 = arith.constant dense<0.000000e+00> : vector<2x8x8xf32>
    %230 = tpu.matmul %225, %227, %cst_96 {dimension_numbers = #tpu.dot_dimension_numbers<[2], [2], [1], [1], [0, 0, 0, 1, 1, 1], [0], [0]>} : vector<2x8x32xf32>, vector<2x8x32xf32>, vector<2x8x8xf32> -> vector<2x8x8xf32>
    "tpu.trace_stop"() : () -> ()
    %cst_97 = arith.constant 0.176776692 : f32
    %231 = vector.broadcast %cst_97 : f32 to vector<2x8x8xf32>
    %232 = arith.mulf %230, %231 : vector<2x8x8xf32>
    %cst_98 = arith.constant dense<0xFF800000> : vector<2x8xf32>
    %233 = vector.multi_reduction <maximumf>, %232, %cst_98 [2] : vector<2x8x8xf32> to vector<2x8xf32>
    %234 = vector.shape_cast %233 : vector<2x8xf32> to vector<2x8x1xf32>
    %235 = vector.broadcast %234 : vector<2x8x1xf32> to vector<2x8x8xf32>
    %236 = arith.subf %232, %235 : vector<2x8x8xf32>
    %237 = math.exp %236 : vector<2x8x8xf32>
    %cst_99 = arith.constant dense<0.000000e+00> : vector<2x8xf32>
    %238 = vector.multi_reduction <add>, %237, %cst_99 [2] : vector<2x8x8xf32> to vector<2x8xf32>
    %239 = vector.shape_cast %238 : vector<2x8xf32> to vector<2x8x1xf32>
    %240 = tpu.reciprocal %239 {approx = true} : vector<2x8x1xf32> -> vector<2x8x1xf32>
    %241 = vector.broadcast %240 : vector<2x8x1xf32> to vector<2x8x8xf32>
    %242 = arith.mulf %237, %241 : vector<2x8x8xf32>
    "tpu.trace_start"() <{level = 10 : i32, message = "bqk,bkd->bqd"}> : () -> ()
    %cst_100 = arith.constant dense<0.000000e+00> : vector<2x8x32xf32>
    %243 = tpu.matmul %242, %229, %cst_100 {dimension_numbers = #tpu.dot_dimension_numbers<[2], [1], [1], [2], [0, 0, 0, 1, 1, 2], [0], [0]>} : vector<2x8x8xf32>, vector<2x8x32xf32>, vector<2x8x32xf32> -> vector<2x8x32xf32>
    "tpu.trace_stop"() : () -> ()
    %244 = vector.shape_cast %243 : vector<2x8x32xf32> to vector<16x32xf32>
    %245 = arith.truncf %244 : vector<16x32xf32> to vector<16x32xbf16>
    %c0_101 = arith.constant 0 : index
    %c0_102 = arith.constant 0 : index
    %246 = vector.load %arg20[%c0_101, %c0_102] : memref<16x128xbf16, #tpu.memory_space<vmem>>, vector<16x32xbf16>
    tpu.vector_store %arg20[%c0_101, %c0_102], %245 {strides = array<i32>} : memref<16x128xbf16, #tpu.memory_space<vmem>>, vector<16x32xbf16>,
    %247 = vector.extract_strided_slice %223 {offsets = [0, 32], sizes = [16, 32], strides = [1, 1]} : vector<16x384xf32> to vector<16x32xf32>
    %248 = vector.shape_cast %247 : vector<16x32xf32> to vector<2x8x32xf32>
    %249 = vector.extract_strided_slice %223 {offsets = [0, 160], sizes = [16, 32], strides = [1, 1]} : vector<16x384xf32> to vector<16x32xf32>
    %250 = vector.shape_cast %249 : vector<16x32xf32> to vector<2x8x32xf32>
    %251 = vector.extract_strided_slice %223 {offsets = [0, 288], sizes = [16, 32], strides = [1, 1]} : vector<16x384xf32> to vector<16x32xf32>
    %252 = vector.shape_cast %251 : vector<16x32xf32> to vector<2x8x32xf32>
    "tpu.trace_start"() <{level = 10 : i32, message = "bqd,bkd->bqk"}> : () -> ()
    %cst_103 = arith.constant dense<0.000000e+00> : vector<2x8x8xf32>
    %253 = tpu.matmul %248, %250, %cst_103 {dimension_numbers = #tpu.dot_dimension_numbers<[2], [2], [1], [1], [0, 0, 0, 1, 1, 1], [0], [0]>} : vector<2x8x32xf32>, vector<2x8x32xf32>, vector<2x8x8xf32> -> vector<2x8x8xf32>
    "tpu.trace_stop"() : () -> ()
    %cst_104 = arith.constant 0.176776692 : f32
    %254 = vector.broadcast %cst_104 : f32 to vector<2x8x8xf32>
    %255 = arith.mulf %253, %254 : vector<2x8x8xf32>
    %cst_105 = arith.constant dense<0xFF800000> : vector<2x8xf32>
    %256 = vector.multi_reduction <maximumf>, %255, %cst_105 [2] : vector<2x8x8xf32> to vector<2x8xf32>
    %257 = vector.shape_cast %256 : vector<2x8xf32> to vector<2x8x1xf32>
    %258 = vector.broadcast %257 : vector<2x8x1xf32> to vector<2x8x8xf32>
    %259 = arith.subf %255, %258 : vector<2x8x8xf32>
    %260 = math.exp %259 : vector<2x8x8xf32>
    %cst_106 = arith.constant dense<0.000000e+00> : vector<2x8xf32>
    %261 = vector.multi_reduction <add>, %260, %cst_106 [2] : vector<2x8x8xf32> to vector<2x8xf32>
    %262 = vector.shape_cast %261 : vector<2x8xf32> to vector<2x8x1xf32>
    %263 = tpu.reciprocal %262 {approx = true} : vector<2x8x1xf32> -> vector<2x8x1xf32>
    %264 = vector.broadcast %263 : vector<2x8x1xf32> to vector<2x8x8xf32>
    %265 = arith.mulf %260, %264 : vector<2x8x8xf32>
    "tpu.trace_start"() <{level = 10 : i32, message = "bqk,bkd->bqd"}> : () -> ()
    %cst_107 = arith.constant dense<0.000000e+00> : vector<2x8x32xf32>
    %266 = tpu.matmul %265, %252, %cst_107 {dimension_numbers = #tpu.dot_dimension_numbers<[2], [1], [1], [2], [0, 0, 0, 1, 1, 2], [0], [0]>} : vector<2x8x8xf32>, vector<2x8x32xf32>, vector<2x8x32xf32> -> vector<2x8x32xf32>
    "tpu.trace_stop"() : () -> ()
    %267 = vector.shape_cast %266 : vector<2x8x32xf32> to vector<16x32xf32>
    %268 = arith.truncf %267 : vector<16x32xf32> to vector<16x32xbf16>
    %c0_108 = arith.constant 0 : index
    %c32_109 = arith.constant 32 : index
    %269 = vector.load %arg20[%c0_108, %c32_109] : memref<16x128xbf16, #tpu.memory_space<vmem>>, vector<16x32xbf16>
    tpu.vector_store %arg20[%c0_108, %c32_109], %268 {strides = array<i32>} : memref<16x128xbf16, #tpu.memory_space<vmem>>, vector<16x32xbf16>,
    %270 = vector.extract_strided_slice %223 {offsets = [0, 64], sizes = [16, 32], strides = [1, 1]} : vector<16x384xf32> to vector<16x32xf32>
    %271 = vector.shape_cast %270 : vector<16x32xf32> to vector<2x8x32xf32>
    %272 = vector.extract_strided_slice %223 {offsets = [0, 192], sizes = [16, 32], strides = [1, 1]} : vector<16x384xf32> to vector<16x32xf32>
    %273 = vector.shape_cast %272 : vector<16x32xf32> to vector<2x8x32xf32>
    %274 = vector.extract_strided_slice %223 {offsets = [0, 320], sizes = [16, 32], strides = [1, 1]} : vector<16x384xf32> to vector<16x32xf32>
    %275 = vector.shape_cast %274 : vector<16x32xf32> to vector<2x8x32xf32>
    "tpu.trace_start"() <{level = 10 : i32, message = "bqd,bkd->bqk"}> : () -> ()
    %cst_110 = arith.constant dense<0.000000e+00> : vector<2x8x8xf32>
    %276 = tpu.matmul %271, %273, %cst_110 {dimension_numbers = #tpu.dot_dimension_numbers<[2], [2], [1], [1], [0, 0, 0, 1, 1, 1], [0], [0]>} : vector<2x8x32xf32>, vector<2x8x32xf32>, vector<2x8x8xf32> -> vector<2x8x8xf32>
    "tpu.trace_stop"() : () -> ()
    %cst_111 = arith.constant 0.176776692 : f32
    %277 = vector.broadcast %cst_111 : f32 to vector<2x8x8xf32>
    %278 = arith.mulf %276, %277 : vector<2x8x8xf32>
    %cst_112 = arith.constant dense<0xFF800000> : vector<2x8xf32>
    %279 = vector.multi_reduction <maximumf>, %278, %cst_112 [2] : vector<2x8x8xf32> to vector<2x8xf32>
    %280 = vector.shape_cast %279 : vector<2x8xf32> to vector<2x8x1xf32>
    %281 = vector.broadcast %280 : vector<2x8x1xf32> to vector<2x8x8xf32>
    %282 = arith.subf %278, %281 : vector<2x8x8xf32>
    %283 = math.exp %282 : vector<2x8x8xf32>
    %cst_113 = arith.constant dense<0.000000e+00> : vector<2x8xf32>
    %284 = vector.multi_reduction <add>, %283, %cst_113 [2] : vector<2x8x8xf32> to vector<2x8xf32>
    %285 = vector.shape_cast %284 : vector<2x8xf32> to vector<2x8x1xf32>
    %286 = tpu.reciprocal %285 {approx = true} : vector<2x8x1xf32> -> vector<2x8x1xf32>
    %287 = vector.broadcast %286 : vector<2x8x1xf32> to vector<2x8x8xf32>
    %288 = arith.mulf %283, %287 : vector<2x8x8xf32>
    "tpu.trace_start"() <{level = 10 : i32, message = "bqk,bkd->bqd"}> : () -> ()
    %cst_114 = arith.constant dense<0.000000e+00> : vector<2x8x32xf32>
    %289 = tpu.matmul %288, %275, %cst_114 {dimension_numbers = #tpu.dot_dimension_numbers<[2], [1], [1], [2], [0, 0, 0, 1, 1, 2], [0], [0]>} : vector<2x8x8xf32>, vector<2x8x32xf32>, vector<2x8x32xf32> -> vector<2x8x32xf32>
    "tpu.trace_stop"() : () -> ()
    %290 = vector.shape_cast %289 : vector<2x8x32xf32> to vector<16x32xf32>
    %291 = arith.truncf %290 : vector<16x32xf32> to vector<16x32xbf16>
    %c0_115 = arith.constant 0 : index
    %c64_116 = arith.constant 64 : index
    %292 = vector.load %arg20[%c0_115, %c64_116] : memref<16x128xbf16, #tpu.memory_space<vmem>>, vector<16x32xbf16>
    tpu.vector_store %arg20[%c0_115, %c64_116], %291 {strides = array<i32>} : memref<16x128xbf16, #tpu.memory_space<vmem>>, vector<16x32xbf16>,
    %293 = vector.extract_strided_slice %223 {offsets = [0, 96], sizes = [16, 32], strides = [1, 1]} : vector<16x384xf32> to vector<16x32xf32>
    %294 = vector.shape_cast %293 : vector<16x32xf32> to vector<2x8x32xf32>
    %295 = vector.extract_strided_slice %223 {offsets = [0, 224], sizes = [16, 32], strides = [1, 1]} : vector<16x384xf32> to vector<16x32xf32>
    %296 = vector.shape_cast %295 : vector<16x32xf32> to vector<2x8x32xf32>
    %297 = vector.extract_strided_slice %223 {offsets = [0, 352], sizes = [16, 32], strides = [1, 1]} : vector<16x384xf32> to vector<16x32xf32>
    %298 = vector.shape_cast %297 : vector<16x32xf32> to vector<2x8x32xf32>
    "tpu.trace_start"() <{level = 10 : i32, message = "bqd,bkd->bqk"}> : () -> ()
    %cst_117 = arith.constant dense<0.000000e+00> : vector<2x8x8xf32>
    %299 = tpu.matmul %294, %296, %cst_117 {dimension_numbers = #tpu.dot_dimension_numbers<[2], [2], [1], [1], [0, 0, 0, 1, 1, 1], [0], [0]>} : vector<2x8x32xf32>, vector<2x8x32xf32>, vector<2x8x8xf32> -> vector<2x8x8xf32>
    "tpu.trace_stop"() : () -> ()
    %cst_118 = arith.constant 0.176776692 : f32
    %300 = vector.broadcast %cst_118 : f32 to vector<2x8x8xf32>
    %301 = arith.mulf %299, %300 : vector<2x8x8xf32>
    %cst_119 = arith.constant dense<0xFF800000> : vector<2x8xf32>
    %302 = vector.multi_reduction <maximumf>, %301, %cst_119 [2] : vector<2x8x8xf32> to vector<2x8xf32>
    %303 = vector.shape_cast %302 : vector<2x8xf32> to vector<2x8x1xf32>
    %304 = vector.broadcast %303 : vector<2x8x1xf32> to vector<2x8x8xf32>
    %305 = arith.subf %301, %304 : vector<2x8x8xf32>
    %306 = math.exp %305 : vector<2x8x8xf32>
    %cst_120 = arith.constant dense<0.000000e+00> : vector<2x8xf32>
    %307 = vector.multi_reduction <add>, %306, %cst_120 [2] : vector<2x8x8xf32> to vector<2x8xf32>
    %308 = vector.shape_cast %307 : vector<2x8xf32> to vector<2x8x1xf32>
    %309 = tpu.reciprocal %308 {approx = true} : vector<2x8x1xf32> -> vector<2x8x1xf32>
    %310 = vector.broadcast %309 : vector<2x8x1xf32> to vector<2x8x8xf32>
    %311 = arith.mulf %306, %310 : vector<2x8x8xf32>
    "tpu.trace_start"() <{level = 10 : i32, message = "bqk,bkd->bqd"}> : () -> ()
    %cst_121 = arith.constant dense<0.000000e+00> : vector<2x8x32xf32>
    %312 = tpu.matmul %311, %298, %cst_121 {dimension_numbers = #tpu.dot_dimension_numbers<[2], [1], [1], [2], [0, 0, 0, 1, 1, 2], [0], [0]>} : vector<2x8x8xf32>, vector<2x8x32xf32>, vector<2x8x32xf32> -> vector<2x8x32xf32>
    "tpu.trace_stop"() : () -> ()
    %313 = vector.shape_cast %312 : vector<2x8x32xf32> to vector<16x32xf32>
    %314 = arith.truncf %313 : vector<16x32xf32> to vector<16x32xbf16>
    %c0_122 = arith.constant 0 : index
    %c96_123 = arith.constant 96 : index
    %315 = vector.load %arg20[%c0_122, %c96_123] : memref<16x128xbf16, #tpu.memory_space<vmem>>, vector<16x32xbf16>
    tpu.vector_store %arg20[%c0_122, %c96_123], %314 {strides = array<i32>} : memref<16x128xbf16, #tpu.memory_space<vmem>>, vector<16x32xbf16>,
    %c0_124 = arith.constant 0 : index
    %c0_125 = arith.constant 0 : index
    %316 = vector.load %arg20[%c0_124, %c0_125] : memref<16x128xbf16, #tpu.memory_space<vmem>>, vector<16x128xbf16>
    %c1_126 = arith.constant 1 : index
    %c0_127 = arith.constant 0 : index
    %c0_128 = arith.constant 0 : index
    %317 = vector.load %arg5[%c1_126, %c0_127, %c0_128] : memref<2x128x128xbf16, #tpu.memory_space<vmem>>, vector<1x128x128xbf16>
    %318 = vector.shape_cast %317 : vector<1x128x128xbf16> to vector<128x128xbf16>
    %cst_129 = arith.constant dense<0.000000e+00> : vector<16x128xf32>
    %319 = tpu.matmul %316, %318, %cst_129 {dimension_numbers = #tpu.dot_dimension_numbers<[1], [0], [0], [1], [0, 0, 1, 1], [], []>} : vector<16x128xbf16>, vector<128x128xbf16>, vector<16x128xf32> -> vector<16x128xf32>
    %c1_130 = arith.constant 1 : index
    %c0_131 = arith.constant 0 : index
    %c0_132 = arith.constant 0 : index
    %320 = vector.load %arg6[%c1_130, %c0_131, %c0_132] : memref<2x1x128xf32, #tpu.memory_space<vmem>>, vector<1x1x128xf32>
    %321 = vector.shape_cast %320 : vector<1x1x128xf32> to vector<1x128xf32>
    %322 = vector.broadcast %321 : vector<1x128xf32> to vector<16x128xf32>
    %323 = arith.addf %319, %322 : vector<16x128xf32>
    %324 = arith.addf %215, %323 : vector<16x128xf32>
    %c1_133 = arith.constant 1 : index
    %c0_134 = arith.constant 0 : index
    %c0_135 = arith.constant 0 : index
    %325 = vector.load %arg7[%c1_133, %c0_134, %c0_135] : memref<2x1x128xf32, #tpu.memory_space<vmem>>, vector<1x1x128xf32>
    %326 = vector.shape_cast %325 : vector<1x1x128xf32> to vector<1x128xf32>
    %c1_136 = arith.constant 1 : index
    %c0_137 = arith.constant 0 : index
    %c0_138 = arith.constant 0 : index
    %327 = vector.load %arg8[%c1_136, %c0_137, %c0_138] : memref<2x1x128xf32, #tpu.memory_space<vmem>>, vector<1x1x128xf32>
    %328 = vector.shape_cast %327 : vector<1x1x128xf32> to vector<1x128xf32>
    %cst_139 = arith.constant dense<0.000000e+00> : vector<16xf32>
    %329 = vector.multi_reduction <add>, %324, %cst_139 [1] : vector<16x128xf32> to vector<16xf32>
    %330 = vector.shape_cast %329 : vector<16xf32> to vector<16x1xf32>
    %cst_140 = arith.constant 1.280000e+02 : f32
    %331 = vector.broadcast %cst_140 : f32 to vector<16x1xf32>
    %332 = arith.divf %330, %331 : vector<16x1xf32>
    %333 = vector.broadcast %332 : vector<16x1xf32> to vector<16x128xf32>
    %334 = arith.subf %324, %333 : vector<16x128xf32>
    %335 = arith.mulf %334, %334 : vector<16x128xf32>
    %cst_141 = arith.constant dense<0.000000e+00> : vector<16xf32>
    %336 = vector.multi_reduction <add>, %335, %cst_141 [1] : vector<16x128xf32> to vector<16xf32>
    %337 = vector.shape_cast %336 : vector<16xf32> to vector<16x1xf32>
    %cst_142 = arith.constant 1.280000e+02 : f32
    %338 = vector.broadcast %cst_142 : f32 to vector<16x1xf32>
    %339 = arith.divf %337, %338 : vector<16x1xf32>
    %340 = vector.broadcast %332 : vector<16x1xf32> to vector<16x128xf32>
    %341 = arith.subf %324, %340 : vector<16x128xf32>
    %cst_143 = arith.constant 9.99999996E-13 : f32
    %342 = vector.broadcast %cst_143 : f32 to vector<16x1xf32>
    %343 = arith.addf %339, %342 : vector<16x1xf32>
    %344 = math.rsqrt %343 : vector<16x1xf32>
    %345 = vector.broadcast %344 : vector<16x1xf32> to vector<16x128xf32>
    %346 = arith.mulf %341, %345 : vector<16x128xf32>
    %347 = vector.broadcast %326 : vector<1x128xf32> to vector<16x128xf32>
    %348 = arith.mulf %346, %347 : vector<16x128xf32>
    %349 = vector.broadcast %328 : vector<1x128xf32> to vector<16x128xf32>
    %350 = arith.addf %348, %349 : vector<16x128xf32>
    %351 = arith.truncf %350 : vector<16x128xf32> to vector<16x128xbf16>
    %c1_144 = arith.constant 1 : index
    %c0_145 = arith.constant 0 : index
    %c0_146 = arith.constant 0 : index
    %352 = vector.load %arg9[%c1_144, %c0_145, %c0_146] : memref<2x128x512xbf16, #tpu.memory_space<vmem>>, vector<1x128x512xbf16>
    %353 = vector.shape_cast %352 : vector<1x128x512xbf16> to vector<128x512xbf16>
    %cst_147 = arith.constant dense<0.000000e+00> : vector<16x512xf32>
    %354 = tpu.matmul %351, %353, %cst_147 {dimension_numbers = #tpu.dot_dimension_numbers<[1], [0], [0], [1], [0, 0, 1, 1], [], []>} : vector<16x128xbf16>, vector<128x512xbf16>, vector<16x512xf32> -> vector<16x512xf32>
    %c1_148 = arith.constant 1 : index
    %c0_149 = arith.constant 0 : index
    %c0_150 = arith.constant 0 : index
    %355 = vector.load %arg10[%c1_148, %c0_149, %c0_150] : memref<2x1x512xf32, #tpu.memory_space<vmem>>, vector<1x1x512xf32>
    %356 = vector.shape_cast %355 : vector<1x1x512xf32> to vector<1x512xf32>
    %357 = vector.broadcast %356 : vector<1x512xf32> to vector<16x512xf32>
    %358 = arith.addf %354, %357 : vector<16x512xf32>
    %359 = arith.mulf %358, %358 : vector<16x512xf32>
    %360 = arith.mulf %358, %359 : vector<16x512xf32>
    %cst_151 = arith.constant 4.471500e-02 : f32
    %361 = vector.broadcast %cst_151 : f32 to vector<16x512xf32>
    %362 = arith.mulf %361, %360 : vector<16x512xf32>
    %363 = arith.addf %358, %362 : vector<16x512xf32>
    %cst_152 = arith.constant 0.797884583 : f32
    %364 = vector.broadcast %cst_152 : f32 to vector<16x512xf32>
    %365 = arith.mulf %364, %363 : vector<16x512xf32>
    %366 = math.tanh %365 : vector<16x512xf32>
    %cst_153 = arith.constant 1.000000e+00 : f32
    %367 = vector.broadcast %cst_153 : f32 to vector<16x512xf32>
    %368 = arith.addf %367, %366 : vector<16x512xf32>
    %cst_154 = arith.constant 5.000000e-01 : f32
    %369 = vector.broadcast %cst_154 : f32 to vector<16x512xf32>
    %370 = arith.mulf %369, %368 : vector<16x512xf32>
    %371 = arith.mulf %358, %370 : vector<16x512xf32>
    %372 = arith.truncf %371 : vector<16x512xf32> to vector<16x512xbf16>
    %c1_155 = arith.constant 1 : index
    %c0_156 = arith.constant 0 : index
    %c0_157 = arith.constant 0 : index
    %373 = vector.load %arg11[%c1_155, %c0_156, %c0_157] : memref<2x512x128xbf16, #tpu.memory_space<vmem>>, vector<1x512x128xbf16>
    %374 = vector.shape_cast %373 : vector<1x512x128xbf16> to vector<512x128xbf16>
    %cst_158 = arith.constant dense<0.000000e+00> : vector<16x128xf32>
    %375 = tpu.matmul %372, %374, %cst_158 {dimension_numbers = #tpu.dot_dimension_numbers<[1], [0], [0], [1], [0, 0, 1, 1], [], []>} : vector<16x512xbf16>, vector<512x128xbf16>, vector<16x128xf32> -> vector<16x128xf32>
    %c1_159 = arith.constant 1 : index
    %c0_160 = arith.constant 0 : index
    %c0_161 = arith.constant 0 : index
    %376 = vector.load %arg12[%c1_159, %c0_160, %c0_161] : memref<2x1x128xf32, #tpu.memory_space<vmem>>, vector<1x1x128xf32>
    %377 = vector.shape_cast %376 : vector<1x1x128xf32> to vector<1x128xf32>
    %378 = vector.broadcast %377 : vector<1x128xf32> to vector<16x128xf32>
    %379 = arith.addf %375, %378 : vector<16x128xf32>
    %380 = arith.addf %350, %379 : vector<16x128xf32>
    %c1_162 = arith.constant 1 : index
    %c0_163 = arith.constant 0 : index
    %c0_164 = arith.constant 0 : index
    %381 = vector.load %arg13[%c1_162, %c0_163, %c0_164] : memref<2x1x128xf32, #tpu.memory_space<vmem>>, vector<1x1x128xf32>
    %382 = vector.shape_cast %381 : vector<1x1x128xf32> to vector<1x128xf32>
    %c1_165 = arith.constant 1 : index
    %c0_166 = arith.constant 0 : index
    %c0_167 = arith.constant 0 : index
    %383 = vector.load %arg14[%c1_165, %c0_166, %c0_167] : memref<2x1x128xf32, #tpu.memory_space<vmem>>, vector<1x1x128xf32>
    %384 = vector.shape_cast %383 : vector<1x1x128xf32> to vector<1x128xf32>
    %cst_168 = arith.constant dense<0.000000e+00> : vector<16xf32>
    %385 = vector.multi_reduction <add>, %380, %cst_168 [1] : vector<16x128xf32> to vector<16xf32>
    %386 = vector.shape_cast %385 : vector<16xf32> to vector<16x1xf32>
    %cst_169 = arith.constant 1.280000e+02 : f32
    %387 = vector.broadcast %cst_169 : f32 to vector<16x1xf32>
    %388 = arith.divf %386, %387 : vector<16x1xf32>
    %389 = vector.broadcast %388 : vector<16x1xf32> to vector<16x128xf32>
    %390 = arith.subf %380, %389 : vector<16x128xf32>
    %391 = arith.mulf %390, %390 : vector<16x128xf32>
    %cst_170 = arith.constant dense<0.000000e+00> : vector<16xf32>
    %392 = vector.multi_reduction <add>, %391, %cst_170 [1] : vector<16x128xf32> to vector<16xf32>
    %393 = vector.shape_cast %392 : vector<16xf32> to vector<16x1xf32>
    %cst_171 = arith.constant 1.280000e+02 : f32
    %394 = vector.broadcast %cst_171 : f32 to vector<16x1xf32>
    %395 = arith.divf %393, %394 : vector<16x1xf32>
    %396 = vector.broadcast %388 : vector<16x1xf32> to vector<16x128xf32>
    %397 = arith.subf %380, %396 : vector<16x128xf32>
    %cst_172 = arith.constant 9.99999996E-13 : f32
    %398 = vector.broadcast %cst_172 : f32 to vector<16x1xf32>
    %399 = arith.addf %395, %398 : vector<16x1xf32>
    %400 = math.rsqrt %399 : vector<16x1xf32>
    %401 = vector.broadcast %400 : vector<16x1xf32> to vector<16x128xf32>
    %402 = arith.mulf %397, %401 : vector<16x128xf32>
    %403 = vector.broadcast %382 : vector<1x128xf32> to vector<16x128xf32>
    %404 = arith.mulf %402, %403 : vector<16x128xf32>
    %405 = vector.broadcast %384 : vector<1x128xf32> to vector<16x128xf32>
    %406 = arith.addf %404, %405 : vector<16x128xf32>
    %407 = vector.shape_cast %406 : vector<16x128xf32> to vector<2x8x128xf32>
    %408 = vector.extract_strided_slice %407 {offsets = [0, 0, 0], sizes = [2, 1, 128], strides = [1, 1, 1]} : vector<2x8x128xf32> to vector<2x1x128xf32>
    %409 = vector.shape_cast %408 : vector<2x1x128xf32> to vector<2x128xf32>
    %410 = arith.truncf %409 : vector<2x128xf32> to vector<2x128xbf16>
    %c0_173 = arith.constant 0 : index
    %c0_174 = arith.constant 0 : index
    %411 = vector.load %arg15[%c0_173, %c0_174] : memref<128x128xbf16, #tpu.memory_space<vmem>>, vector<128x128xbf16>
    %cst_175 = arith.constant dense<0.000000e+00> : vector<2x128xf32>
    %412 = tpu.matmul %410, %411, %cst_175 {dimension_numbers = #tpu.dot_dimension_numbers<[1], [0], [0], [1], [0, 0, 1, 1], [], []>} : vector<2x128xbf16>, vector<128x128xbf16>, vector<2x128xf32> -> vector<2x128xf32>
    %c0_176 = arith.constant 0 : index
    %c0_177 = arith.constant 0 : index
    %413 = vector.load %arg16[%c0_176, %c0_177] : memref<1x128xf32, #tpu.memory_space<vmem>>, vector<1x128xf32>
    %414 = vector.broadcast %413 : vector<1x128xf32> to vector<2x128xf32>
    %415 = arith.addf %412, %414 : vector<2x128xf32>
    %416 = math.tanh %415 : vector<2x128xf32>
    %417 = arith.truncf %416 : vector<2x128xf32> to vector<2x128xbf16>
    %c0_178 = arith.constant 0 : index
    %c0_179 = arith.constant 0 : index
    %418 = vector.load %arg17[%c0_178, %c0_179] : memref<128x128xbf16, #tpu.memory_space<vmem>>, vector<128x128xbf16>
    %cst_180 = arith.constant dense<0.000000e+00> : vector<2x128xf32>
    %419 = tpu.matmul %417, %418, %cst_180 {dimension_numbers = #tpu.dot_dimension_numbers<[1], [0], [0], [1], [0, 0, 1, 1], [], []>} : vector<2x128xbf16>, vector<128x128xbf16>, vector<2x128xf32> -> vector<2x128xf32>
    %c0_181 = arith.constant 0 : index
    %c0_182 = arith.constant 0 : index
    %420 = vector.load %arg18[%c0_181, %c0_182] : memref<1x128xf32, #tpu.memory_space<vmem>>, vector<1x128xf32>
    %421 = vector.broadcast %420 : vector<1x128xf32> to vector<2x128xf32>
    %422 = arith.addf %419, %421 : vector<2x128xf32>
    %423 = arith.negf %422 : vector<2x128xf32>
    %424 = math.exp %423 : vector<2x128xf32>
    %cst_183 = arith.constant 1.000000e+00 : f32
    %425 = vector.broadcast %cst_183 : f32 to vector<2x128xf32>
    %426 = arith.addf %425, %424 : vector<2x128xf32>
    %427 = arith.divf %425, %426 : vector<2x128xf32>
    %c0_184 = arith.constant 0 : index
    %c0_185 = arith.constant 0 : index
    %428 = vector.load %arg19[%c0_184, %c0_185] : memref<2x128xf32, #tpu.memory_space<vmem>>, vector<2x128xf32>
    tpu.vector_store %arg19[%c0_184, %c0_185], %427 {strides = array<i32>} : memref<2x128xf32, #tpu.memory_space<vmem>>, vector<2x128xf32>,
    return
  }
}

</mosaic_0001>

<bundles_post_ra>
// kernel: bert_classifier_forward.1
= control target key start
LH: loop header
LB: loop body
LE: loop exit
PB: predicated region body
PF: predicated region fallthrough
CT: control target
= control target key end

     0   :  { %s7938_s0 = inlined_call_operand.vmem [shape: f32[16,128], index: 0, kind: input, shape index: {}]   ;;  %s7939_s1 = inlined_call_operand.vmem [shape: f32[1,128], index: 1, kind: input, shape index: {}]   ;;  %s7940_s2 = inlined_call_operand.hbm [shape: f32[1,128], index: 2, kind: input, shape index: {}]   ;;  %s7941_s3 = inlined_call_operand.hbm [shape: bf16[2,128,384], index: 3, kind: input, shape index: {}]   ;;  %s7942_s4 = inlined_call_operand.vmem [shape: f32[2,1,384], index: 4, kind: input, shape index: {}]   ;;  %s7943_s5 = inlined_call_operand.vmem [shape: bf16[2,128,128], index: 5, kind: input, shape index: {}]   ;;  %s7944_s6 = inlined_call_operand.vmem [shape: f32[2,1,128], index: 6, kind: input, shape index: {}]   ;;  %s7945_s7 = inlined_call_operand.vmem [shape: f32[2,1,128], index: 7, kind: input, shape index: {}]   ;;  %s7946_s8 = inlined_call_operand.hbm [shape: f32[2,1,128], index: 8, kind: input, shape index: {}]   ;;  %s7947_s9 = inlined_call_operand.hbm [shape: bf16[2,128,512], index: 9, kind: input, shape index: {}]   ;;  %s7948_s10 = inlined_call_operand.vmem [shape: f32[2,1,512], index: 10, kind: input, shape index: {}]   ;;  %s7949_s11 = inlined_call_operand.hbm [shape: bf16[2,512,128], index: 11, kind: input, shape index: {}]   ;;  %s7950_s12 = inlined_call_operand.vmem [shape: f32[2,1,128], index: 12, kind: input, shape index: {}]   ;;  %s7951_s13 = inlined_call_operand.hbm [shape: f32[2,1,128], index: 13, kind: input, shape index: {}]   ;;  %s7952_s14 = inlined_call_operand.hbm [shape: f32[2,1,128], index: 14, kind: input, shape index: {}]   ;;  %s7953_s15 = inlined_call_operand.vmem [shape: bf16[128,128], index: 15, kind: input, shape index: {}]   ;;  %s7954_s16 = inlined_call_operand.hbm [shape: f32[1,128], index: 16, kind: input, shape index: {}]   ;;  %s7955_s17 = inlined_call_operand.hbm [shape: bf16[128,128], index: 17, kind: input, shape index: {}]   ;;  %s7956_s18 = inlined_call_operand.vmem [shape: f32[1,128], index: 18, kind: input, shape index: {}]   ;;  %s7957_s19 = inlined_call_operand.hbm [shape: f32[2,128], index: 19, kind: output, shape index: {}]  }
   0x1   :  { %7959 = sst [smem:[#allocation25_spill]] %s7938_s0 }
   0x2   :  { %7960 = sst [smem:[#allocation26_spill]] %s7939_s1 }
   0x3   :  { %7961 = sst [smem:[#allocation27_spill]] %s7940_s2 }
   0x4   :  { %7962 = sst [smem:[#allocation28_spill]] %s7941_s3 }
   0x5   :  { %24 = vsyncpa [#allocation4], 0 }
   0x6   :  { %25 = vsyncpa [#allocation7], 0 }
   0x7   :  { %26 = vsyncpa [#allocation10], 0 }
   0x8   :  { %27 = vsyncpa [#allocation13], 0 }
   0x9   :  { %28 = vsyncpa [#allocation16], 0 }
   0xa   :  { %29 = vsyncpa [#allocation5], 0  ;;  %s7052_s0 = smov [#allocation6]  }
   0xb   :  { %s49_s30 = sshll.u32 %s7052_s0, 4  ;;  %s50_s30 = int_to_ptr.vmem [resolvable:$true] %s49_s30 }
   0xc   :  { %s6848_s20 = scalar_lea.vmem %s50_s30, 6144  ;;  %p6853_p1 = scmp.lt.s32.totalorder %s50_s30, %s50_s30 }
   0xd   :  { %p6849_p0 = scmp.ne.s32.totalorder %s50_s30, %s6848_s20  ;;  %p6854_p2 = scmp.lt.s32.totalorder %s6848_s20, %s6848_s20 }
   0xf   :  { %p6855_p3 = por %p6854_p2, %p6853_p1 }
  0x11   :  { %p6856_p4 = pnand %p6855_p3, %p6849_p0 }
  0x13   :  { %6859 = shalt.err (!%p6856_p4)
}
  0x14   :  { %s7053_s21 = smov 192   ;;  %s7054_s1 = smov 12  }
  0x15   :  { %s7963_s23 = sld [smem:[#allocation28_spill]]  ;;  %s7055_s24 = smov [#allocation9]  }
  0x16   :  { %s81_s25 = sshll.u32 %s7055_s24, 4  ;;  %s82_s25 = int_to_ptr.vmem [resolvable:$true] %s81_s25 }
  0x17   :  { %s6868_s3 = scalar_lea.vmem %s82_s25, 8192  ;;  %p6873_p6 = scmp.lt.s32.totalorder %s82_s25, %s82_s25 }
  0x18   :  { %p6869_p5 = scmp.ne.s32.totalorder %s82_s25, %s6868_s3  ;;  %p6874_p7 = scmp.lt.s32.totalorder %s6868_s3, %s6868_s3 }
  0x1a   :  { %p6875_p8 = por %p6874_p7, %p6873_p6 }
  0x1b   :  { %55 = dma.hbm_to_vmem [thread:$0]  %s7963_s23, 6144, %s50_s30, [#allocation7], %s7053_s21, %s7053_s21, %s7054_s1  }
  0x1c   :  { %p6876_p9 = pnand %p6875_p8, %p6869_p5 }
  0x1e   :  { %6879 = shalt.err (!%p6876_p9)
}
  0x1f   :  { %s7056_s26 = smov 256   ;;  %s7057_s27 = smov 16  }
  0x20   :  { %87 = dma.hbm_to_vmem [thread:$0]  %s7947_s9, 8192, %s82_s25, [#allocation10], %s7056_s26, %s7056_s26, %s7057_s27  }
  0x21   :  { %s7058_s0 = smov [#allocation12]   ;;  %s7059_s30 = smov [#allocation15]  }
  0x22   :  { %s109_s20 = sshll.u32 %s7058_s0, 4  ;;  %s136_s21 = sshll.u32 %s7059_s30, 4  ;;  %s110_s20 = int_to_ptr.vmem [resolvable:$true] %s109_s20  ;;  %s137_s21 = int_to_ptr.vmem [resolvable:$true] %s136_s21 }
  0x23   :  { %s6888_s1 = scalar_lea.vmem %s110_s20, 32  ;;  %p6893_p11 = scmp.lt.s32.totalorder %s110_s20, %s110_s20 }
  0x24   :  { %p6889_p10 = scmp.ne.s32.totalorder %s110_s20, %s6888_s1  ;;  %p6894_p12 = scmp.lt.s32.totalorder %s6888_s1, %s6888_s1 }
  0x26   :  { %p6895_p13 = por %p6894_p12, %p6893_p11 }
  0x28   :  { %p6896_p0 = pnand %p6895_p13, %p6889_p10 }
  0x2a   :  { %6899 = shalt.err (!%p6896_p0)
}
  0x2b   :  { %s7060_s22 = smov 1   ;;  %s6908_s9 = scalar_lea.vmem %s137_s21, 16 }
  0x2c   :  { %115 = dma.hbm_to_vmem [thread:$0]  %s7951_s13, 32, %s110_s20, [#allocation13], %s7057_s27, %s7057_s27, %s7060_s22  }
  0x2d   :  { %p6909_p1 = scmp.ne.s32.totalorder %s137_s21, %s6908_s9  ;;  %s6912_s24 = scalar_lea.vmem %s137_s21, 32 }
  0x2e   :  { %p6913_p2 = scmp.lt.s32.totalorder %s137_s21, %s137_s21  ;;  %p6914_p3 = scmp.lt.s32.totalorder %s6912_s24, %s6908_s9 }
  0x30   :  { %p6915_p4 = por %p6914_p3, %p6913_p2 }
  0x32   :  { %p6916_p5 = pnand %p6915_p4, %p6909_p1 }
  0x34   :  { %6919 = shalt.err (!%p6916_p5)
}
  0x35   :  { %139 = dma.hbm_to_vmem [thread:$0]  %s7954_s16, 16, %s137_s21, [#allocation16]  }
  0x36   :  { %s7061_s26 = smov [#allocation3]   ;;  %s7062_s29 = smov [#allocation8]  }
  0x37   :  { %s40_s28 = sshll.u32 %s7061_s26, 4  ;;  %s69_s0 = sshll.u32 %s7062_s29, 4  ;;  %s41_s28 = int_to_ptr.vmem [resolvable:$true] %s40_s28  ;;  %s70_s0 = int_to_ptr.vmem [resolvable:$true] %s69_s0 }
  0x38   :  { %s6928_s30 = scalar_lea.vmem %s41_s28, 16  ;;  %s6932_s13 = scalar_lea.vmem %s41_s28, 32 }
  0x39   :  { %p6929_p6 = scmp.ne.s32.totalorder %s41_s28, %s6928_s30  ;;  %p6933_p7 = scmp.lt.s32.totalorder %s41_s28, %s41_s28 }
  0x3a   :  { %p6934_p8 = scmp.lt.s32.totalorder %s6932_s13, %s6928_s30 }
  0x3c   :  { %p6935_p9 = por %p6934_p8, %p6933_p7 }
  0x3e   :  { %p6936_p10 = pnand %p6935_p9, %p6929_p6 }
  0x40   :  { %6939 = shalt.err (!%p6936_p10)
}
  0x41   :  { %s7964_s2 = sld [smem:[#allocation27_spill]]  ;;  %s6948_s23 = scalar_lea.vmem %s70_s0, 32 }
  0x42   :  { %p6949_p11 = scmp.ne.s32.totalorder %s70_s0, %s6948_s23  ;;  %p6953_p12 = scmp.lt.s32.totalorder %s70_s0, %s70_s0 }
  0x43   :  { %p6954_p13 = scmp.lt.s32.totalorder %s6948_s23, %s6948_s23 }
  0x45   :  { %p6955_p0 = por %p6954_p13, %p6953_p12 }
  0x47   :  { %43 = dma.hbm_to_vmem [thread:$0]  %s7964_s2, 16, %s41_s28, [#allocation4]  }
  0x48   :  { %p6956_p1 = pnand %p6955_p0, %p6949_p11 }
  0x4a   :  { %6959 = shalt.err (!%p6956_p1)
}
  0x4b   :  { %75 = dma.hbm_to_vmem [thread:$0]  %s7946_s8, 32, %s70_s0, [#allocation7], %s7057_s27, %s7057_s27, %s7060_s22  }
  0x4c   :  { %s7063_s9 = smov [#allocation11]  }
  0x4d   :  { %s95_s24 = sshll.u32 %s7063_s9, 4  ;;  %s96_s24 = int_to_ptr.vmem [resolvable:$true] %s95_s24 }
  0x4e   :  { %s6968_s25 = scalar_lea.vmem %s96_s24, 8192  ;;  %p6973_p3 = scmp.lt.s32.totalorder %s96_s24, %s96_s24 }
  0x4f   :  { %p6969_p2 = scmp.ne.s32.totalorder %s96_s24, %s6968_s25  ;;  %p6974_p4 = scmp.lt.s32.totalorder %s6968_s25, %s6968_s25 }
  0x51   :  { %p6975_p5 = por %p6974_p4, %p6973_p3 }
  0x53   :  { %p6976_p6 = pnand %p6975_p5, %p6969_p2 }
  0x55   :  { %6979 = shalt.err (!%p6976_p6)
}
  0x56   :  { %s7064_s3 = smov 64   ;;  %s7065_s26 = smov 4  }
  0x57   :  { %101 = dma.hbm_to_vmem [thread:$0]  %s7949_s11, 8192, %s96_s24, [#allocation10], %s7064_s3, %s7064_s3, %s7065_s26  }
  0x58   :  { %s7066_s30 = smov [#allocation14]   ;;  %s7067_s0 = smov [#allocation17]  }
  0x59   :  { %s121_s8 = sshll.u32 %s7066_s30, 4  ;;  %s145_s13 = sshll.u32 %s7067_s0, 4  ;;  %s122_s8 = int_to_ptr.vmem [resolvable:$true] %s121_s8  ;;  %s146_s13 = int_to_ptr.vmem [resolvable:$true] %s145_s13 }
  0x5a   :  { %s6988_s20 = scalar_lea.vmem %s122_s8, 32  ;;  %p6993_p8 = scmp.lt.s32.totalorder %s122_s8, %s122_s8 }
  0x5b   :  { %p6989_p7 = scmp.ne.s32.totalorder %s122_s8, %s6988_s20  ;;  %p6994_p9 = scmp.lt.s32.totalorder %s6988_s20, %s6988_s20 }
  0x5d   :  { %p6995_p10 = por %p6994_p9, %p6993_p8 }
  0x5f   :  { %p6996_p11 = pnand %p6995_p10, %p6989_p7 }
  0x61   :  { %6999 = shalt.err (!%p6996_p11)
}
  0x62   :  { %127 = dma.hbm_to_vmem [thread:$0]  %s7952_s14, 32, %s122_s8, [#allocation13], %s7057_s27, %s7057_s27, %s7060_s22  }
  0x63   :  { %s7008_s11 = scalar_lea.vmem %s146_s13, 1024  ;;  %p7013_p13 = scmp.lt.s32.totalorder %s146_s13, %s146_s13 }
  0x64   :  { %p7009_p12 = scmp.ne.s32.totalorder %s146_s13, %s7008_s11  ;;  %p7014_p0 = scmp.lt.s32.totalorder %s7008_s11, %s7008_s11 }
  0x66   :  { %p7015_p1 = por %p7014_p0, %p7013_p13 }
  0x68   :  { %p7016_p2 = pnand %p7015_p1, %p7009_p12 }
  0x6a   :  { %7019 = shalt.err (!%p7016_p2)
}
  0x6b   :  { %151 = dma.hbm_to_vmem [thread:$0]  %s7955_s17, 1024, %s146_s13, [#allocation16], %s7064_s3, %s7064_s3, %s7065_s26  }
  0x6c   :  { %7040 = dma.done.wait [#allocation4], 16  }
  0x6d   :  { %7041 = vsyncadd [#allocation4], 4294967280 }
  0x6e   :  { %7042 = dma.done.wait [#allocation7], 6176  }
  0x6f   :  { %7043 = vsyncadd [#allocation7], 4294961120 }
  0x70   :  { %7044 = dma.done.wait [#allocation10], 16384  }
  0x71   :  { %7045 = vsyncadd [#allocation10], 4294950912 }
  0x72   :  { %7046 = dma.done.wait [#allocation13], 64  }
  0x73   :  { %7047 = vsyncadd [#allocation13], 4294967232 }
  0x74   :  { %7048 = dma.done.wait [#allocation16], 1040  }
  0x75   :  { %7049 = vsyncadd [#allocation16], 4294966256  ;;  %s7965_s22 = sld [smem:[#allocation25_spill]]  ;;  %v6460_v2 = vld [vmem:[#allocation6 + $0xac] ss:$12 sps:$4 sm:$0xff]   ;;  %v7068_v4 = vmov 0.0   ;;  %v260_v53 = vlaneseq }
  0x76   :  { %v6462_v3 = vld [vmem:[#allocation6 + $0xa8] ss:$12 sps:$4 sm:$0xff]   ;;  %6158 = vmatprep.subr.bf16.mxu1 %v7068_v4  ;;  %v6463_v5 = vld [vmem:[#allocation6 + $0xb0] ss:$12 sps:$4 sm:$0xff]   ;;  %403 = vmatprep.subr.bf16.mxu0 %v6460_v2  ;;  %v6467_v16 = vld [vmem:[#allocation6 + $0x98] ss:$12 sps:$4 sm:$0xff]  }
  0x77   :  { %404 = vmatpush1.bf16.msra.mxu0 %v6462_v3  ;;  %6159 = vmatpush3.bf16.msra.mxu1 %v6463_v5  ;;  %v6464_v14 = vld [vmem:[#allocation6 + $0x94] ss:$12 sps:$4 sm:$0xff]   ;;  %v6466_v15 = vld [vmem:[#allocation6 + $0x90] ss:$12 sps:$4 sm:$0xff]   ;;  %v6470_v18 = vld [vmem:[#allocation6 + $0x78] ss:$12 sps:$4 sm:$0xff]  }
  0x78   :  { %6160 = vmatprep.subr.bf16.mxu1 %v7068_v4  ;;  %405 = vmatprep.subr.bf16.mxu0 %v6464_v14  ;;  %v6468_v17 = vld [vmem:[#allocation6 + $0x7c] ss:$12 sps:$4 sm:$0xff]   ;;  %v6471_v19 = vld [vmem:[#allocation6 + $0x80] ss:$12 sps:$4 sm:$0xff]   ;;  %v6472_v20 = vld [vmem:[#allocation6 + $0x64] ss:$12 sps:$4 sm:$0xff]  }
  0x79   :  { %v6474_v21 = vld [vmem:[#allocation6 + $0x60] ss:$12 sps:$4 sm:$0xff]   ;;  %v6475_v22 = vld [vmem:[#allocation6 + $0x68] ss:$12 sps:$4 sm:$0xff]   ;;  %v6479_v25 = vld [vmem:[#allocation6 + $0x50] ss:$12 sps:$4 sm:$0xff]  }
  0x7a   :  { %v6476_v23 = vld [vmem:[#allocation6 + $0x4c] ss:$12 sps:$4 sm:$0xff]   ;;  %v6478_v24 = vld [vmem:[#allocation6 + $0x48] ss:$12 sps:$4 sm:$0xff]   ;;  %v7069_v27 = vmov 0   ;;  %vm7070_vm0 = vmmov 0  }
  0x7b   :  { %v182_v0 = vld [vmem:[%s7965_s22] sm:$0xff]  ;;  %v183_v1 = vld [vmem:[%s7965_s22 + $0x8] sm:$0xff]  ;;  %406 = vmatpush1.bf16.msra.mxu0 %v6466_v15  ;;  %6161 = vmatpush3.bf16.msra.mxu1 %v6467_v16  ;;  %s7966_s25 = sld [smem:[#allocation26_spill]]  ;;  %v7257_v54 = vshrl.u32 %v260_v53, 7  ;;  %vm487_vm1 = vcmask 261120   ;;  %vm642_vm2 = vcmask 64512  }
  0x7c   :  { %186 = vadd.xlane.f32.xlu0 %v182_v0  ;;  %6162 = vmatprep.subr.bf16.mxu1 %v7068_v4  ;;  %v6480_v26 = vld [vmem:[#allocation6 + $0x34] ss:$12 sps:$4 sm:$0xff]   ;;  %v6482_v28 = vld [vmem:[#allocation6 + $0x30] ss:$12 sps:$4 sm:$0xff]   ;;  %v6483_v29 = vld [vmem:[#allocation6 + $0x38] ss:$12 sps:$4 sm:$0xff]  }
  0x7d   :  { %407 = vmatprep.subr.bf16.mxu0 %v6468_v17  ;;  %435 = vmatprep.mubr.bf16.mxu0 %v7069_v27  ;;  %v6484_v30 = vld [vmem:[#allocation6 + $0x1c] ss:$12 sps:$4 sm:$0xff]   ;;  %v6486_v31 = vld [vmem:[#allocation6 + $0x18] ss:$12 sps:$4 sm:$0xff]   ;;  %v6487_v32 = vld [vmem:[#allocation6 + $0x20] ss:$12 sps:$4 sm:$0xff]  }
  0x7e   :  { %6174 = vmatprep.mubr.msk.bf16.mxu1 %vm7070_vm0, %v7068_v4  ;;  %v6488_v33 = vld [vmem:[#allocation6 + $0x4] ss:$12 sps:$4 sm:$0xff]   ;;  %v6490_v34 = vld [vmem:[#allocation6] ss:$12 sps:$4 sm:$0xff]   ;;  %v6491_v35 = vld [vmem:[#allocation6 + $0x8] ss:$12 sps:$4 sm:$0xff]  }
  0x7f   :  { %408 = vmatpush1.bf16.msra.mxu0 %v6470_v18  ;;  %6163 = vmatpush3.bf16.msra.mxu1 %v6471_v19  ;;  %v5625_v48 = vld [vmem:[#allocation3] ss:$0 sm:$0xff]  ;;  %v7260_v55 = vsub.s32 1, %v7257_v54  ;;  %v258_v56 = vld [vmem:[%s7942_s4] sm:$0x7]  ;;  %v7266_v57 = vsub.s32 0, %v7257_v54 }
  0x80   :  { %188 = vadd.xlane.f32.xlu0 %v183_v1  ;;  %6164 = vmatprep.subr.bf16.mxu1 %v7068_v4  ;;  %v7269_v58 = vsub.s32 2, %v7257_v54  ;;  %s7071_s29 = smov 96   ;;  %vm819_vm3 = vcmask 257024   ;;  %s7072_s30 = smov 32   ;;  %vm1168_vm4 = vcmask 519424   ;;  %vm1515_vm5 = vcmask 781824  }
  0x81   :  { %409 = vmatprep.subr.bf16.mxu0 %v6472_v20  ;;  %v5624_v44 = vld [vmem:[%s7966_s25] ss:$0 sm:$0xff]  ;;  %v267_v59 = vrot.slane %v258_v56, %v7260_v55  ;;  %v263_v62 = vrot.slane %v258_v56, %v7266_v57  ;;  %vm1862_vm6 = vcmask 1044224   ;;  %vm5393_vm7 = vcmask 1041409   ;;  %s7073_s26 = smov [#allocation18]  }
  0x82   :  { %s5611_s28 = sshll.u32 %s7073_s26, 4  ;;  %s5612_s28 = int_to_ptr.vmem [resolvable:$true] %s5611_s28 }
  0x83   :  { %410 = vmatpush1.bf16.msra.mxu0 %v6474_v21  ;;  %6165 = vmatpush3.bf16.msra.mxu1 %v6475_v22  ;;  %s7020_s8 = scalar_lea.vmem %s5612_s28, 32  ;;  %p7025_p4 = scmp.lt.s32.totalorder %s5612_s28, %s5612_s28 }
  0x84   :  { %411 = vmatprep.subr.bf16.mxu0 %v6476_v23  ;;  %6166 = vmatprep.subr.bf16.mxu1 %v7068_v4  ;;  %p7021_p3 = scmp.ne.s32.totalorder %s5612_s28, %s7020_s8  ;;  %p7026_p5 = scmp.lt.s32.totalorder %s7020_s8, %s7020_s8 }
  0x86   :  { %p7027_p6 = por %p7026_p5, %p7025_p4 }
  0x87   :  { %412 = vmatpush1.bf16.msra.mxu0 %v6478_v24  ;;  %6167 = vmatpush3.bf16.msra.mxu1 %v6479_v25 }
  0x88   :  { %413 = vmatprep.subr.bf16.mxu0 %v6480_v26  ;;  %6168 = vmatprep.subr.bf16.mxu1 %v7068_v4  ;;  %p7028_p7 = pnand %p7027_p6, %p7021_p3 }
  0x8b   :  { %414 = vmatpush1.bf16.msra.mxu0 %v6482_v28  ;;  %6169 = vmatpush3.bf16.msra.mxu1 %v6483_v29 }
  0x8c   :  { %415 = vmatprep.subr.bf16.mxu0 %v6484_v30  ;;  %6170 = vmatprep.subr.bf16.mxu1 %v7068_v4 }
  0x8f   :  { %416 = vmatpush1.bf16.msra.mxu0 %v6486_v31  ;;  %6171 = vmatpush3.bf16.msra.mxu1 %v6487_v32 }
  0x90   :  { %417 = vmatprep.subr.bf16.mxu0 %v6488_v33  ;;  %6172 = vmatprep.subr.bf16.mxu1 %v7068_v4 }
  0x93   :  { %418 = vmatpush1.bf16.msra.mxu0 %v6490_v34  ;;  %6173 = vmatpush3.bf16.msra.mxu1 %v6491_v35 }
  0x94   :  { %6178 = vmatprep.subr.mxu1 %v7068_v4  ;;  %6218 = vmatprep.subr.mxu0 %v7068_v4 }
 0x105   :  { %v187_v6 = vpop.xlane.xlu0 %186 }
 0x106   :  { %v191_v7 = vmul.f32 0.0078125, %v187_v6 }
 0x108   :  { %v7223_v8 = vsub.f32 %v182_v0, %v191_v7 }
 0x109   :  { %v189_v9 = vpop.xlane.xlu0 %188 }
 0x10a   :  { %v192_v10 = vmul.f32 0.0078125, %v189_v9  ;;  %v195_v11 = vmul.f32 %v7223_v8, %v7223_v8 }
 0x10c   :  { %v7227_v12 = vsub.f32 %v183_v1, %v192_v10  ;;  %197 = vadd.xlane.f32.xlu1 %v195_v11  ;;  %v271_v1 = vrot.slane %v258_v56, %v7269_v58 }
 0x10e   :  { %v196_v13 = vmul.f32 %v7227_v12, %v7227_v12 }
 0x110   :  { %199 = vadd.xlane.f32.xlu1 %v196_v13 }
 0x195   :  { %v198_v36 = vpop.xlane.xlu1 %197 }
 0x196   :  { %v201_v37 = vmul.f32 0.0078125, %v198_v36 }
 0x198   :  { %v203_v38 = vadd.f32 1e-12, %v201_v37 }
 0x199   :  { %v200_v39 = vpop.xlane.xlu1 %199 }
 0x19a   :  { %6718 = vrsqrt.f32 %v203_v38  ;;  %v202_v40 = vmul.f32 0.0078125, %v200_v39 }
 0x19c   :  { %v204_v41 = vadd.f32 1e-12, %v202_v40 }
 0x19e   :  { %6720 = vrsqrt.f32 %v204_v41 }
 0x1a7   :  { %v6719_v42 = vpop.eup %6718 }
 0x1a8   :  { %v207_v43 = vmul.f32 %v6719_v42, %v7223_v8 }
 0x1aa   :  { %v215_v47 = vmul.f32 %v5624_v44, %v207_v43 }
 0x1ab   :  { %v6721_v45 = vpop.eup %6720 }
 0x1ac   :  { %v208_v46 = vmul.f32 %v6721_v45, %v7227_v12  ;;  %v7247_v50 = vadd.f32 %v5625_v48, %v215_v47 }
 0x1ae   :  { %v216_v49 = vmul.f32 %v5624_v44, %v208_v46 }
 0x1b0   :  { %v7249_v51 = vadd.f32 %v5625_v48, %v216_v49 }
 0x1b2   :  { %v225_v52 = vpack.c.bf16 %v7249_v51, %v7247_v50 }
 0x1b4   :  { %436 = vmatmul.mubr.bf16.vlgmr.msra.gmra.mxu0 %v225_v52  ;;  %6175 = vmatmul.mubr.bf16.vlgmr.msra.gmra.mxu1 %v225_v52 }
 0x1b5   :  { %6180 = vmatprep.mubr.msk.f32.mxu1 %vm7070_vm0, %v7068_v4  ;;  %6220 = vmatprep.mubr.msk.f32.mxu0 %vm7070_vm0, %v7068_v4 }
 0x274   :  { %v437_v60 = vpop.f32.mrf.mxu0  ;;  %v480_v61 = vpop.f32.mrf.mxu1 }
 0x275   :  { %v7280_v7 = vadd.f32 %v437_v60, %v263_v62  ;;  %v7294_v12 = vadd.f32 %v480_v61, %v271_v1 }
 0x276   :  { %v439_v63 = vpop.f32.mrf.mxu0  ;;  %v6176_v0 = vpop.f32.mrf.mxu1 }
 0x277   :  { %v7274_v2 = vadd.f32 %v439_v63, %v267_v59 }
 0x278   :  { %v441_v3 = vpop.f32.mrf.mxu0  ;;  %v483_v5 = vpop.f32.mrf.mxu1 }
 0x279   :  { %v7276_v6 = vadd.f32 %v483_v5, %v271_v1  ;;  %6179 = vmatpush3.xpose.msk.msra.mxu1 %vm487_vm1, %v7274_v2  ;;  %v7291_v11 = vadd.f32 %v441_v3, %v263_v62 }
 0x27a   :  { %v443_v8 = vpop.f32.mrf.mxu0  ;;  %v6177_v9 = vpop.f32.mrf.mxu1  ;;  %6183 = vmatprep.subr.mxu1 %v7068_v4 }
 0x27b   :  { %v7283_v10 = vadd.f32 %v443_v8, %v267_v59 }
 0x27c   :  { %6181 = vmatmul.mubr.msk.f32.vlgmr.msra.gmra.mxu1 %vm487_vm1, %v7280_v7 }
 0x27d   :  { %6184 = vmatpush3.xpose.msk.msra.mxu1 %vm487_vm1, %v7283_v10  ;;  %6185 = vmatprep.mubr.msk.f32.mxu1 %vm7070_vm0, %v7068_v4 }
 0x27e   :  { %6188 = vmatprep.subr.mxu1 %v7068_v4 }
 0x280   :  { %6186 = vmatmul.mubr.msk.f32.vlgmr.msra.gmra.mxu1 %vm487_vm1, %v7291_v11 }
 0x281   :  { %6189 = vmatpush3.msra.mxu1 %v7294_v12  ;;  %6190 = vmatprep.mubr.msk.f32.mxu1 %vm7070_vm0, %v7068_v4 }
 0x282   :  { %6193 = vmatprep.subr.mxu1 %v7068_v4 }
 0x33c   :  { %v560_v13 = vpop.f32.mrf.mxu1 }
 0x33d   :  { %v640_v14 = vmul.f32 0.17677669, %v560_v13 }
 0x33e   :  { %v6182_v15 = vpop.f32.mrf.mxu1 }
 0x33f   :  { %v643_v16 = vsel %vm642_vm2, %v640_v14, -inf }
 0x340   :  { %644 = vmax.xlane.f32.xlu0 %v643_v16  ;;  %v636_v17 = vpop.f32.mrf.mxu1 }
 0x341   :  { %v641_v18 = vmul.f32 0.17677669, %v636_v17 }
 0x342   :  { %v6187_v19 = vpop.f32.mrf.mxu1 }
 0x343   :  { %v646_v20 = vsel %vm642_vm2, %v641_v18, -inf }
 0x344   :  { %647 = vmax.xlane.f32.xlu1 %v646_v20 }
 0x355   :  { %822 = vrot.lane.b32.xlu1 %v7280_v7, %s7071_s29 }
 0x359   :  { %902 = vrot.lane.b32.xlu1 %v7283_v10, %s7071_s29 }
 0x3c9   :  { %v645_v21 = vpop.xlane.xlu0 %644 }
 0x3ca   :  { %v649_v22 = vsub.f32 %v640_v14, %v645_v21 }
 0x3cc   :  { %v651_v23 = vmul.f32 1.442695, %v649_v22 }
 0x3cd   :  { %v648_v24 = vpop.xlane.xlu1 %647 }
 0x3ce   :  { %6722 = vpow2.f32 %v651_v23  ;;  %v650_v25 = vsub.f32 %v641_v18, %v648_v24 }
 0x3d0   :  { %v653_v26 = vmul.f32 1.442695, %v650_v25 }
 0x3d1   :  { %v823_v32 = vpop.permute.xlu1 %822 }
 0x3d2   :  { %6724 = vpow2.f32 %v653_v26 }
 0x3d5   :  { %v903_v33 = vpop.permute.xlu1 %902 }
 0x3db   :  { %v6723_v28 = vpop.eup %6722 }
 0x3dc   :  { %v655_v29 = vsel %vm642_vm2, %v6723_v28, 0.0 }
 0x3dd   :  { %656 = vadd.xlane.f32.xlu0 %v655_v29 }
 0x3df   :  { %v6725_v30 = vpop.eup %6724 }
 0x3e0   :  { %v658_v31 = vsel %vm642_vm2, %v6725_v30, 0.0 }
 0x3e1   :  { %659 = vadd.xlane.f32.xlu1 %v658_v31 }
 0x3f2   :  { %900 = vrot.lane.b32.xlu1 %v7291_v11, %s7071_s29 }
 0x3f3   :  { %824 = vrot.lane.b32.xlu0 %v7274_v2, %s7071_s29 }
 0x466   :  { %v657_v34 = vpop.xlane.xlu0 %656 }
 0x467   :  { %6726 = vrcp.f32 %v657_v34 }
 0x46a   :  { %v660_v35 = vpop.xlane.xlu1 %659  ;;  %v825_v40 = vpop.permute.xlu0 %824 }
 0x46b   :  { %6728 = vrcp.f32 %v660_v35 }
 0x46e   :  { %v901_v41 = vpop.permute.xlu1 %900 }
 0x474   :  { %v6727_v36 = vpop.eup %6726 }
 0x475   :  { %v663_v37 = vmul.f32 %v6727_v36, %v6723_v28 }
 0x477   :  { %6191 = vmatmul.mubr.msk.f32.vlgmr.msra.gmra.mxu1 %vm642_vm2, %v663_v37 }
 0x478   :  { %v6729_v38 = vpop.eup %6728  ;;  %6194 = vmatpush3.msra.mxu1 %v7276_v6  ;;  %6195 = vmatprep.mubr.msk.f32.mxu1 %vm7070_vm0, %v7068_v4 }
 0x479   :  { %6198 = vmatprep.subr.mxu1 %v7068_v4  ;;  %v664_v39 = vmul.f32 %v6729_v38, %v6725_v30 }
 0x47b   :  { %6196 = vmatmul.mubr.msk.f32.vlgmr.msra.gmra.mxu1 %vm642_vm2, %v664_v39 }
 0x47c   :  { %6199 = vmatpush3.xpose.msk.msra.mxu1 %vm487_vm1, %v825_v40  ;;  %6200 = vmatprep.mubr.msk.f32.mxu1 %vm7070_vm0, %v7068_v4 }
 0x47d   :  { %6203 = vmatprep.subr.mxu1 %v7068_v4 }
 0x47f   :  { %6201 = vmatmul.mubr.msk.f32.vlgmr.msra.gmra.mxu1 %vm487_vm1, %v823_v32 }
 0x480   :  { %6204 = vmatpush3.xpose.msk.msra.mxu1 %vm487_vm1, %v903_v33  ;;  %6205 = vmatprep.mubr.msk.f32.mxu1 %vm7070_vm0, %v7068_v4 }
 0x481   :  { %6208 = vmatprep.subr.mxu1 %v7068_v4 }
 0x483   :  { %6206 = vmatmul.mubr.msk.f32.vlgmr.msra.gmra.mxu1 %vm487_vm1, %v901_v41 }
 0x484   :  { %6210 = vmatprep.mubr.msk.f32.mxu1 %vm7070_vm0, %v7068_v4 }
 0x537   :  { %v734_v42 = vpop.f32.mrf.mxu1 }
 0x538   :  { %v5936_v43 = vpack.c.bf16 %v734_v42, %v734_v42 }
 0x539   :  { %v6192_v44 = vpop.f32.mrf.mxu1 }
 0x53a   :  { %820 = vst.msk [vmem:[#allocation2] sm:$0xf] %vm819_vm3, %v5936_v43 }
 0x53b   :  { %v807_v45 = vpop.f32.mrf.mxu1 }
 0x53c   :  { %v5937_v46 = vpack.c.bf16 %v807_v45, %v807_v45 }
 0x53d   :  { %v6197_v47 = vpop.f32.mrf.mxu1 }
 0x53e   :  { %821 = vst.msk [vmem:[#allocation2 + $0x4] sm:$0xf] %vm819_vm3, %v5937_v46 }
 0x53f   :  { %v896_v48 = vpop.f32.mrf.mxu1 }
 0x540   :  { %v978_v49 = vmul.f32 0.17677669, %v896_v48 }
 0x541   :  { %v6202_v52 = vpop.f32.mrf.mxu1 }
 0x542   :  { %v980_v53 = vsel %vm642_vm2, %v978_v49, -inf }
 0x543   :  { %981 = vmax.xlane.f32.xlu0 %v980_v53  ;;  %v974_v56 = vpop.f32.mrf.mxu1 }
 0x544   :  { %v979_v59 = vmul.f32 0.17677669, %v974_v56 }
 0x545   :  { %v6207_v60 = vpop.f32.mrf.mxu1 }
 0x546   :  { %v983_v61 = vsel %vm642_vm2, %v979_v59, -inf }
 0x547   :  { %984 = vmax.xlane.f32.xlu1 %v983_v61 }
 0x558   :  { %1080 = vrot.lane.b32.xlu1 %v7276_v6, %s7071_s29 }
 0x55c   :  { %1173 = vrot.lane.b32.xlu1 %v7274_v2, %s7064_s3 }
 0x560   :  { %1251 = vrot.lane.b32.xlu1 %v7283_v10, %s7064_s3 }
 0x564   :  { %1249 = vrot.lane.b32.xlu1 %v7291_v11, %s7064_s3 }
 0x5cc   :  { %v982_v62 = vpop.xlane.xlu0 %981 }
 0x5cd   :  { %v986_v63 = vsub.f32 %v978_v49, %v982_v62 }
 0x5cf   :  { %v988_v0 = vmul.f32 1.442695, %v986_v63 }
 0x5d0   :  { %v985_v1 = vpop.xlane.xlu1 %984 }
 0x5d1   :  { %6730 = vpow2.f32 %v988_v0  ;;  %v987_v3 = vsub.f32 %v979_v59, %v985_v1 }
 0x5d3   :  { %v990_v5 = vmul.f32 1.442695, %v987_v3 }
 0x5d4   :  { %v1081_v8 = vpop.permute.xlu1 %1080 }
 0x5d5   :  { %6732 = vpow2.f32 %v990_v5 }
 0x5d8   :  { %v1174_v9 = vpop.permute.xlu1 %1173 }
 0x5d9   :  { %6219 = vmatpush3.xpose.msk.msra.mxu0 %vm487_vm1, %v1174_v9 }
 0x5da   :  { %6228 = vmatprep.subr.mxu0 %v7068_v4 }
 0x5dc   :  { %v1252_v24 = vpop.permute.xlu1 %1251 }
 0x5de   :  { %v6731_v13 = vpop.eup %6730 }
 0x5df   :  { %v992_v14 = vsel %vm642_vm2, %v6731_v13, 0.0 }
 0x5e0   :  { %993 = vadd.xlane.f32.xlu0 %v992_v14  ;;  %v1250_v26 = vpop.permute.xlu1 %1249 }
 0x5e2   :  { %v6733_v15 = vpop.eup %6732 }
 0x5e3   :  { %v995_v16 = vsel %vm642_vm2, %v6733_v15, 0.0 }
 0x5e4   :  { %996 = vadd.xlane.f32.xlu0 %v995_v16 }
 0x5fa   :  { %1003 = vrot.lane.b32.xlu0 %v7294_v12, %s7071_s29 }
 0x5fe   :  { %1171 = vrot.lane.b32.xlu0 %v7280_v7, %s7064_s3 }
 0x669   :  { %v994_v17 = vpop.xlane.xlu0 %993 }
 0x66a   :  { %6734 = vrcp.f32 %v994_v17 }
 0x66d   :  { %v997_v18 = vpop.xlane.xlu0 %996 }
 0x66e   :  { %6736 = vrcp.f32 %v997_v18 }
 0x671   :  { %v1004_v19 = vpop.permute.xlu0 %1003 }
 0x672   :  { %6209 = vmatpush3.msra.mxu1 %v1004_v19 }
 0x673   :  { %6213 = vmatprep.subr.mxu1 %v7068_v4 }
 0x675   :  { %v1172_v20 = vpop.permute.xlu0 %1171 }
 0x676   :  { %6221 = vmatmul.mubr.msk.f32.vlgmr.msra.gmra.mxu0 %vm487_vm1, %v1172_v20 }
 0x677   :  { %v6735_v21 = vpop.eup %6734  ;;  %6230 = vmatprep.mubr.msk.f32.mxu0 %vm7070_vm0, %v7068_v4 }
 0x678   :  { %v1000_v22 = vmul.f32 %v6735_v21, %v6731_v13 }
 0x67a   :  { %6211 = vmatmul.mubr.msk.f32.vlgmr.msra.gmra.mxu1 %vm642_vm2, %v1000_v22 }
 0x67b   :  { %v6737_v23 = vpop.eup %6736  ;;  %6214 = vmatpush3.msra.mxu1 %v1081_v8  ;;  %6215 = vmatprep.mubr.msk.f32.mxu1 %vm7070_vm0, %v7068_v4 }
 0x67c   :  { %6223 = vmatprep.subr.mxu1 %v7068_v4  ;;  %v1001_v25 = vmul.f32 %v6737_v23, %v6733_v15 }
 0x67e   :  { %6216 = vmatmul.mubr.msk.f32.vlgmr.msra.gmra.mxu1 %vm642_vm2, %v1001_v25 }
 0x67f   :  { %6224 = vmatpush3.xpose.msk.msra.mxu1 %vm487_vm1, %v1252_v24  ;;  %6225 = vmatprep.mubr.msk.f32.mxu1 %vm7070_vm0, %v7068_v4 }
 0x680   :  { %6233 = vmatprep.subr.mxu1 %v7068_v4 }
 0x682   :  { %6226 = vmatmul.mubr.msk.f32.vlgmr.msra.gmra.mxu1 %vm487_vm1, %v1250_v26 }
 0x683   :  { %6235 = vmatprep.mubr.msk.f32.mxu1 %vm7070_vm0, %v7068_v4 }
 0x736   :  { %v1245_v28 = vpop.f32.mrf.mxu0 }
 0x737   :  { %v1327_v29 = vmul.f32 0.17677669, %v1245_v28 }
 0x738   :  { %v6222_v30 = vpop.f32.mrf.mxu0 }
 0x739   :  { %v1329_v31 = vsel %vm642_vm2, %v1327_v29, -inf }
 0x73a   :  { %1330 = vmax.xlane.f32.xlu0 %v1329_v31  ;;  %v7369_v32 = vpop.f32.mrf.mxu1 }
 0x73b   :  { %v5938_v19 = vpack.c.bf16 %v7369_v32, %v7369_v32 }
 0x73c   :  { %v6212_v33 = vpop.f32.mrf.mxu1 }
 0x73e   :  { %v7371_v34 = vpop.f32.mrf.mxu1 }
 0x73f   :  { %v5939_v20 = vpack.c.bf16 %v7371_v34, %v7371_v34 }
 0x740   :  { %v6217_v35 = vpop.f32.mrf.mxu1 }
 0x742   :  { %v1323_v36 = vpop.f32.mrf.mxu1 }
 0x743   :  { %v1328_v37 = vmul.f32 0.17677669, %v1323_v36 }
 0x744   :  { %v6227_v38 = vpop.f32.mrf.mxu1 }
 0x745   :  { %v1332_v39 = vsel %vm642_vm2, %v1328_v37, -inf }
 0x746   :  { %1333 = vmax.xlane.f32.xlu1 %v1332_v39 }
 0x757   :  { %1427 = vrot.lane.b32.xlu1 %v7276_v6, %s7064_s3 }
 0x75b   :  { %1520 = vrot.lane.b32.xlu1 %v7274_v2, %s7072_s30 }
 0x75f   :  { %1598 = vrot.lane.b32.xlu1 %v7283_v10, %s7072_s30 }
 0x763   :  { %1596 = vrot.lane.b32.xlu1 %v7291_v11, %s7072_s30 }
 0x7c3   :  { %v1331_v40 = vpop.xlane.xlu0 %1330 }
 0x7c4   :  { %v1335_v41 = vsub.f32 %v1327_v29, %v1331_v40 }
 0x7c6   :  { %v1337_v42 = vmul.f32 1.442695, %v1335_v41 }
 0x7c8   :  { %6738 = vpow2.f32 %v1337_v42 }
 0x7cf   :  { %v1334_v43 = vpop.xlane.xlu1 %1333 }
 0x7d0   :  { %v1336_v44 = vsub.f32 %v1328_v37, %v1334_v43 }
 0x7d2   :  { %v1339_v45 = vmul.f32 1.442695, %v1336_v44  ;;  %v6492_v44 = vld [vmem:[%s7943_s5 + $0x38] sm:$0xff]  }
 0x7d3   :  { %v1428_v46 = vpop.permute.xlu1 %1427 }
 0x7d4   :  { %6740 = vpow2.f32 %v1339_v45  ;;  %6234 = vmatpush3.msra.mxu1 %v1428_v46  ;;  %v6493_v45 = vld [vmem:[%s7943_s5 + $0x30] sm:$0xff]   ;;  %v6494_v46 = vld [vmem:[%s7943_s5 + $0x28] sm:$0xff]  }
 0x7d5   :  { %v6739_v47 = vpop.eup %6738  ;;  %6243 = vmatprep.subr.mxu1 %v7068_v4 }
 0x7d6   :  { %v1341_v2 = vsel %vm642_vm2, %v6739_v47, 0.0 }
 0x7d7   :  { %1342 = vadd.xlane.f32.xlu0 %v1341_v2  ;;  %v1521_v59 = vpop.permute.xlu1 %1520  ;;  %v6496_v2 = vld [vmem:[%s7943_s5 + $0x18] sm:$0xff]  }
 0x7db   :  { %v1599_v61 = vpop.permute.xlu1 %1598 }
 0x7df   :  { %v1597_v63 = vpop.permute.xlu1 %1596 }
 0x7e1   :  { %v6741_v10 = vpop.eup %6740 }
 0x7e2   :  { %v1344_v48 = vsel %vm642_vm2, %v6741_v10, 0.0 }
 0x7e3   :  { %1345 = vadd.xlane.f32.xlu0 %v1344_v48 }
 0x7f9   :  { %1351 = vrot.lane.b32.xlu0 %v7294_v12, %s7064_s3 }
 0x7fd   :  { %1518 = vrot.lane.b32.xlu0 %v7280_v7, %s7072_s30 }
 0x860   :  { %v1343_v11 = vpop.xlane.xlu0 %1342 }
 0x861   :  { %6742 = vrcp.f32 %v1343_v11 }
 0x86c   :  { %v1346_v49 = vpop.xlane.xlu0 %1345 }
 0x86d   :  { %6744 = vrcp.f32 %v1346_v49  ;;  %v6498_v49 = vld [vmem:[%s7943_s5 + $0x8] sm:$0xff]  }
 0x86e   :  { %v6743_v52 = vpop.eup %6742 }
 0x86f   :  { %v1349_v53 = vmul.f32 %v6743_v52, %v6739_v47  ;;  %v6495_v47 = vld [vmem:[%s7943_s5 + $0x20] sm:$0xff]  }
 0x870   :  { %v1352_v56 = vpop.permute.xlu0 %1351 }
 0x871   :  { %6229 = vmatpush3.msra.mxu0 %v1352_v56 }
 0x872   :  { %6231 = vmatmul.mubr.msk.f32.vlgmr.msra.gmra.mxu0 %vm642_vm2, %v1349_v53  ;;  %6238 = vmatprep.subr.mxu0 %v7068_v4  ;;  %v6499_v53 = vld [vmem:[%s7943_s5] sm:$0xff]  }
 0x873   :  { %6239 = vmatpush3.xpose.msk.msra.mxu0 %vm487_vm1, %v1521_v59  ;;  %6240 = vmatprep.mubr.msk.f32.mxu0 %vm7070_vm0, %v7068_v4 }
 0x874   :  { %v1519_v60 = vpop.permute.xlu0 %1518  ;;  %6248 = vmatprep.subr.mxu0 %v7068_v4 }
 0x876   :  { %6241 = vmatmul.mubr.msk.f32.vlgmr.msra.gmra.mxu0 %vm487_vm1, %v1519_v60 }
 0x877   :  { %6250 = vmatprep.mubr.msk.f32.mxu0 %vm7070_vm0, %v7068_v4 }
 0x87a   :  { %v6745_v7 = vpop.eup %6744 }
 0x87b   :  { %v1350_v62 = vmul.f32 %v6745_v7, %v6741_v10  ;;  %v6497_v10 = vld [vmem:[%s7943_s5 + $0x10] sm:$0xff]  }
 0x87d   :  { %6236 = vmatmul.mubr.msk.f32.vlgmr.msra.gmra.mxu1 %vm642_vm2, %v1350_v62 }
 0x87e   :  { %6244 = vmatpush3.xpose.msk.msra.mxu1 %vm487_vm1, %v1599_v61  ;;  %6245 = vmatprep.mubr.msk.f32.mxu1 %vm7070_vm0, %v7068_v4 }
 0x87f   :  { %6253 = vmatprep.subr.mxu1 %v7068_v4 }
 0x881   :  { %6246 = vmatmul.mubr.msk.f32.vlgmr.msra.gmra.mxu1 %vm487_vm1, %v1597_v63  ;;  %v5682_v63 = vld [vmem:[%s7944_s6] ss:$0 sm:$0xff] }
 0x882   :  { %6255 = vmatprep.mubr.msk.f32.mxu1 %vm7070_vm0, %v7068_v4 }
 0x932   :  { %v1423_v0 = vpop.f32.mrf.mxu0 }
 0x933   :  { %v5940_v36 = vpack.c.bf16 %v1423_v0, %v1423_v0 }
 0x934   :  { %v6232_v1 = vpop.f32.mrf.mxu0 }
 0x936   :  { %v1592_v3 = vpop.f32.mrf.mxu0 }
 0x937   :  { %v1674_v5 = vmul.f32 0.17677669, %v1592_v3 }
 0x938   :  { %v6242_v8 = vpop.f32.mrf.mxu0 }
 0x939   :  { %v1676_v9 = vsel %vm642_vm2, %v1674_v5, -inf }
 0x93a   :  { %1677 = vmax.xlane.f32.xlu0 %v1676_v9 }
 0x93d   :  { %v1499_v13 = vpop.f32.mrf.mxu1 }
 0x93e   :  { %v5941_v21 = vpack.c.bf16 %v1499_v13, %v1499_v13 }
 0x93f   :  { %v6237_v14 = vpop.f32.mrf.mxu1 }
 0x941   :  { %v1670_v15 = vpop.f32.mrf.mxu1 }
 0x942   :  { %v1675_v16 = vmul.f32 0.17677669, %v1670_v15  ;;  %v6501_v15 = vld [vmem:[#allocation9 + $0xe0] ss:$16 sps:$4 sm:$0xff]  }
 0x943   :  { %v6247_v17 = vpop.f32.mrf.mxu1 }
 0x944   :  { %v1679_v18 = vsel %vm642_vm2, %v1675_v16, -inf  ;;  %v6504_v17 = vld [vmem:[#allocation9 + $0xe8] ss:$16 sps:$4 sm:$0xff]  }
 0x945   :  { %1680 = vmax.xlane.f32.xlu1 %v1679_v18  ;;  %v6506_v18 = vld [vmem:[#allocation9 + $0xec] ss:$16 sps:$4 sm:$0xff]  }
 0x956   :  { %1774 = vrot.lane.b32.xlu1 %v7276_v6, %s7072_s30 }
 0x95a   :  { %1162 = vrot.lane.b32.xlu1 %v5938_v19, %s7072_s30 }
 0x95e   :  { %1164 = vrot.lane.b32.xlu1 %v5939_v20, %s7072_s30 }
 0x962   :  { %1511 = vrot.lane.b32.xlu1 %v5941_v21, %s7064_s3 }
 0x9c3   :  { %v1678_v22 = vpop.xlane.xlu0 %1677 }
 0x9c4   :  { %v1682_v23 = vsub.f32 %v1674_v5, %v1678_v22 }
 0x9c6   :  { %v1684_v24 = vmul.f32 1.442695, %v1682_v23 }
 0x9c8   :  { %6746 = vpow2.f32 %v1684_v24 }
 0x9ce   :  { %v1681_v25 = vpop.xlane.xlu1 %1680 }
 0x9cf   :  { %v1683_v26 = vsub.f32 %v1675_v16, %v1681_v25  ;;  %v6503_v16 = vld [vmem:[#allocation9 + $0xe4] ss:$16 sps:$4 sm:$0xff]  }
 0x9d0   :  { %v6509_v25 = vld [vmem:[#allocation9 + $0xc4] ss:$16 sps:$4 sm:$0xff]  }
 0x9d1   :  { %v1686_v6 = vmul.f32 1.442695, %v1683_v26  ;;  %v6512_v26 = vld [vmem:[#allocation9 + $0xcc] ss:$16 sps:$4 sm:$0xff]  }
 0x9d2   :  { %v1775_v28 = vpop.permute.xlu1 %1774 }
 0x9d3   :  { %6748 = vpow2.f32 %v1686_v6  ;;  %6254 = vmatpush3.msra.mxu1 %v1775_v28  ;;  %v6507_v6 = vld [vmem:[#allocation9 + $0xc0] ss:$16 sps:$4 sm:$0xff]   ;;  %v6510_v28 = vld [vmem:[#allocation9 + $0xc8] ss:$16 sps:$4 sm:$0xff]  }
 0x9d4   :  { %2242 = vmatprep.subr.bf16.mxu1 %v6503_v16  ;;  %v6551_v16 = vld [vmem:[#allocation11 + $0x38] sm:$0xff]  }
 0x9d5   :  { %v6747_v29 = vpop.eup %6746 }
 0x9d6   :  { %v1163_v30 = vpop.permute.xlu1 %1162  ;;  %v1688_v31 = vsel %vm642_vm2, %v6747_v29, 0.0 }
 0x9d7   :  { %1169 = vst.msk [vmem:[#allocation2] sm:$0xf] %vm1168_vm4, %v1163_v30  ;;  %1689 = vadd.xlane.f32.xlu0 %v1688_v31  ;;  %v6518_v30 = vld [vmem:[#allocation9 + $0xac] ss:$16 sps:$4 sm:$0xff]   ;;  %v6513_v31 = vld [vmem:[#allocation9 + $0xa0] ss:$16 sps:$4 sm:$0xff]  }
 0x9da   :  { %v1165_v32 = vpop.permute.xlu1 %1164 }
 0x9db   :  { %1170 = vst.msk [vmem:[#allocation2 + $0x4] sm:$0xf] %vm1168_vm4, %v1165_v32  ;;  %v6516_v32 = vld [vmem:[#allocation9 + $0xa8] ss:$16 sps:$4 sm:$0xff]  }
 0x9de   :  { %v1512_v33 = vpop.permute.xlu1 %1511 }
 0x9df   :  { %1517 = vst.msk [vmem:[#allocation2 + $0x4] sm:$0xf] %vm1515_vm5, %v1512_v33  ;;  %v6519_v33 = vld [vmem:[#allocation9 + $0x80] ss:$16 sps:$4 sm:$0xff]  }
 0x9e0   :  { %v6749_v34 = vpop.eup %6748 }
 0x9e1   :  { %v1691_v35 = vsel %vm642_vm2, %v6749_v34, 0.0 }
 0x9e2   :  { %1692 = vadd.xlane.f32.xlu0 %v1691_v35  ;;  %v6522_v35 = vld [vmem:[#allocation9 + $0x88] ss:$16 sps:$4 sm:$0xff]  }
 0x9f8   :  { %1698 = vrot.lane.b32.xlu0 %v7294_v12, %s7072_s30 }
 0x9fc   :  { %1509 = vrot.lane.b32.xlu0 %v5940_v36, %s7064_s3  ;;  %v6524_v36 = vld [vmem:[#allocation9 + $0x8c] ss:$16 sps:$4 sm:$0xff]  }
 0xa60   :  { %v1690_v37 = vpop.xlane.xlu0 %1689 }
 0xa61   :  { %6750 = vrcp.f32 %v1690_v37  ;;  %v6527_v37 = vld [vmem:[#allocation9 + $0x64] ss:$16 sps:$4 sm:$0xff]  }
 0xa6b   :  { %v1693_v38 = vpop.xlane.xlu0 %1692 }
 0xa6c   :  { %6752 = vrcp.f32 %v1693_v38  ;;  %v6530_v38 = vld [vmem:[#allocation9 + $0x6c] ss:$16 sps:$4 sm:$0xff]  }
 0xa6e   :  { %v6751_v39 = vpop.eup %6750 }
 0xa6f   :  { %v1699_v40 = vpop.permute.xlu0 %1698  ;;  %v1696_v41 = vmul.f32 %v6751_v39, %v6747_v29  ;;  %v6515_v29 = vld [vmem:[#allocation9 + $0xa4] ss:$16 sps:$4 sm:$0xff]   ;;  %v6525_v39 = vld [vmem:[#allocation9 + $0x60] ss:$16 sps:$4 sm:$0xff]  }
 0xa70   :  { %6249 = vmatpush3.msra.mxu0 %v1699_v40  ;;  %v6528_v40 = vld [vmem:[#allocation9 + $0x68] ss:$16 sps:$4 sm:$0xff]  }
 0xa71   :  { %6251 = vmatmul.mubr.msk.f32.vlgmr.msra.gmra.mxu0 %vm642_vm2, %v1696_v41  ;;  %6258 = vmatprep.subr.bf16.mxu0 %v7068_v4  ;;  %v6533_v41 = vld [vmem:[#allocation9 + $0x44] ss:$16 sps:$4 sm:$0xff]  }
 0xa72   :  { %6274 = vmatprep.mubr.msk.bf16.mxu0 %vm7070_vm0, %v7068_v4  ;;  %6259 = vmatpush3.bf16.msra.mxu0 %v6492_v44  ;;  %v6539_v44 = vld [vmem:[#allocation9 + $0x24] ss:$16 sps:$4 sm:$0xff]  }
 0xa73   :  { %v1510_v42 = vpop.permute.xlu0 %1509  ;;  %6260 = vmatprep.subr.bf16.mxu0 %v7068_v4 }
 0xa74   :  { %1516 = vst.msk [vmem:[#allocation2] sm:$0xf] %vm1515_vm5, %v1510_v42  ;;  %v6536_v42 = vld [vmem:[#allocation9 + $0x4c] ss:$16 sps:$4 sm:$0xff]  }
 0xa76   :  { %6261 = vmatpush3.bf16.msra.mxu0 %v6493_v45  ;;  %v6542_v45 = vld [vmem:[#allocation9 + $0x2c] ss:$16 sps:$4 sm:$0xff]  }
 0xa77   :  { %6262 = vmatprep.subr.bf16.mxu0 %v7068_v4 }
 0xa79   :  { %v6753_v12 = vpop.eup %6752 }
 0xa7a   :  { %v1697_v43 = vmul.f32 %v6753_v12, %v6749_v34  ;;  %6263 = vmatpush3.bf16.msra.mxu0 %v6494_v46  ;;  %v6521_v34 = vld [vmem:[#allocation9 + $0x84] ss:$16 sps:$4 sm:$0xff]   ;;  %v6531_v12 = vld [vmem:[#allocation9 + $0x40] ss:$16 sps:$4 sm:$0xff]  }
 0xa7b   :  { %6264 = vmatprep.subr.bf16.mxu0 %v7068_v4  ;;  %v6537_v46 = vld [vmem:[#allocation9 + $0x20] ss:$16 sps:$4 sm:$0xff]  }
 0xa7c   :  { %6256 = vmatmul.mubr.msk.f32.vlgmr.msra.gmra.mxu1 %vm642_vm2, %v1697_v43  ;;  %v6534_v43 = vld [vmem:[#allocation9 + $0x48] ss:$16 sps:$4 sm:$0xff]  }
 0xa7d   :  { %2274 = vmatprep.mubr.bf16.mxu1 %v7069_v27  ;;  %2243 = vmatpush1.bf16.msra.mxu1 %v6501_v15  ;;  %v6550_v15 = vld [vmem:[#allocation11 + $0xf8] sm:$0xff]  }
 0xa7e   :  { %6265 = vmatpush3.bf16.msra.mxu0 %v6495_v47  ;;  %2244 = vmatprep.subr.bf16.mxu1 %v6509_v25  ;;  %v6540_v47 = vld [vmem:[#allocation9 + $0x28] ss:$16 sps:$4 sm:$0xff]   ;;  %v6562_v25 = vld [vmem:[#allocation11 + $0xe0] sm:$0xff]  }
 0xa7f   :  { %6266 = vmatprep.subr.bf16.mxu0 %v7068_v4 }
 0xa81   :  { %2245 = vmatpush1.bf16.msra.mxu1 %v6507_v6  ;;  %v6564_v6 = vld [vmem:[#allocation11 + $0xa0] sm:$0xff]  }
 0xa82   :  { %6267 = vmatpush3.bf16.msra.mxu0 %v6496_v2  ;;  %2246 = vmatprep.subr.bf16.mxu1 %v6515_v29  ;;  %v6545_v2 = vld [vmem:[#allocation9 + $0x4] ss:$16 sps:$4 sm:$0xff]   ;;  %v6566_v29 = vld [vmem:[#allocation11 + $0xd8] sm:$0xff]  }
 0xa83   :  { %6268 = vmatprep.subr.bf16.mxu0 %v7068_v4 }
 0xa85   :  { %2247 = vmatpush1.bf16.msra.mxu1 %v6513_v31  ;;  %v6568_v31 = vld [vmem:[#allocation11 + $0x98] sm:$0xff]  }
 0xa86   :  { %6269 = vmatpush3.bf16.msra.mxu0 %v6497_v10  ;;  %2248 = vmatprep.subr.bf16.mxu1 %v6521_v34  ;;  %v6548_v10 = vld [vmem:[#allocation9 + $0xc] ss:$16 sps:$4 sm:$0xff]   ;;  %v6571_v34 = vld [vmem:[#allocation11 + $0x10] sm:$0xff]  }
 0xa87   :  { %6270 = vmatprep.subr.bf16.mxu0 %v7068_v4 }
 0xa89   :  { %2249 = vmatpush1.bf16.msra.mxu1 %v6519_v33  ;;  %v6570_v33 = vld [vmem:[#allocation11 + $0xd0] sm:$0xff]  }
 0xa8a   :  { %6271 = vmatpush3.bf16.msra.mxu0 %v6498_v49  ;;  %2250 = vmatprep.subr.bf16.mxu1 %v6527_v37  ;;  %v6574_v37 = vld [vmem:[#allocation11 + $0xc8] sm:$0xff]  }
 0xa8b   :  { %6272 = vmatprep.subr.bf16.mxu0 %v7068_v4 }
 0xa8d   :  { %2251 = vmatpush1.bf16.msra.mxu1 %v6525_v39  ;;  %v6576_v39 = vld [vmem:[#allocation11 + $0x88] sm:$0xff]  }
 0xa8e   :  { %6273 = vmatpush3.bf16.msra.mxu0 %v6499_v53  ;;  %2252 = vmatprep.subr.bf16.mxu1 %v6533_v41  ;;  %v6578_v41 = vld [vmem:[#allocation11 + $0xc0] sm:$0xff]  }
 0xa8f   :  { %2285 = vmatprep.subr.bf16.mxu0 %v6506_v18  ;;  %v6553_v18 = vld [vmem:[#allocation11 + $0x70] sm:$0xff]  }
 0xa91   :  { %2253 = vmatpush1.bf16.msra.mxu1 %v6531_v12  ;;  %v6580_v12 = vld [vmem:[#allocation11 + $0x80] sm:$0xff]  }
 0xa92   :  { %2254 = vmatprep.subr.bf16.mxu1 %v6539_v44  ;;  %v2076_v44 = vsub.s32 3, %v7257_v54 }
 0xa95   :  { %2255 = vmatpush1.bf16.msra.mxu1 %v6537_v46 }
 0xa96   :  { %2256 = vmatprep.subr.bf16.mxu1 %v6545_v2 }
 0xb31   :  { %v1770_v48 = vpop.f32.mrf.mxu0 }
 0xb32   :  { %v5942_v11 = vpack.c.bf16 %v1770_v48, %v1770_v48  ;;  %v6543_v48 = vld [vmem:[#allocation9] ss:$16 sps:$4 sm:$0xff]  }
 0xb33   :  { %v6252_v52 = vpop.f32.mrf.mxu0  ;;  %2257 = vmatpush1.bf16.msra.mxu1 %v6543_v48 }
 0xb34   :  { %1856 = vrot.lane.b32.xlu0 %v5942_v11, %s7071_s29  ;;  %v6546_v11 = vld [vmem:[#allocation9 + $0x8] ss:$16 sps:$4 sm:$0xff]  }
 0xb3c   :  { %v1846_v56 = vpop.f32.mrf.mxu1 }
 0xb3d   :  { %v5943_v59 = vpack.c.bf16 %v1846_v56, %v1846_v56 }
 0xb3e   :  { %v6257_v60 = vpop.f32.mrf.mxu1 }
 0xb3f   :  { %1858 = vrot.lane.b32.xlu1 %v5943_v59, %s7071_s29 }
 0xba6   :  { %v1857_v7 = vpop.permute.xlu0 %1856 }
 0xba7   :  { %1863 = vst.msk [vmem:[#allocation2] sm:$0xf] %vm1862_vm6, %v1857_v7 }
 0xbb1   :  { %v1859_v61 = vpop.permute.xlu1 %1858 }
 0xbb2   :  { %1864 = vst.msk [vmem:[#allocation2 + $0x4] sm:$0xf] %vm1862_vm6, %v1859_v61 }
 0xbb9   :  { %v6500_v62 = vld [vmem:[#allocation2] sm:$0xff]  }
 0xbba   :  { %6275 = vmatmul.mubr.bf16.vlgmr.msra.gmra.mxu0 %v6500_v62  ;;  %v5692_v62 = vld [vmem:[%s7945_s7] ss:$0 sm:$0xff] }
 0xbbb   :  { %2317 = vmatprep.mubr.bf16.mxu0 %v7069_v27  ;;  %2286 = vmatpush1.bf16.msra.mxu0 %v6504_v17  ;;  %v6552_v17 = vld [vmem:[#allocation11 + $0xb8] sm:$0xff]  }
 0xbbc   :  { %2287 = vmatprep.subr.bf16.mxu0 %v6512_v26  ;;  %v6563_v26 = vld [vmem:[#allocation11 + $0x20] sm:$0xff]  }
 0xbbf   :  { %2288 = vmatpush1.bf16.msra.mxu0 %v6510_v28  ;;  %v6565_v28 = vld [vmem:[#allocation11 + $0x58] sm:$0xff]  }
 0xbc0   :  { %2289 = vmatprep.subr.bf16.mxu0 %v6518_v30  ;;  %v6567_v30 = vld [vmem:[#allocation11 + $0x18] sm:$0xff]  }
 0xbc3   :  { %2290 = vmatpush1.bf16.msra.mxu0 %v6516_v32  ;;  %v6569_v32 = vld [vmem:[#allocation11 + $0x50] sm:$0xff]  }
 0xbc4   :  { %2291 = vmatprep.subr.bf16.mxu0 %v6524_v36  ;;  %v6573_v36 = vld [vmem:[#allocation11 + $0x48] sm:$0xff]  }
 0xbc7   :  { %2292 = vmatpush1.bf16.msra.mxu0 %v6522_v35  ;;  %v6572_v35 = vld [vmem:[#allocation11 + $0x90] sm:$0xff]  }
 0xbc8   :  { %2293 = vmatprep.subr.bf16.mxu0 %v6530_v38  ;;  %v6575_v38 = vld [vmem:[#allocation11 + $0x8] sm:$0xff]  }
 0xbcb   :  { %2294 = vmatpush1.bf16.msra.mxu0 %v6528_v40  ;;  %v6577_v40 = vld [vmem:[#allocation11 + $0x40] sm:$0xff]  }
 0xbcc   :  { %2295 = vmatprep.subr.bf16.mxu0 %v6536_v42  ;;  %v6579_v42 = vld [vmem:[#allocation11] sm:$0xff]  }
 0xbcf   :  { %2296 = vmatpush1.bf16.msra.mxu0 %v6534_v43  ;;  %v2060_v43 = vld [vmem:[%s7948_s10] sm:$0xf] }
 0xbd0   :  { %2297 = vmatprep.subr.bf16.mxu0 %v6542_v45  ;;  %v2065_v45 = vrot.slane %v2060_v43, %v7266_v57  ;;  %v2073_v46 = vrot.slane %v2060_v43, %v7269_v58  ;;  %v2077_v2 = vrot.slane %v2060_v43, %v2076_v44 }
 0xbd3   :  { %2298 = vmatpush1.bf16.msra.mxu0 %v6540_v47  ;;  %v2069_v47 = vrot.slane %v2060_v43, %v7260_v55 }
 0xbd4   :  { %2299 = vmatprep.subr.bf16.mxu0 %v6548_v10 }
 0xbd7   :  { %2300 = vmatpush1.bf16.msra.mxu0 %v6546_v11 }
 0xbd8   :  { %6024 = vmatprep.subr.bf16.mxu0 %v6550_v15 }
 0xc7a   :  { %v1978_v0 = vpop.f32.mrf.mxu0 }
 0xc7b   :  { %v1979_v1 = vadd.f32 %v5682_v63, %v1978_v0 }
 0xc7c   :  { %v6276_v3 = vpop.f32.mrf.mxu0 }
 0xc7d   :  { %v1985_v5 = vadd.f32 %v1979_v1, %v7247_v50  ;;  %v5693_v3 = vld [vmem:[#allocation8] ss:$0 sm:$0xff] }
 0xc7e   :  { %v1981_v8 = vpop.f32.mrf.mxu0 }
 0xc7f   :  { %v1982_v9 = vadd.f32 %v5682_v63, %v1981_v8  ;;  %1989 = vadd.xlane.f32.xlu0 %v1985_v5 }
 0xc80   :  { %v6277_v13 = vpop.f32.mrf.mxu0 }
 0xc81   :  { %v1986_v14 = vadd.f32 %v1982_v9, %v7249_v51 }
 0xc83   :  { %1991 = vadd.xlane.f32.xlu1 %v1986_v14 }
 0xd08   :  { %v1990_v19 = vpop.xlane.xlu0 %1989 }
 0xd09   :  { %v1993_v20 = vmul.f32 0.0078125, %v1990_v19  ;;  %v6554_v19 = vld [vmem:[#allocation11 + $0xf0] sm:$0xff]  }
 0xd0b   :  { %v7473_v21 = vsub.f32 %v1985_v5, %v1993_v20  ;;  %v6555_v20 = vld [vmem:[#allocation11 + $0x30] sm:$0xff]  }
 0xd0c   :  { %v1992_v50 = vpop.xlane.xlu1 %1991 }
 0xd0d   :  { %v1994_v22 = vmul.f32 0.0078125, %v1992_v50  ;;  %v1997_v23 = vmul.f32 %v7473_v21, %v7473_v21  ;;  %v6557_v50 = vld [vmem:[#allocation11 + $0x68] sm:$0xff]  }
 0xd0f   :  { %v7477_v24 = vsub.f32 %v1986_v14, %v1994_v22  ;;  %1999 = vadd.xlane.f32.xlu0 %v1997_v23  ;;  %v6549_v14 = vld [vmem:[#allocation11 + $0x78] sm:$0xff]   ;;  %v6558_v22 = vld [vmem:[#allocation11 + $0xe8] sm:$0xff]  }
 0xd10   :  { %6002 = vmatprep.subr.bf16.mxu1 %v6549_v14  ;;  %v6559_v23 = vld [vmem:[#allocation11 + $0x28] sm:$0xff]  }
 0xd11   :  { %v1998_v51 = vmul.f32 %v7477_v24, %v7477_v24 }
 0xd13   :  { %2001 = vadd.xlane.f32.xlu0 %v1998_v51  ;;  %v6561_v51 = vld [vmem:[#allocation11 + $0x60] sm:$0xff]  }
 0xd98   :  { %v2000_v49 = vpop.xlane.xlu0 %1999 }
 0xd99   :  { %v2003_v52 = vmul.f32 0.0078125, %v2000_v49 }
 0xd9b   :  { %v2005_v53 = vadd.f32 1e-12, %v2003_v52 }
 0xd9c   :  { %v2002_v56 = vpop.xlane.xlu0 %2001 }
 0xd9d   :  { %6754 = vrsqrt.f32 %v2005_v53  ;;  %v2004_v59 = vmul.f32 0.0078125, %v2002_v56 }
 0xd9f   :  { %v2006_v60 = vadd.f32 1e-12, %v2004_v59 }
 0xda1   :  { %6756 = vrsqrt.f32 %v2006_v60 }
 0xdaa   :  { %v6755_v7 = vpop.eup %6754 }
 0xdab   :  { %v2009_v61 = vmul.f32 %v6755_v7, %v7473_v21  ;;  %v6556_v21 = vld [vmem:[#allocation11 + $0xb0] sm:$0xff]  }
 0xdad   :  { %v2017_v1 = vmul.f32 %v5692_v62, %v2009_v61 }
 0xdae   :  { %v6757_v63 = vpop.eup %6756 }
 0xdaf   :  { %v2010_v0 = vmul.f32 %v6757_v63, %v7477_v24  ;;  %v7486_v8 = vadd.f32 %v5693_v3, %v2017_v1  ;;  %v6560_v24 = vld [vmem:[#allocation11 + $0xa8] sm:$0xff]  }
 0xdb1   :  { %v2018_v5 = vmul.f32 %v5692_v62, %v2010_v0 }
 0xdb3   :  { %v7488_v9 = vadd.f32 %v5693_v3, %v2018_v5 }
 0xdb5   :  { %v2027_v13 = vpack.c.bf16 %v7488_v9, %v7486_v8 }
 0xdb7   :  { %2275 = vmatmul.mubr.bf16.vlgmr.msra.gmra.mxu1 %v2027_v13  ;;  %2318 = vmatmul.mubr.bf16.vlgmr.msra.gmra.mxu0 %v2027_v13 }
 0xdb8   :  { %6003 = vmatpush3.bf16.msra.mxu1 %v6551_v16  ;;  %6025 = vmatpush3.bf16.msra.mxu0 %v6552_v17 }
 0xdb9   :  { %6004 = vmatprep.subr.bf16.mxu1 %v6553_v18  ;;  %6026 = vmatprep.subr.bf16.mxu0 %v6554_v19 }
 0xdbc   :  { %6005 = vmatpush3.bf16.msra.mxu1 %v6555_v20  ;;  %6027 = vmatpush3.bf16.msra.mxu0 %v6556_v21 }
 0xdbd   :  { %6006 = vmatprep.subr.bf16.mxu1 %v6557_v50  ;;  %6028 = vmatprep.subr.bf16.mxu0 %v6558_v22 }
 0xdc0   :  { %6007 = vmatpush3.bf16.msra.mxu1 %v6559_v23  ;;  %6029 = vmatpush3.bf16.msra.mxu0 %v6560_v24 }
 0xdc1   :  { %6008 = vmatprep.subr.bf16.mxu1 %v6561_v51  ;;  %6030 = vmatprep.subr.bf16.mxu0 %v6562_v25 }
 0xdc4   :  { %6009 = vmatpush3.bf16.msra.mxu1 %v6563_v26  ;;  %6031 = vmatpush3.bf16.msra.mxu0 %v6564_v6 }
 0xdc5   :  { %6010 = vmatprep.subr.bf16.mxu1 %v6565_v28  ;;  %6032 = vmatprep.subr.bf16.mxu0 %v6566_v29 }
 0xdc8   :  { %6011 = vmatpush3.bf16.msra.mxu1 %v6567_v30  ;;  %6033 = vmatpush3.bf16.msra.mxu0 %v6568_v31 }
 0xdc9   :  { %6012 = vmatprep.subr.bf16.mxu1 %v6569_v32  ;;  %6034 = vmatprep.subr.bf16.mxu0 %v6570_v33 }
 0xdcc   :  { %6013 = vmatpush3.bf16.msra.mxu1 %v6571_v34  ;;  %6035 = vmatpush3.bf16.msra.mxu0 %v6572_v35 }
 0xdcd   :  { %6014 = vmatprep.subr.bf16.mxu1 %v6573_v36  ;;  %6036 = vmatprep.subr.bf16.mxu0 %v6574_v37 }
 0xdd0   :  { %6015 = vmatpush3.bf16.msra.mxu1 %v6575_v38  ;;  %6037 = vmatpush3.bf16.msra.mxu0 %v6576_v39 }
 0xdd1   :  { %6016 = vmatprep.subr.bf16.mxu1 %v6577_v40  ;;  %6038 = vmatprep.subr.bf16.mxu0 %v6578_v41 }
 0xdd4   :  { %6017 = vmatpush3.bf16.msra.mxu1 %v6579_v42  ;;  %6039 = vmatpush3.bf16.msra.mxu0 %v6580_v12 }
 0xdd5   :  { %6278 = vmatprep.subr.bf16.mxu0 %v7068_v4 }
 0xe77   :  { %v2276_v10 = vpop.f32.mrf.mxu1  ;;  %v2319_v48 = vpop.f32.mrf.mxu0 }
 0xe78   :  { %v7502_v11 = vadd.f32 %v2276_v10, %v2065_v45  ;;  %v7504_v49 = vadd.f32 %v2319_v48, %v2073_v46 }
 0xe79   :  { %v2278_v52 = vpop.f32.mrf.mxu1  ;;  %v2321_v53 = vpop.f32.mrf.mxu0 }
 0xe7a   :  { %v2328_v56 = vmul.f32 %v7502_v11, %v7502_v11  ;;  %v2330_v59 = vmul.f32 %v7504_v49, %v7504_v49  ;;  %v7510_v60 = vadd.f32 %v2278_v52, %v2069_v47  ;;  %v7512_v7 = vadd.f32 %v2321_v53, %v2077_v2 }
 0xe7b   :  { %v2280_v61 = vpop.f32.mrf.mxu1  ;;  %v2323_v62 = vpop.f32.mrf.mxu0 }
 0xe7c   :  { %v2336_v63 = vmul.f32 %v2328_v56, %v7502_v11  ;;  %v2338_v0 = vmul.f32 %v2330_v59, %v7504_v49  ;;  %v2329_v1 = vmul.f32 %v7510_v60, %v7510_v60  ;;  %v2331_v3 = vmul.f32 %v7512_v7, %v7512_v7 }
 0xe7d   :  { %v7520_v5 = vadd.f32 %v2280_v61, %v2065_v45  ;;  %v7522_v13 = vadd.f32 %v2323_v62, %v2073_v46  ;;  %v2282_v14 = vpop.f32.mrf.mxu1  ;;  %v2325_v15 = vpop.f32.mrf.mxu0 }
 0xe7e   :  { %v2344_v16 = vmul.f32 0.044715, %v2336_v63  ;;  %v2346_v17 = vmul.f32 0.044715, %v2338_v0  ;;  %v2337_v18 = vmul.f32 %v2329_v1, %v7510_v60  ;;  %v2339_v19 = vmul.f32 %v2331_v3, %v7512_v7 }
 0xe7f   :  { %v2332_v20 = vmul.f32 %v7520_v5, %v7520_v5  ;;  %v2334_v21 = vmul.f32 %v7522_v13, %v7522_v13  ;;  %v7530_v50 = vadd.f32 %v2282_v14, %v2069_v47  ;;  %v7532_v22 = vadd.f32 %v2325_v15, %v2077_v2 }
 0xe80   :  { %v2352_v23 = vadd.f32 %v2344_v16, %v7502_v11  ;;  %v2354_v24 = vadd.f32 %v2346_v17, %v7504_v49  ;;  %v2345_v51 = vmul.f32 0.044715, %v2337_v18  ;;  %v2347_v25 = vmul.f32 0.044715, %v2339_v19 }
 0xe81   :  { %v2340_v26 = vmul.f32 %v2332_v20, %v7520_v5  ;;  %v2342_v6 = vmul.f32 %v2334_v21, %v7522_v13  ;;  %v2333_v28 = vmul.f32 %v7530_v50, %v7530_v50  ;;  %v2335_v29 = vmul.f32 %v7532_v22, %v7532_v22 }
 0xe82   :  { %v2360_v30 = vmul.f32 0.7978846, %v2352_v23  ;;  %v2362_v31 = vmul.f32 0.7978846, %v2354_v24  ;;  %v2353_v32 = vadd.f32 %v2345_v51, %v7510_v60  ;;  %v2355_v33 = vadd.f32 %v2347_v25, %v7512_v7 }
 0xe83   :  { %v2348_v34 = vmul.f32 0.044715, %v2340_v26  ;;  %v2350_v35 = vmul.f32 0.044715, %v2342_v6  ;;  %v2341_v36 = vmul.f32 %v2333_v28, %v7530_v50  ;;  %v2343_v37 = vmul.f32 %v2335_v29, %v7532_v22 }
 0xe84   :  { %6758 = vtanh.f32 %v2360_v30  ;;  %v2361_v38 = vmul.f32 0.7978846, %v2353_v32  ;;  %v2363_v39 = vmul.f32 0.7978846, %v2355_v33 }
 0xe85   :  { %6760 = vtanh.f32 %v2362_v31  ;;  %v2356_v40 = vadd.f32 %v2348_v34, %v7520_v5  ;;  %v2358_v41 = vadd.f32 %v2350_v35, %v7522_v13  ;;  %v2349_v42 = vmul.f32 0.044715, %v2341_v36 }
 0xe86   :  { %6762 = vtanh.f32 %v2361_v38  ;;  %v2351_v12 = vmul.f32 0.044715, %v2343_v37 }
 0xe87   :  { %6764 = vtanh.f32 %v2363_v39  ;;  %v2364_v43 = vmul.f32 0.7978846, %v2356_v40  ;;  %v2366_v45 = vmul.f32 0.7978846, %v2358_v41  ;;  %v2357_v46 = vadd.f32 %v2349_v42, %v7530_v50 }
 0xe88   :  { %v2359_v47 = vadd.f32 %v2351_v12, %v7532_v22 }
 0xe89   :  { %6766 = vtanh.f32 %v2364_v43  ;;  %v2365_v2 = vmul.f32 0.7978846, %v2357_v46 }
 0xe8a   :  { %6768 = vtanh.f32 %v2366_v45  ;;  %v2367_v10 = vmul.f32 0.7978846, %v2359_v47 }
 0xe8b   :  { %6770 = vtanh.f32 %v2365_v2 }
 0xe8c   :  { %6772 = vtanh.f32 %v2367_v10 }
 0xe91   :  { %v6759_v48 = vpop.eup %6758 }
 0xe92   :  { %v6761_v52 = vpop.eup %6760  ;;  %v2376_v62 = vadd.f32 1.0, %v6759_v48  ;;  %v6581_v48 = vld [vmem:[#allocation6 + $0x168] ss:$12 sps:$4 sm:$0xff]  }
 0xe93   :  { %v6763_v53 = vpop.eup %6762  ;;  %v2378_v1 = vadd.f32 1.0, %v6761_v52  ;;  %v6583_v52 = vld [vmem:[#allocation6 + $0x16c] ss:$12 sps:$4 sm:$0xff]  }
 0xe94   :  { %v6765_v56 = vpop.eup %6764  ;;  %v2377_v59 = vadd.f32 1.0, %v6763_v53  ;;  %v2384_v20 = vmul.f32 0.5, %v2376_v62  ;;  %v6584_v53 = vld [vmem:[#allocation6 + $0x170] ss:$12 sps:$4 sm:$0xff]   ;;  %2971 = vmatprep.subr.bf16.mxu1 %v6583_v52 }
 0xe95   :  { %v2379_v63 = vadd.f32 1.0, %v6765_v56  ;;  %v2386_v51 = vmul.f32 0.5, %v2378_v1  ;;  %v6587_v1 = vld [vmem:[#allocation6 + $0x154] ss:$12 sps:$4 sm:$0xff]  }
 0xe96   :  { %v6767_v61 = vpop.eup %6766  ;;  %v2385_v19 = vmul.f32 0.5, %v2377_v59  ;;  %v2392_v31 = vmul.f32 %v2384_v20, %v7502_v11  ;;  %v6596_v20 = vld [vmem:[#allocation6 + $0x128] ss:$12 sps:$4 sm:$0xff]  }
 0xe97   :  { %v6769_v0 = vpop.eup %6768  ;;  %v2380_v3 = vadd.f32 1.0, %v6767_v61  ;;  %v2387_v24 = vmul.f32 0.5, %v2379_v63  ;;  %v2394_v34 = vmul.f32 %v2386_v51, %v7504_v49  ;;  %v6603_v51 = vld [vmem:[#allocation6 + $0xf4] ss:$12 sps:$4 sm:$0xff]  }
 0xe98   :  { %v6771_v14 = vpop.eup %6770  ;;  %v2382_v15 = vadd.f32 1.0, %v6769_v0  ;;  %v2393_v29 = vmul.f32 %v2385_v19, %v7510_v60  ;;  %v6595_v19 = vld [vmem:[#allocation6 + $0x124] ss:$12 sps:$4 sm:$0xff]  }
 0xe99   :  { %v6773_v16 = vpop.eup %6772  ;;  %v2388_v17 = vmul.f32 0.5, %v2380_v3  ;;  %v2381_v18 = vadd.f32 1.0, %v6771_v14  ;;  %v2395_v32 = vmul.f32 %v2387_v24, %v7512_v7  ;;  %v5726_v7 = vld [vmem:[%s7950_s12] ss:$0 sm:$0xff]  ;;  %v6585_v3 = vld [vmem:[#allocation6 + $0x150] ss:$12 sps:$4 sm:$0xff]  }
 0xe9a   :  { %v2390_v21 = vmul.f32 0.5, %v2382_v15  ;;  %v2383_v23 = vadd.f32 1.0, %v6773_v16  ;;  %v6588_v14 = vld [vmem:[#allocation6 + $0x158] ss:$12 sps:$4 sm:$0xff]   ;;  %v6591_v15 = vld [vmem:[#allocation6 + $0x13c] ss:$12 sps:$4 sm:$0xff]  }
 0xe9b   :  { %v2389_v25 = vmul.f32 0.5, %v2381_v18  ;;  %v2396_v26 = vmul.f32 %v2388_v17, %v7520_v5  ;;  %v6589_v16 = vld [vmem:[#allocation6 + $0x138] ss:$12 sps:$4 sm:$0xff]   ;;  %v6592_v17 = vld [vmem:[#allocation6 + $0x140] ss:$12 sps:$4 sm:$0xff]  }
 0xe9c   :  { %v2391_v6 = vmul.f32 0.5, %v2383_v23  ;;  %v2398_v28 = vmul.f32 %v2390_v21, %v7522_v13  ;;  %v6593_v18 = vld [vmem:[#allocation6 + $0x120] ss:$12 sps:$4 sm:$0xff]   ;;  %v6597_v23 = vld [vmem:[#allocation6 + $0x108] ss:$12 sps:$4 sm:$0xff]  }
 0xe9d   :  { %v2397_v30 = vmul.f32 %v2389_v25, %v7530_v50  ;;  %v2400_v37 = vpack.c.bf16 %v2396_v26, %v2392_v31  ;;  %v6599_v21 = vld [vmem:[#allocation6 + $0x10c] ss:$12 sps:$4 sm:$0xff]   ;;  %v6600_v24 = vld [vmem:[#allocation6 + $0x110] ss:$12 sps:$4 sm:$0xff]  }
 0xe9e   :  { %v2399_v33 = vmul.f32 %v2391_v6, %v7532_v22  ;;  %v2402_v5 = vpack.c.bf16 %v2398_v28, %v2394_v34  ;;  %v6601_v25 = vld [vmem:[#allocation6 + $0xf0] ss:$12 sps:$4 sm:$0xff]   ;;  %v6604_v26 = vld [vmem:[#allocation6 + $0xf8] ss:$12 sps:$4 sm:$0xff]   ;;  %v6609_v31 = vld [vmem:[#allocation6 + $0xc0] ss:$12 sps:$4 sm:$0xff]  }
 0xe9f   :  { %v2401_v35 = vpack.c.bf16 %v2397_v30, %v2393_v29  ;;  %v6607_v6 = vld [vmem:[#allocation6 + $0xdc] ss:$12 sps:$4 sm:$0xff]   ;;  %v6605_v28 = vld [vmem:[#allocation6 + $0xd8] ss:$12 sps:$4 sm:$0xff]   ;;  %v6608_v29 = vld [vmem:[#allocation6 + $0xe0] ss:$12 sps:$4 sm:$0xff]  }
 0xea0   :  { %v2403_v36 = vpack.c.bf16 %v2399_v33, %v2395_v32  ;;  %v6611_v30 = vld [vmem:[#allocation6 + $0xc4] ss:$12 sps:$4 sm:$0xff]   ;;  %v6612_v32 = vld [vmem:[#allocation6 + $0xc8] ss:$12 sps:$4 sm:$0xff]  }
 0xea1   :  { %2699 = vmatprep.mubr.bf16.mxu1 %v2401_v35 }
 0xea2   :  { %2740 = vmatprep.mubr.bf16.mxu0 %v2403_v36  ;;  %2700 = vmatmul.mubr.bf16.vlgmr.msra.gmra.mxu1 %v2400_v37 }
 0xea3   :  { %2741 = vmatmul.mubr.bf16.vlgmr.msra.gmra.mxu0 %v2402_v5  ;;  %3003 = vmatprep.mubr.bf16.mxu1 %v7069_v27 }
 0xea4   :  { %6294 = vmatprep.mubr.msk.bf16.mxu0 %vm7070_vm0, %v7068_v4  ;;  %6279 = vmatpush3.bf16.msra.mxu0 %v6584_v53 }
 0xea5   :  { %2972 = vmatpush1.bf16.msra.mxu1 %v6581_v48  ;;  %6280 = vmatprep.subr.bf16.mxu0 %v7068_v4 }
 0xea6   :  { %2973 = vmatprep.subr.bf16.mxu1 %v6587_v1 }
 0xea8   :  { %6281 = vmatpush3.bf16.msra.mxu0 %v6588_v14 }
 0xea9   :  { %2974 = vmatpush1.bf16.msra.mxu1 %v6585_v3  ;;  %6282 = vmatprep.subr.bf16.mxu0 %v7068_v4 }
 0xeaa   :  { %2975 = vmatprep.subr.bf16.mxu1 %v6591_v15 }
 0xeac   :  { %6283 = vmatpush3.bf16.msra.mxu0 %v6592_v17 }
 0xead   :  { %2976 = vmatpush1.bf16.msra.mxu1 %v6589_v16  ;;  %6284 = vmatprep.subr.bf16.mxu0 %v7068_v4 }
 0xeae   :  { %2977 = vmatprep.subr.bf16.mxu1 %v6595_v19 }
 0xeb0   :  { %6285 = vmatpush3.bf16.msra.mxu0 %v6596_v20 }
 0xeb1   :  { %2978 = vmatpush1.bf16.msra.mxu1 %v6593_v18  ;;  %6286 = vmatprep.subr.bf16.mxu0 %v7068_v4 }
 0xeb2   :  { %2979 = vmatprep.subr.bf16.mxu1 %v6599_v21 }
 0xeb4   :  { %6287 = vmatpush3.bf16.msra.mxu0 %v6600_v24 }
 0xeb5   :  { %2980 = vmatpush1.bf16.msra.mxu1 %v6597_v23  ;;  %6288 = vmatprep.subr.bf16.mxu0 %v7068_v4 }
 0xeb6   :  { %2981 = vmatprep.subr.bf16.mxu1 %v6603_v51 }
 0xeb8   :  { %6289 = vmatpush3.bf16.msra.mxu0 %v6604_v26 }
 0xeb9   :  { %2982 = vmatpush1.bf16.msra.mxu1 %v6601_v25  ;;  %6290 = vmatprep.subr.bf16.mxu0 %v7068_v4 }
 0xeba   :  { %2983 = vmatprep.subr.bf16.mxu1 %v6607_v6 }
 0xebc   :  { %6291 = vmatpush3.bf16.msra.mxu0 %v6608_v29 }
 0xebd   :  { %2984 = vmatpush1.bf16.msra.mxu1 %v6605_v28  ;;  %6292 = vmatprep.subr.bf16.mxu0 %v7068_v4 }
 0xebe   :  { %2985 = vmatprep.subr.bf16.mxu1 %v6611_v30 }
 0xec0   :  { %6293 = vmatpush3.bf16.msra.mxu0 %v6612_v32 }
 0xec1   :  { %2986 = vmatpush1.bf16.msra.mxu1 %v6609_v31  ;;  %6338 = vmatprep.subr.mxu0 %v7068_v4 }
 0xec2   :  { %6298 = vmatprep.subr.mxu1 %v7068_v4 }
 0xf62   :  { %v6018_v11 = vpop.f32.mrf.mxu1 }
 0xf63   :  { %v6040_v60 = vpop.f32.mrf.mxu0 }
 0xf64   :  { %v6019_v49 = vpop.f32.mrf.mxu1 }
 0xf65   :  { %v6020_v13 = vadd.f32 %v6019_v49, %v6018_v11  ;;  %v6041_v50 = vpop.f32.mrf.mxu0 }
 0xf66   :  { %v6021_v22 = vpop.f32.mrf.mxu1  ;;  %v6042_v39 = vadd.f32 %v6041_v50, %v6040_v60 }
 0xf67   :  { %v2702_v38 = vadd.f32 %v6020_v13, %v5726_v7  ;;  %v6043_v40 = vpop.f32.mrf.mxu0 }
 0xf68   :  { %v6022_v41 = vpop.f32.mrf.mxu1 }
 0xf69   :  { %v2743_v42 = vadd.f32 %v6042_v39, %v2702_v38  ;;  %v6023_v12 = vadd.f32 %v6022_v41, %v6021_v22  ;;  %v6044_v43 = vpop.f32.mrf.mxu0  ;;  %v5760_v22 = vld [vmem:[#allocation14] ss:$0 sm:$0xff] }
 0xf6a   :  { %v6045_v46 = vadd.f32 %v6044_v43, %v6043_v40 }
 0xf6b   :  { %v2705_v45 = vadd.f32 %v6023_v12, %v5726_v7  ;;  %v2749_v47 = vadd.f32 %v2743_v42, %v7486_v8  ;;  %v5759_v7 = vld [vmem:[#allocation12] ss:$0 sm:$0xff]  ;;  %v5761_v42 = vld [vmem:[%s7942_s4 + $0x3] sm:$0x7] }
 0xf6c   :  { %v2835_v12 = vrot.slane %v5761_v42, %v7260_v55 }
 0xf6d   :  { %v2746_v2 = vadd.f32 %v6045_v46, %v2705_v45  ;;  %2753 = vadd.xlane.f32.xlu0 %v2749_v47  ;;  %v2831_v46 = vrot.slane %v5761_v42, %v7266_v57 }
 0xf6f   :  { %v2750_v10 = vadd.f32 %v2746_v2, %v7488_v9 }
 0xf71   :  { %2755 = vadd.xlane.f32.xlu1 %v2750_v10 }
 0xff6   :  { %v2754_v56 = vpop.xlane.xlu0 %2753 }
 0xff7   :  { %v2757_v59 = vmul.f32 0.0078125, %v2754_v56 }
 0xff9   :  { %v7567_v61 = vsub.f32 %v2749_v47, %v2757_v59 }
 0xffa   :  { %v2756_v62 = vpop.xlane.xlu1 %2755 }
 0xffb   :  { %v2758_v63 = vmul.f32 0.0078125, %v2756_v62  ;;  %v2761_v8 = vmul.f32 %v7567_v61, %v7567_v61 }
 0xffd   :  { %v7571_v0 = vsub.f32 %v2750_v10, %v2758_v63  ;;  %2763 = vadd.xlane.f32.xlu0 %v2761_v8  ;;  %v2839_v10 = vrot.slane %v5761_v42, %v7269_v58 }
 0xfff   :  { %v2762_v9 = vmul.f32 %v7571_v0, %v7571_v0 }
0x1001   :  { %2765 = vadd.xlane.f32.xlu1 %v2762_v9 }
0x1086   :  { %v2764_v33 = vpop.xlane.xlu0 %2763 }
0x1087   :  { %v2767_v34 = vmul.f32 0.0078125, %v2764_v33 }
0x1089   :  { %v2769_v35 = vadd.f32 1e-12, %v2767_v34 }
0x108a   :  { %v2766_v36 = vpop.xlane.xlu1 %2765 }
0x108b   :  { %6774 = vrsqrt.f32 %v2769_v35  ;;  %v2768_v37 = vmul.f32 0.0078125, %v2766_v36 }
0x108d   :  { %v2770_v5 = vadd.f32 1e-12, %v2768_v37 }
0x108f   :  { %6776 = vrsqrt.f32 %v2770_v5 }
0x1098   :  { %v6775_v11 = vpop.eup %6774 }
0x1099   :  { %v2773_v60 = vmul.f32 %v6775_v11, %v7567_v61 }
0x109b   :  { %v2781_v50 = vmul.f32 %v5759_v7, %v2773_v60 }
0x109c   :  { %v6777_v49 = vpop.eup %6776 }
0x109d   :  { %v2774_v13 = vmul.f32 %v6777_v49, %v7571_v0  ;;  %v7585_v39 = vadd.f32 %v5760_v22, %v2781_v50 }
0x109f   :  { %v2782_v38 = vmul.f32 %v5759_v7, %v2774_v13 }
0x10a1   :  { %v7587_v40 = vadd.f32 %v5760_v22, %v2782_v38 }
0x10a3   :  { %v2791_v41 = vpack.c.bf16 %v7587_v40, %v7585_v39 }
0x10a5   :  { %3004 = vmatmul.mubr.bf16.vlgmr.msra.gmra.mxu1 %v2791_v41  ;;  %6295 = vmatmul.mubr.bf16.vlgmr.msra.gmra.mxu0 %v2791_v41 }
0x10a6   :  { %6300 = vmatprep.mubr.msk.f32.mxu1 %vm7070_vm0, %v7068_v4  ;;  %6340 = vmatprep.mubr.msk.f32.mxu0 %vm7070_vm0, %v7068_v4 }
0x1165   :  { %v3005_v43 = vpop.f32.mrf.mxu1  ;;  %v3048_v45 = vpop.f32.mrf.mxu0 }
0x1166   :  { %v7607_v59 = vadd.f32 %v3005_v43, %v2831_v46  ;;  %v7621_v0 = vadd.f32 %v3048_v45, %v2839_v10 }
0x1167   :  { %v3007_v47 = vpop.f32.mrf.mxu1  ;;  %v6296_v2 = vpop.f32.mrf.mxu0 }
0x1168   :  { %v7601_v48 = vadd.f32 %v3007_v47, %v2835_v12 }
0x1169   :  { %v3009_v52 = vpop.f32.mrf.mxu1  ;;  %v3051_v53 = vpop.f32.mrf.mxu0 }
0x116a   :  { %v7603_v56 = vadd.f32 %v3051_v53, %v2839_v10  ;;  %6299 = vmatpush3.xpose.msk.msra.mxu1 %vm487_vm1, %v7601_v48  ;;  %v7618_v8 = vadd.f32 %v3009_v52, %v2831_v46 }
0x116b   :  { %v3011_v61 = vpop.f32.mrf.mxu1  ;;  %v6297_v62 = vpop.f32.mrf.mxu0  ;;  %6303 = vmatprep.subr.mxu1 %v7068_v4 }
0x116c   :  { %v7610_v63 = vadd.f32 %v3011_v61, %v2835_v12 }
0x116d   :  { %6301 = vmatmul.mubr.msk.f32.vlgmr.msra.gmra.mxu1 %vm487_vm1, %v7607_v59 }
0x116e   :  { %6304 = vmatpush3.xpose.msk.msra.mxu1 %vm487_vm1, %v7610_v63  ;;  %6305 = vmatprep.mubr.msk.f32.mxu1 %vm7070_vm0, %v7068_v4 }
0x116f   :  { %6308 = vmatprep.subr.mxu1 %v7068_v4 }
0x1171   :  { %6306 = vmatmul.mubr.msk.f32.vlgmr.msra.gmra.mxu1 %vm487_vm1, %v7618_v8 }
0x1172   :  { %6309 = vmatpush3.msra.mxu1 %v7621_v0  ;;  %6310 = vmatprep.mubr.msk.f32.mxu1 %vm7070_vm0, %v7068_v4 }
0x1173   :  { %6313 = vmatprep.subr.mxu1 %v7068_v4 }
0x122d   :  { %v3127_v9 = vpop.f32.mrf.mxu1 }
0x122e   :  { %v3207_v1 = vmul.f32 0.17677669, %v3127_v9 }
0x122f   :  { %v6302_v3 = vpop.f32.mrf.mxu1 }
0x1230   :  { %v3209_v14 = vsel %vm642_vm2, %v3207_v1, -inf }
0x1231   :  { %3210 = vmax.xlane.f32.xlu0 %v3209_v14  ;;  %v3203_v15 = vpop.f32.mrf.mxu1 }
0x1232   :  { %v3208_v16 = vmul.f32 0.17677669, %v3203_v15 }
0x1233   :  { %v6307_v17 = vpop.f32.mrf.mxu1 }
0x1234   :  { %v3212_v18 = vsel %vm642_vm2, %v3208_v16, -inf }
0x1235   :  { %3213 = vmax.xlane.f32.xlu1 %v3212_v18 }
0x1246   :  { %3387 = vrot.lane.b32.xlu1 %v7607_v59, %s7071_s29 }
0x124a   :  { %3467 = vrot.lane.b32.xlu1 %v7610_v63, %s7071_s29 }
0x12ba   :  { %v3211_v19 = vpop.xlane.xlu0 %3210 }
0x12bb   :  { %v3215_v20 = vsub.f32 %v3207_v1, %v3211_v19 }
0x12bd   :  { %v3217_v21 = vmul.f32 1.442695, %v3215_v20 }
0x12be   :  { %v3214_v23 = vpop.xlane.xlu1 %3213 }
0x12bf   :  { %6778 = vpow2.f32 %v3217_v21  ;;  %v3216_v24 = vsub.f32 %v3208_v16, %v3214_v23 }
0x12c1   :  { %v3219_v51 = vmul.f32 1.442695, %v3216_v24 }
0x12c2   :  { %v3388_v29 = vpop.permute.xlu1 %3387 }
0x12c3   :  { %6780 = vpow2.f32 %v3219_v51 }
0x12c6   :  { %v3468_v30 = vpop.permute.xlu1 %3467 }
0x12cc   :  { %v6779_v25 = vpop.eup %6778 }
0x12cd   :  { %v3221_v26 = vsel %vm642_vm2, %v6779_v25, 0.0 }
0x12ce   :  { %3222 = vadd.xlane.f32.xlu0 %v3221_v26 }
0x12d0   :  { %v6781_v6 = vpop.eup %6780 }
0x12d1   :  { %v3224_v28 = vsel %vm642_vm2, %v6781_v6, 0.0 }
0x12d2   :  { %3225 = vadd.xlane.f32.xlu1 %v3224_v28 }
0x12e3   :  { %3465 = vrot.lane.b32.xlu1 %v7618_v8, %s7071_s29 }
0x12e4   :  { %3389 = vrot.lane.b32.xlu0 %v7601_v48, %s7071_s29 }
0x1357   :  { %v3223_v31 = vpop.xlane.xlu0 %3222 }
0x1358   :  { %6782 = vrcp.f32 %v3223_v31 }
0x135b   :  { %v3226_v32 = vpop.xlane.xlu1 %3225  ;;  %v3390_v37 = vpop.permute.xlu0 %3389 }
0x135c   :  { %6784 = vrcp.f32 %v3226_v32 }
0x135f   :  { %v3466_v5 = vpop.permute.xlu1 %3465 }
0x1365   :  { %v6783_v33 = vpop.eup %6782 }
0x1366   :  { %v3229_v34 = vmul.f32 %v6783_v33, %v6779_v25 }
0x1368   :  { %6311 = vmatmul.mubr.msk.f32.vlgmr.msra.gmra.mxu1 %vm642_vm2, %v3229_v34 }
0x1369   :  { %v6785_v35 = vpop.eup %6784  ;;  %6314 = vmatpush3.msra.mxu1 %v7603_v56  ;;  %6315 = vmatprep.mubr.msk.f32.mxu1 %vm7070_vm0, %v7068_v4 }
0x136a   :  { %6318 = vmatprep.subr.mxu1 %v7068_v4  ;;  %v3230_v36 = vmul.f32 %v6785_v35, %v6781_v6 }
0x136c   :  { %6316 = vmatmul.mubr.msk.f32.vlgmr.msra.gmra.mxu1 %vm642_vm2, %v3230_v36 }
0x136d   :  { %6319 = vmatpush3.xpose.msk.msra.mxu1 %vm487_vm1, %v3390_v37  ;;  %6320 = vmatprep.mubr.msk.f32.mxu1 %vm7070_vm0, %v7068_v4 }
0x136e   :  { %6323 = vmatprep.subr.mxu1 %v7068_v4 }
0x1370   :  { %6321 = vmatmul.mubr.msk.f32.vlgmr.msra.gmra.mxu1 %vm487_vm1, %v3388_v29 }
0x1371   :  { %6324 = vmatpush3.xpose.msk.msra.mxu1 %vm487_vm1, %v3468_v30  ;;  %6325 = vmatprep.mubr.msk.f32.mxu1 %vm7070_vm0, %v7068_v4 }
0x1372   :  { %6328 = vmatprep.subr.mxu1 %v7068_v4 }
0x1374   :  { %6326 = vmatmul.mubr.msk.f32.vlgmr.msra.gmra.mxu1 %vm487_vm1, %v3466_v5 }
0x1375   :  { %6330 = vmatprep.mubr.msk.f32.mxu1 %vm7070_vm0, %v7068_v4 }
0x1428   :  { %v3300_v11 = vpop.f32.mrf.mxu1 }
0x1429   :  { %v5944_v60 = vpack.c.bf16 %v3300_v11, %v3300_v11 }
0x142a   :  { %v6312_v7 = vpop.f32.mrf.mxu1 }
0x142b   :  { %3385 = vst.msk [vmem:[#allocation2] sm:$0xf] %vm819_vm3, %v5944_v60 }
0x142c   :  { %v3373_v49 = vpop.f32.mrf.mxu1 }
0x142d   :  { %v5945_v13 = vpack.c.bf16 %v3373_v49, %v3373_v49 }
0x142e   :  { %v6317_v50 = vpop.f32.mrf.mxu1 }
0x142f   :  { %3386 = vst.msk [vmem:[#allocation2 + $0x4] sm:$0xf] %vm819_vm3, %v5945_v13 }
0x1430   :  { %v3461_v22 = vpop.f32.mrf.mxu1 }
0x1431   :  { %v3543_v38 = vmul.f32 0.17677669, %v3461_v22 }
0x1432   :  { %v6322_v41 = vpop.f32.mrf.mxu1 }
0x1433   :  { %v3545_v42 = vsel %vm642_vm2, %v3543_v38, -inf }
0x1434   :  { %3546 = vmax.xlane.f32.xlu0 %v3545_v42  ;;  %v3539_v12 = vpop.f32.mrf.mxu1 }
0x1435   :  { %v3544_v43 = vmul.f32 0.17677669, %v3539_v12 }
0x1436   :  { %v6327_v45 = vpop.f32.mrf.mxu1 }
0x1437   :  { %v3548_v46 = vsel %vm642_vm2, %v3544_v43, -inf }
0x1438   :  { %3549 = vmax.xlane.f32.xlu1 %v3548_v46 }
0x1449   :  { %3645 = vrot.lane.b32.xlu1 %v7603_v56, %s7071_s29 }
0x144d   :  { %3737 = vrot.lane.b32.xlu1 %v7601_v48, %s7064_s3 }
0x1451   :  { %3815 = vrot.lane.b32.xlu1 %v7610_v63, %s7064_s3 }
0x1455   :  { %3813 = vrot.lane.b32.xlu1 %v7618_v8, %s7064_s3 }
0x14bd   :  { %v3547_v47 = vpop.xlane.xlu0 %3546 }
0x14be   :  { %v3551_v2 = vsub.f32 %v3543_v38, %v3547_v47 }
0x14c0   :  { %v3553_v10 = vmul.f32 1.442695, %v3551_v2 }
0x14c1   :  { %v3550_v52 = vpop.xlane.xlu1 %3549 }
0x14c2   :  { %6786 = vpow2.f32 %v3553_v10  ;;  %v3552_v53 = vsub.f32 %v3544_v43, %v3550_v52 }
0x14c4   :  { %v3555_v61 = vmul.f32 1.442695, %v3552_v53 }
0x14c5   :  { %v3646_v62 = vpop.permute.xlu1 %3645 }
0x14c6   :  { %6788 = vpow2.f32 %v3555_v61 }
0x14c9   :  { %v3738_v9 = vpop.permute.xlu1 %3737 }
0x14ca   :  { %6339 = vmatpush3.xpose.msk.msra.mxu0 %vm487_vm1, %v3738_v9 }
0x14cb   :  { %6348 = vmatprep.subr.mxu0 %v7068_v4 }
0x14cd   :  { %v3816_v24 = vpop.permute.xlu1 %3815 }
0x14cf   :  { %v6787_v1 = vpop.eup %6786 }
0x14d0   :  { %v3557_v3 = vsel %vm642_vm2, %v6787_v1, 0.0 }
0x14d1   :  { %3558 = vadd.xlane.f32.xlu0 %v3557_v3  ;;  %v3814_v25 = vpop.permute.xlu1 %3813 }
0x14d3   :  { %v6789_v14 = vpop.eup %6788 }
0x14d4   :  { %v3560_v15 = vsel %vm642_vm2, %v6789_v14, 0.0 }
0x14d5   :  { %3561 = vadd.xlane.f32.xlu0 %v3560_v15 }
0x14eb   :  { %3568 = vrot.lane.b32.xlu0 %v7621_v0, %s7071_s29 }
0x14ef   :  { %3735 = vrot.lane.b32.xlu0 %v7607_v59, %s7064_s3 }
0x155a   :  { %v3559_v16 = vpop.xlane.xlu0 %3558 }
0x155b   :  { %6790 = vrcp.f32 %v3559_v16 }
0x155e   :  { %v3562_v17 = vpop.xlane.xlu0 %3561 }
0x155f   :  { %6792 = vrcp.f32 %v3562_v17 }
0x1562   :  { %v3569_v18 = vpop.permute.xlu0 %3568 }
0x1563   :  { %6329 = vmatpush3.msra.mxu1 %v3569_v18 }
0x1564   :  { %6333 = vmatprep.subr.mxu1 %v7068_v4 }
0x1566   :  { %v3736_v19 = vpop.permute.xlu0 %3735 }
0x1567   :  { %6341 = vmatmul.mubr.msk.f32.vlgmr.msra.gmra.mxu0 %vm487_vm1, %v3736_v19 }
0x1568   :  { %v6791_v20 = vpop.eup %6790  ;;  %6350 = vmatprep.mubr.msk.f32.mxu0 %vm7070_vm0, %v7068_v4 }
0x1569   :  { %v3565_v21 = vmul.f32 %v6791_v20, %v6787_v1 }
0x156b   :  { %6331 = vmatmul.mubr.msk.f32.vlgmr.msra.gmra.mxu1 %vm642_vm2, %v3565_v21 }
0x156c   :  { %v6793_v23 = vpop.eup %6792  ;;  %6334 = vmatpush3.msra.mxu1 %v3646_v62  ;;  %6335 = vmatprep.mubr.msk.f32.mxu1 %vm7070_vm0, %v7068_v4 }
0x156d   :  { %6343 = vmatprep.subr.mxu1 %v7068_v4  ;;  %v3566_v51 = vmul.f32 %v6793_v23, %v6789_v14 }
0x156f   :  { %6336 = vmatmul.mubr.msk.f32.vlgmr.msra.gmra.mxu1 %vm642_vm2, %v3566_v51 }
0x1570   :  { %6344 = vmatpush3.xpose.msk.msra.mxu1 %vm487_vm1, %v3816_v24  ;;  %6345 = vmatprep.mubr.msk.f32.mxu1 %vm7070_vm0, %v7068_v4 }
0x1571   :  { %6353 = vmatprep.subr.mxu1 %v7068_v4 }
0x1573   :  { %6346 = vmatmul.mubr.msk.f32.vlgmr.msra.gmra.mxu1 %vm487_vm1, %v3814_v25 }
0x1574   :  { %6355 = vmatprep.mubr.msk.f32.mxu1 %vm7070_vm0, %v7068_v4 }
0x1627   :  { %v3809_v26 = vpop.f32.mrf.mxu0 }
0x1628   :  { %v3891_v6 = vmul.f32 0.17677669, %v3809_v26 }
0x1629   :  { %v6342_v28 = vpop.f32.mrf.mxu0 }
0x162a   :  { %v3893_v29 = vsel %vm642_vm2, %v3891_v6, -inf }
0x162b   :  { %3894 = vmax.xlane.f32.xlu0 %v3893_v29  ;;  %v7696_v30 = vpop.f32.mrf.mxu1 }
0x162c   :  { %v5946_v19 = vpack.c.bf16 %v7696_v30, %v7696_v30 }
0x162d   :  { %v6332_v31 = vpop.f32.mrf.mxu1 }
0x162f   :  { %v7698_v32 = vpop.f32.mrf.mxu1 }
0x1630   :  { %v5947_v20 = vpack.c.bf16 %v7698_v32, %v7698_v32 }
0x1631   :  { %v6337_v33 = vpop.f32.mrf.mxu1 }
0x1633   :  { %v3887_v34 = vpop.f32.mrf.mxu1 }
0x1634   :  { %v3892_v35 = vmul.f32 0.17677669, %v3887_v34 }
0x1635   :  { %v6347_v36 = vpop.f32.mrf.mxu1 }
0x1636   :  { %v3896_v37 = vsel %vm642_vm2, %v3892_v35, -inf }
0x1637   :  { %3897 = vmax.xlane.f32.xlu1 %v3896_v37 }
0x1648   :  { %3991 = vrot.lane.b32.xlu1 %v7603_v56, %s7064_s3 }
0x164c   :  { %4083 = vrot.lane.b32.xlu1 %v7601_v48, %s7072_s30 }
0x1650   :  { %4161 = vrot.lane.b32.xlu1 %v7610_v63, %s7072_s30 }
0x1654   :  { %4159 = vrot.lane.b32.xlu1 %v7618_v8, %s7072_s30 }
0x16b4   :  { %v3895_v5 = vpop.xlane.xlu0 %3894 }
0x16b5   :  { %v3899_v11 = vsub.f32 %v3891_v6, %v3895_v5 }
0x16b7   :  { %v3901_v60 = vmul.f32 1.442695, %v3899_v11 }
0x16b9   :  { %6794 = vpow2.f32 %v3901_v60 }
0x16c0   :  { %v3898_v7 = vpop.xlane.xlu1 %3897 }
0x16c1   :  { %v3900_v49 = vsub.f32 %v3892_v35, %v3898_v7 }
0x16c3   :  { %v3903_v13 = vmul.f32 1.442695, %v3900_v49 }
0x16c4   :  { %v3992_v50 = vpop.permute.xlu1 %3991 }
0x16c5   :  { %6796 = vpow2.f32 %v3903_v13  ;;  %6354 = vmatpush3.msra.mxu1 %v3992_v50  ;;  %v6613_v13 = vld [vmem:[%s7943_s5 + $0x78] sm:$0xff]   ;;  %v6614_v50 = vld [vmem:[%s7943_s5 + $0x70] sm:$0xff]  }
0x16c6   :  { %v6795_v22 = vpop.eup %6794  ;;  %6363 = vmatprep.subr.mxu1 %v7068_v4 }
0x16c7   :  { %v3905_v48 = vsel %vm642_vm2, %v6795_v22, 0.0 }
0x16c8   :  { %3906 = vadd.xlane.f32.xlu0 %v3905_v48  ;;  %v4084_v45 = vpop.permute.xlu1 %4083  ;;  %v6616_v48 = vld [vmem:[%s7943_s5 + $0x60] sm:$0xff]  }
0x16cc   :  { %v4162_v47 = vpop.permute.xlu1 %4161 }
0x16d0   :  { %v4160_v10 = vpop.permute.xlu1 %4159 }
0x16d2   :  { %v6797_v63 = vpop.eup %6796 }
0x16d3   :  { %v3908_v38 = vsel %vm642_vm2, %v6797_v63, 0.0 }
0x16d4   :  { %3909 = vadd.xlane.f32.xlu0 %v3908_v38  ;;  %v6618_v38 = vld [vmem:[%s7943_s5 + $0x50] sm:$0xff]  }
0x16ea   :  { %3915 = vrot.lane.b32.xlu0 %v7621_v0, %s7064_s3 }
0x16ee   :  { %4081 = vrot.lane.b32.xlu0 %v7607_v59, %s7072_s30 }
0x1751   :  { %v3907_v8 = vpop.xlane.xlu0 %3906 }
0x1752   :  { %6798 = vrcp.f32 %v3907_v8 }
0x175d   :  { %v3910_v41 = vpop.xlane.xlu0 %3909 }
0x175e   :  { %6800 = vrcp.f32 %v3910_v41 }
0x175f   :  { %v6799_v42 = vpop.eup %6798 }
0x1760   :  { %v3913_v12 = vmul.f32 %v6799_v42, %v6795_v22  ;;  %v6615_v22 = vld [vmem:[%s7943_s5 + $0x68] sm:$0xff]  }
0x1761   :  { %v3916_v43 = vpop.permute.xlu0 %3915  ;;  %v6619_v42 = vld [vmem:[%s7943_s5 + $0x48] sm:$0xff]  }
0x1762   :  { %6349 = vmatpush3.msra.mxu0 %v3916_v43  ;;  %v6620_v43 = vld [vmem:[%s7943_s5 + $0x40] sm:$0xff]  }
0x1763   :  { %6351 = vmatmul.mubr.msk.f32.vlgmr.msra.gmra.mxu0 %vm642_vm2, %v3913_v12  ;;  %6358 = vmatprep.subr.mxu0 %v7068_v4 }
0x1764   :  { %6359 = vmatpush3.xpose.msk.msra.mxu0 %vm487_vm1, %v4084_v45  ;;  %6360 = vmatprep.mubr.msk.f32.mxu0 %vm7070_vm0, %v7068_v4 }
0x1765   :  { %v4082_v46 = vpop.permute.xlu0 %4081  ;;  %6368 = vmatprep.subr.mxu0 %v7068_v4 }
0x1767   :  { %6361 = vmatmul.mubr.msk.f32.vlgmr.msra.gmra.mxu0 %vm487_vm1, %v4082_v46 }
0x1768   :  { %6370 = vmatprep.mubr.msk.f32.mxu0 %vm7070_vm0, %v7068_v4 }
0x176b   :  { %v6801_v59 = vpop.eup %6800 }
0x176c   :  { %v3914_v2 = vmul.f32 %v6801_v59, %v6797_v63  ;;  %v6617_v63 = vld [vmem:[%s7943_s5 + $0x58] sm:$0xff]  }
0x176e   :  { %6356 = vmatmul.mubr.msk.f32.vlgmr.msra.gmra.mxu1 %vm642_vm2, %v3914_v2 }
0x176f   :  { %6364 = vmatpush3.xpose.msk.msra.mxu1 %vm487_vm1, %v4162_v47  ;;  %6365 = vmatprep.mubr.msk.f32.mxu1 %vm7070_vm0, %v7068_v4 }
0x1770   :  { %6373 = vmatprep.subr.mxu1 %v7068_v4 }
0x1772   :  { %6366 = vmatmul.mubr.msk.f32.vlgmr.msra.gmra.mxu1 %vm487_vm1, %v4160_v10 }
0x1773   :  { %6375 = vmatprep.mubr.msk.f32.mxu1 %vm7070_vm0, %v7068_v4 }
0x1823   :  { %v3987_v52 = vpop.f32.mrf.mxu0 }
0x1824   :  { %v5948_v35 = vpack.c.bf16 %v3987_v52, %v3987_v52  ;;  %v5835_v52 = vld [vmem:[%s7944_s6 + $0x1] ss:$0 sm:$0xff] }
0x1825   :  { %v6352_v53 = vpop.f32.mrf.mxu0 }
0x1827   :  { %v4155_v61 = vpop.f32.mrf.mxu0 }
0x1828   :  { %v4237_v62 = vmul.f32 0.17677669, %v4155_v61 }
0x1829   :  { %v6362_v9 = vpop.f32.mrf.mxu0 }
0x182a   :  { %v4239_v1 = vsel %vm642_vm2, %v4237_v62, -inf }
0x182b   :  { %4240 = vmax.xlane.f32.xlu0 %v4239_v1 }
0x182e   :  { %v4063_v3 = vpop.f32.mrf.mxu1 }
0x182f   :  { %v5949_v21 = vpack.c.bf16 %v4063_v3, %v4063_v3 }
0x1830   :  { %v6357_v14 = vpop.f32.mrf.mxu1 }
0x1832   :  { %v4233_v15 = vpop.f32.mrf.mxu1 }
0x1833   :  { %v4238_v16 = vmul.f32 0.17677669, %v4233_v15 }
0x1834   :  { %v6367_v17 = vpop.f32.mrf.mxu1 }
0x1835   :  { %v4242_v18 = vsel %vm642_vm2, %v4238_v16, -inf  ;;  %v6624_v17 = vld [vmem:[#allocation9 + $0x1e4] ss:$16 sps:$4 sm:$0xff]  }
0x1836   :  { %4243 = vmax.xlane.f32.xlu1 %v4242_v18  ;;  %v6625_v18 = vld [vmem:[#allocation9 + $0x1e8] ss:$16 sps:$4 sm:$0xff]  }
0x1847   :  { %4337 = vrot.lane.b32.xlu1 %v7603_v56, %s7072_s30 }
0x184b   :  { %3727 = vrot.lane.b32.xlu1 %v5946_v19, %s7072_s30 }
0x184f   :  { %3729 = vrot.lane.b32.xlu1 %v5947_v20, %s7072_s30 }
0x1853   :  { %4075 = vrot.lane.b32.xlu1 %v5949_v21, %s7064_s3 }
0x18b4   :  { %v4241_v23 = vpop.xlane.xlu0 %4240 }
0x18b5   :  { %v4245_v24 = vsub.f32 %v4237_v62, %v4241_v23 }
0x18b7   :  { %v4247_v51 = vmul.f32 1.442695, %v4245_v24 }
0x18b9   :  { %6802 = vpow2.f32 %v4247_v51 }
0x18bf   :  { %v4244_v25 = vpop.xlane.xlu1 %4243 }
0x18c0   :  { %v4246_v26 = vsub.f32 %v4238_v16, %v4244_v25  ;;  %v6622_v16 = vld [vmem:[#allocation9 + $0x1e0] ss:$16 sps:$4 sm:$0xff]   ;;  %v6630_v25 = vld [vmem:[#allocation9 + $0x1c4] ss:$16 sps:$4 sm:$0xff]  }
0x18c2   :  { %v4249_v56 = vmul.f32 1.442695, %v4246_v26  ;;  %v6633_v26 = vld [vmem:[#allocation9 + $0x1cc] ss:$16 sps:$4 sm:$0xff]  }
0x18c3   :  { %v4338_v6 = vpop.permute.xlu1 %4337 }
0x18c4   :  { %6804 = vpow2.f32 %v4249_v56  ;;  %6374 = vmatpush3.msra.mxu1 %v4338_v6  ;;  %v6628_v56 = vld [vmem:[#allocation9 + $0x1c0] ss:$16 sps:$4 sm:$0xff]   ;;  %v6631_v6 = vld [vmem:[#allocation9 + $0x1c8] ss:$16 sps:$4 sm:$0xff]  }
0x18c5   :  { %4810 = vmatprep.subr.bf16.mxu1 %v6624_v17  ;;  %v6672_v17 = vld [vmem:[#allocation11 + $0x138] sm:$0xff]  }
0x18c6   :  { %v6803_v28 = vpop.eup %6802 }
0x18c7   :  { %v3728_v29 = vpop.permute.xlu1 %3727  ;;  %v4251_v30 = vsel %vm642_vm2, %v6803_v28, 0.0 }
0x18c8   :  { %3733 = vst.msk [vmem:[#allocation2] sm:$0xf] %vm1168_vm4, %v3728_v29  ;;  %4252 = vadd.xlane.f32.xlu0 %v4251_v30  ;;  %v6639_v29 = vld [vmem:[#allocation9 + $0x1ac] ss:$16 sps:$4 sm:$0xff]   ;;  %v6634_v30 = vld [vmem:[#allocation9 + $0x1a0] ss:$16 sps:$4 sm:$0xff]  }
0x18cb   :  { %v3730_v31 = vpop.permute.xlu1 %3729 }
0x18cc   :  { %3734 = vst.msk [vmem:[#allocation2 + $0x4] sm:$0xf] %vm1168_vm4, %v3730_v31  ;;  %v6637_v31 = vld [vmem:[#allocation9 + $0x1a8] ss:$16 sps:$4 sm:$0xff]  }
0x18cf   :  { %v4076_v32 = vpop.permute.xlu1 %4075 }
0x18d0   :  { %4080 = vst.msk [vmem:[#allocation2 + $0x4] sm:$0xf] %vm1515_vm5, %v4076_v32  ;;  %v6640_v32 = vld [vmem:[#allocation9 + $0x180] ss:$16 sps:$4 sm:$0xff]  }
0x18d1   :  { %v6805_v33 = vpop.eup %6804 }
0x18d2   :  { %v4254_v34 = vsel %vm642_vm2, %v6805_v33, 0.0 }
0x18d3   :  { %4255 = vadd.xlane.f32.xlu0 %v4254_v34  ;;  %v6643_v34 = vld [vmem:[#allocation9 + $0x188] ss:$16 sps:$4 sm:$0xff]  }
0x18e9   :  { %4261 = vrot.lane.b32.xlu0 %v7621_v0, %s7072_s30 }
0x18ed   :  { %4073 = vrot.lane.b32.xlu0 %v5948_v35, %s7064_s3  ;;  %v6645_v35 = vld [vmem:[#allocation9 + $0x18c] ss:$16 sps:$4 sm:$0xff]  }
0x1951   :  { %v4253_v36 = vpop.xlane.xlu0 %4252 }
0x1952   :  { %6806 = vrcp.f32 %v4253_v36  ;;  %v6648_v36 = vld [vmem:[#allocation9 + $0x164] ss:$16 sps:$4 sm:$0xff]  }
0x195c   :  { %v4256_v37 = vpop.xlane.xlu0 %4255 }
0x195d   :  { %6808 = vrcp.f32 %v4256_v37  ;;  %v6651_v37 = vld [vmem:[#allocation9 + $0x16c] ss:$16 sps:$4 sm:$0xff]  }
0x195f   :  { %v6807_v5 = vpop.eup %6806 }
0x1960   :  { %v4262_v11 = vpop.permute.xlu0 %4261  ;;  %v4259_v60 = vmul.f32 %v6807_v5, %v6803_v28  ;;  %v6636_v28 = vld [vmem:[#allocation9 + $0x1a4] ss:$16 sps:$4 sm:$0xff]   ;;  %v6646_v5 = vld [vmem:[#allocation9 + $0x160] ss:$16 sps:$4 sm:$0xff]  }
0x1961   :  { %6369 = vmatpush3.msra.mxu0 %v4262_v11  ;;  %v6649_v11 = vld [vmem:[#allocation9 + $0x168] ss:$16 sps:$4 sm:$0xff]  }
0x1962   :  { %6371 = vmatmul.mubr.msk.f32.vlgmr.msra.gmra.mxu0 %vm642_vm2, %v4259_v60  ;;  %6378 = vmatprep.subr.bf16.mxu0 %v7068_v4  ;;  %v6654_v60 = vld [vmem:[#allocation9 + $0x144] ss:$16 sps:$4 sm:$0xff]  }
0x1963   :  { %6394 = vmatprep.mubr.msk.bf16.mxu0 %vm7070_vm0, %v7068_v4  ;;  %6379 = vmatpush3.bf16.msra.mxu0 %v6613_v13  ;;  %v6660_v13 = vld [vmem:[#allocation9 + $0x124] ss:$16 sps:$4 sm:$0xff]  }
0x1964   :  { %v4074_v7 = vpop.permute.xlu0 %4073  ;;  %6380 = vmatprep.subr.bf16.mxu0 %v7068_v4 }
0x1965   :  { %4079 = vst.msk [vmem:[#allocation2] sm:$0xf] %vm1515_vm5, %v4074_v7  ;;  %v6657_v7 = vld [vmem:[#allocation9 + $0x14c] ss:$16 sps:$4 sm:$0xff]  }
0x1967   :  { %6381 = vmatpush3.bf16.msra.mxu0 %v6614_v50  ;;  %v6663_v50 = vld [vmem:[#allocation9 + $0x12c] ss:$16 sps:$4 sm:$0xff]  }
0x1968   :  { %6382 = vmatprep.subr.bf16.mxu0 %v7068_v4 }
0x196a   :  { %v6809_v0 = vpop.eup %6808 }
0x196b   :  { %v4260_v49 = vmul.f32 %v6809_v0, %v6805_v33  ;;  %6383 = vmatpush3.bf16.msra.mxu0 %v6615_v22  ;;  %v6642_v33 = vld [vmem:[#allocation9 + $0x184] ss:$16 sps:$4 sm:$0xff]   ;;  %v6652_v0 = vld [vmem:[#allocation9 + $0x140] ss:$16 sps:$4 sm:$0xff]  }
0x196c   :  { %6384 = vmatprep.subr.bf16.mxu0 %v7068_v4  ;;  %v6658_v22 = vld [vmem:[#allocation9 + $0x120] ss:$16 sps:$4 sm:$0xff]  }
0x196d   :  { %6376 = vmatmul.mubr.msk.f32.vlgmr.msra.gmra.mxu1 %vm642_vm2, %v4260_v49  ;;  %v6655_v49 = vld [vmem:[#allocation9 + $0x148] ss:$16 sps:$4 sm:$0xff]  }
0x196e   :  { %4842 = vmatprep.mubr.bf16.mxu1 %v7069_v27  ;;  %4811 = vmatpush1.bf16.msra.mxu1 %v6622_v16  ;;  %v6671_v16 = vld [vmem:[#allocation11 + $0x1f8] sm:$0xff]  }
0x196f   :  { %6385 = vmatpush3.bf16.msra.mxu0 %v6616_v48  ;;  %4812 = vmatprep.subr.bf16.mxu1 %v6630_v25  ;;  %v6661_v48 = vld [vmem:[#allocation9 + $0x128] ss:$16 sps:$4 sm:$0xff]   ;;  %v6683_v25 = vld [vmem:[#allocation11 + $0x1e0] sm:$0xff]  }
0x1970   :  { %6386 = vmatprep.subr.bf16.mxu0 %v7068_v4 }
0x1972   :  { %4813 = vmatpush1.bf16.msra.mxu1 %v6628_v56  ;;  %v6685_v56 = vld [vmem:[#allocation11 + $0x1a0] sm:$0xff]  }
0x1973   :  { %6387 = vmatpush3.bf16.msra.mxu0 %v6617_v63  ;;  %4814 = vmatprep.subr.bf16.mxu1 %v6636_v28  ;;  %v6666_v63 = vld [vmem:[#allocation9 + $0x104] ss:$16 sps:$4 sm:$0xff]   ;;  %v6687_v28 = vld [vmem:[#allocation11 + $0x1d8] sm:$0xff]  }
0x1974   :  { %6388 = vmatprep.subr.bf16.mxu0 %v7068_v4 }
0x1976   :  { %4815 = vmatpush1.bf16.msra.mxu1 %v6634_v30  ;;  %v6689_v30 = vld [vmem:[#allocation11 + $0x198] sm:$0xff]  }
0x1977   :  { %6389 = vmatpush3.bf16.msra.mxu0 %v6618_v38  ;;  %4816 = vmatprep.subr.bf16.mxu1 %v6642_v33  ;;  %v6669_v38 = vld [vmem:[#allocation9 + $0x10c] ss:$16 sps:$4 sm:$0xff]   ;;  %v6692_v33 = vld [vmem:[#allocation11 + $0x110] sm:$0xff]  }
0x1978   :  { %6390 = vmatprep.subr.bf16.mxu0 %v7068_v4 }
0x197a   :  { %4817 = vmatpush1.bf16.msra.mxu1 %v6640_v32  ;;  %v6691_v32 = vld [vmem:[#allocation11 + $0x1d0] sm:$0xff]  }
0x197b   :  { %6391 = vmatpush3.bf16.msra.mxu0 %v6619_v42  ;;  %4818 = vmatprep.subr.bf16.mxu1 %v6648_v36  ;;  %v6695_v36 = vld [vmem:[#allocation11 + $0x1c8] sm:$0xff]  }
0x197c   :  { %6392 = vmatprep.subr.bf16.mxu0 %v7068_v4 }
0x197e   :  { %4819 = vmatpush1.bf16.msra.mxu1 %v6646_v5  ;;  %v6697_v5 = vld [vmem:[#allocation11 + $0x188] sm:$0xff]  }
0x197f   :  { %6393 = vmatpush3.bf16.msra.mxu0 %v6620_v43  ;;  %4820 = vmatprep.subr.bf16.mxu1 %v6654_v60  ;;  %v6699_v60 = vld [vmem:[#allocation11 + $0x1c0] sm:$0xff]  }
0x1982   :  { %4821 = vmatpush1.bf16.msra.mxu1 %v6652_v0  ;;  %v6701_v0 = vld [vmem:[#allocation11 + $0x180] sm:$0xff]  }
0x1983   :  { %4822 = vmatprep.subr.bf16.mxu1 %v6660_v13 }
0x1986   :  { %4823 = vmatpush1.bf16.msra.mxu1 %v6658_v22 }
0x1987   :  { %4824 = vmatprep.subr.bf16.mxu1 %v6666_v63 }
0x1a22   :  { %v4333_v8 = vpop.f32.mrf.mxu0 }
0x1a23   :  { %v5950_v41 = vpack.c.bf16 %v4333_v8, %v4333_v8  ;;  %v6664_v8 = vld [vmem:[#allocation9 + $0x100] ss:$16 sps:$4 sm:$0xff]  }
0x1a24   :  { %v6372_v12 = vpop.f32.mrf.mxu0  ;;  %4825 = vmatpush1.bf16.msra.mxu1 %v6664_v8 }
0x1a25   :  { %4419 = vrot.lane.b32.xlu0 %v5950_v41, %s7071_s29  ;;  %v6667_v41 = vld [vmem:[#allocation9 + $0x108] ss:$16 sps:$4 sm:$0xff]  }
0x1a2d   :  { %v4409_v45 = vpop.f32.mrf.mxu1 }
0x1a2e   :  { %v5951_v46 = vpack.c.bf16 %v4409_v45, %v4409_v45 }
0x1a2f   :  { %v6377_v59 = vpop.f32.mrf.mxu1 }
0x1a30   :  { %4421 = vrot.lane.b32.xlu1 %v5951_v46, %s7071_s29 }
0x1a97   :  { %v4420_v47 = vpop.permute.xlu0 %4419 }
0x1a98   :  { %4425 = vst.msk [vmem:[#allocation2] sm:$0xf] %vm1862_vm6, %v4420_v47 }
0x1aa2   :  { %v4422_v2 = vpop.permute.xlu1 %4421 }
0x1aa3   :  { %4426 = vst.msk [vmem:[#allocation2 + $0x4] sm:$0xf] %vm1862_vm6, %v4422_v2 }
0x1aaa   :  { %v6621_v10 = vld [vmem:[#allocation2] sm:$0xff]  }
0x1aab   :  { %6395 = vmatmul.mubr.bf16.vlgmr.msra.gmra.mxu0 %v6621_v10  ;;  %v5846_v10 = vld [vmem:[%s7945_s7 + $0x1] ss:$0 sm:$0xff] }
0x1aac   :  { %4885 = vmatprep.mubr.bf16.mxu0 %v7069_v27  ;;  %v6627_v27 = vld [vmem:[#allocation9 + $0x1ec] ss:$16 sps:$4 sm:$0xff]  }
0x1aad   :  { %4853 = vmatprep.subr.bf16.mxu0 %v6627_v27  ;;  %v6674_v27 = vld [vmem:[#allocation11 + $0x170] sm:$0xff]  }
0x1aae   :  { %4854 = vmatpush1.bf16.msra.mxu0 %v6625_v18  ;;  %v6673_v18 = vld [vmem:[#allocation11 + $0x1b8] sm:$0xff]  }
0x1aaf   :  { %4855 = vmatprep.subr.bf16.mxu0 %v6633_v26  ;;  %v6684_v26 = vld [vmem:[#allocation11 + $0x120] sm:$0xff]  }
0x1ab2   :  { %4856 = vmatpush1.bf16.msra.mxu0 %v6631_v6  ;;  %v6686_v6 = vld [vmem:[#allocation11 + $0x158] sm:$0xff]  }
0x1ab3   :  { %4857 = vmatprep.subr.bf16.mxu0 %v6639_v29  ;;  %v6688_v29 = vld [vmem:[#allocation11 + $0x118] sm:$0xff]  }
0x1ab6   :  { %4858 = vmatpush1.bf16.msra.mxu0 %v6637_v31  ;;  %v6690_v31 = vld [vmem:[#allocation11 + $0x150] sm:$0xff]  }
0x1ab7   :  { %4859 = vmatprep.subr.bf16.mxu0 %v6645_v35  ;;  %v6694_v35 = vld [vmem:[#allocation11 + $0x148] sm:$0xff]  }
0x1aba   :  { %4860 = vmatpush1.bf16.msra.mxu0 %v6643_v34  ;;  %v6693_v34 = vld [vmem:[#allocation11 + $0x190] sm:$0xff]  }
0x1abb   :  { %4861 = vmatprep.subr.bf16.mxu0 %v6651_v37  ;;  %v6696_v37 = vld [vmem:[#allocation11 + $0x108] sm:$0xff]  }
0x1abe   :  { %4862 = vmatpush1.bf16.msra.mxu0 %v6649_v11  ;;  %v6698_v11 = vld [vmem:[#allocation11 + $0x140] sm:$0xff]  }
0x1abf   :  { %4863 = vmatprep.subr.bf16.mxu0 %v6657_v7  ;;  %v6700_v7 = vld [vmem:[#allocation11 + $0x100] sm:$0xff]  }
0x1ac2   :  { %4864 = vmatpush1.bf16.msra.mxu0 %v6655_v49  ;;  %v5848_v49 = vld [vmem:[%s7948_s10 + $0x4] sm:$0xf] }
0x1ac3   :  { %4865 = vmatprep.subr.bf16.mxu0 %v6663_v50  ;;  %v4633_v13 = vrot.slane %v5848_v49, %v7266_v57  ;;  %v4641_v50 = vrot.slane %v5848_v49, %v7269_v58  ;;  %v4637_v22 = vrot.slane %v5848_v49, %v7260_v55 }
0x1ac6   :  { %4866 = vmatpush1.bf16.msra.mxu0 %v6661_v48  ;;  %v4645_v48 = vrot.slane %v5848_v49, %v2076_v44 }
0x1ac7   :  { %4867 = vmatprep.subr.bf16.mxu0 %v6669_v38 }
0x1aca   :  { %4868 = vmatpush1.bf16.msra.mxu0 %v6667_v41 }
0x1acb   :  { %6118 = vmatprep.subr.bf16.mxu0 %v6671_v16 }
0x1b6b   :  { %v4542_v53 = vpop.f32.mrf.mxu0 }
0x1b6c   :  { %v4543_v61 = vadd.f32 %v5835_v52, %v4542_v53 }
0x1b6d   :  { %v6396_v62 = vpop.f32.mrf.mxu0 }
0x1b6e   :  { %v4549_v9 = vadd.f32 %v4543_v61, %v7585_v39  ;;  %v5847_v62 = vld [vmem:[#allocation8 + $0x1] ss:$0 sm:$0xff] }
0x1b6f   :  { %v4545_v1 = vpop.f32.mrf.mxu0 }
0x1b70   :  { %v4546_v3 = vadd.f32 %v5835_v52, %v4545_v1  ;;  %4555 = vadd.xlane.f32.xlu0 %v4549_v9 }
0x1b71   :  { %v6397_v14 = vpop.f32.mrf.mxu0 }
0x1b72   :  { %v4550_v15 = vadd.f32 %v4546_v3, %v7587_v40 }
0x1b74   :  { %4557 = vadd.xlane.f32.xlu1 %v4550_v15 }
0x1bf9   :  { %v4556_v19 = vpop.xlane.xlu0 %4555 }
0x1bfa   :  { %v4559_v20 = vmul.f32 0.0078125, %v4556_v19  ;;  %v6675_v19 = vld [vmem:[#allocation11 + $0x1f0] sm:$0xff]  }
0x1bfc   :  { %v7800_v21 = vsub.f32 %v4549_v9, %v4559_v20  ;;  %v6676_v20 = vld [vmem:[#allocation11 + $0x130] sm:$0xff]  }
0x1bfd   :  { %v4558_v39 = vpop.xlane.xlu1 %4557 }
0x1bfe   :  { %v4560_v23 = vmul.f32 0.0078125, %v4558_v39  ;;  %v4563_v24 = vmul.f32 %v7800_v21, %v7800_v21  ;;  %v6678_v39 = vld [vmem:[#allocation11 + $0x168] sm:$0xff]  }
0x1c00   :  { %v7804_v51 = vsub.f32 %v4550_v15, %v4560_v23  ;;  %4565 = vadd.xlane.f32.xlu0 %v4563_v24  ;;  %v6670_v15 = vld [vmem:[#allocation11 + $0x178] sm:$0xff]   ;;  %v6679_v23 = vld [vmem:[#allocation11 + $0x1e8] sm:$0xff]  }
0x1c01   :  { %6096 = vmatprep.subr.bf16.mxu1 %v6670_v15  ;;  %v6680_v24 = vld [vmem:[#allocation11 + $0x128] sm:$0xff]  }
0x1c02   :  { %v4564_v40 = vmul.f32 %v7804_v51, %v7804_v51 }
0x1c04   :  { %4567 = vadd.xlane.f32.xlu0 %v4564_v40  ;;  %v6682_v40 = vld [vmem:[#allocation11 + $0x160] sm:$0xff]  }
0x1c89   :  { %v4566_v42 = vpop.xlane.xlu0 %4565 }
0x1c8a   :  { %v4569_v12 = vmul.f32 0.0078125, %v4566_v42 }
0x1c8c   :  { %v4571_v43 = vadd.f32 1e-12, %v4569_v12 }
0x1c8d   :  { %v4568_v45 = vpop.xlane.xlu0 %4567 }
0x1c8e   :  { %6810 = vrsqrt.f32 %v4571_v43  ;;  %v4570_v46 = vmul.f32 0.0078125, %v4568_v45 }
0x1c90   :  { %v4572_v59 = vadd.f32 1e-12, %v4570_v46 }
0x1c92   :  { %6812 = vrsqrt.f32 %v4572_v59 }
0x1c9b   :  { %v6811_v47 = vpop.eup %6810 }
0x1c9c   :  { %v4575_v2 = vmul.f32 %v6811_v47, %v7800_v21  ;;  %v6677_v21 = vld [vmem:[#allocation11 + $0x1b0] sm:$0xff]  }
0x1c9e   :  { %v4583_v61 = vmul.f32 %v5846_v10, %v4575_v2 }
0x1c9f   :  { %v6813_v52 = vpop.eup %6812 }
0x1ca0   :  { %v4576_v53 = vmul.f32 %v6813_v52, %v7804_v51  ;;  %v7813_v1 = vadd.f32 %v5847_v62, %v4583_v61  ;;  %v6681_v51 = vld [vmem:[#allocation11 + $0x1a8] sm:$0xff]  }
0x1ca2   :  { %v4584_v9 = vmul.f32 %v5846_v10, %v4576_v53 }
0x1ca4   :  { %v7815_v3 = vadd.f32 %v5847_v62, %v4584_v9 }
0x1ca6   :  { %v4593_v14 = vpack.c.bf16 %v7815_v3, %v7813_v1 }
0x1ca8   :  { %4843 = vmatmul.mubr.bf16.vlgmr.msra.gmra.mxu1 %v4593_v14  ;;  %4886 = vmatmul.mubr.bf16.vlgmr.msra.gmra.mxu0 %v4593_v14 }
0x1ca9   :  { %6097 = vmatpush3.bf16.msra.mxu1 %v6672_v17  ;;  %6119 = vmatpush3.bf16.msra.mxu0 %v6673_v18 }
0x1caa   :  { %6098 = vmatprep.subr.bf16.mxu1 %v6674_v27  ;;  %6120 = vmatprep.subr.bf16.mxu0 %v6675_v19 }
0x1cad   :  { %6099 = vmatpush3.bf16.msra.mxu1 %v6676_v20  ;;  %6121 = vmatpush3.bf16.msra.mxu0 %v6677_v21 }
0x1cae   :  { %6100 = vmatprep.subr.bf16.mxu1 %v6678_v39  ;;  %6122 = vmatprep.subr.bf16.mxu0 %v6679_v23 }
0x1cb1   :  { %6101 = vmatpush3.bf16.msra.mxu1 %v6680_v24  ;;  %6123 = vmatpush3.bf16.msra.mxu0 %v6681_v51 }
0x1cb2   :  { %6102 = vmatprep.subr.bf16.mxu1 %v6682_v40  ;;  %6124 = vmatprep.subr.bf16.mxu0 %v6683_v25 }
0x1cb5   :  { %6103 = vmatpush3.bf16.msra.mxu1 %v6684_v26  ;;  %6125 = vmatpush3.bf16.msra.mxu0 %v6685_v56 }
0x1cb6   :  { %6104 = vmatprep.subr.bf16.mxu1 %v6686_v6  ;;  %6126 = vmatprep.subr.bf16.mxu0 %v6687_v28 }
0x1cb9   :  { %6105 = vmatpush3.bf16.msra.mxu1 %v6688_v29  ;;  %6127 = vmatpush3.bf16.msra.mxu0 %v6689_v30 }
0x1cba   :  { %6106 = vmatprep.subr.bf16.mxu1 %v6690_v31  ;;  %6128 = vmatprep.subr.bf16.mxu0 %v6691_v32 }
0x1cbd   :  { %6107 = vmatpush3.bf16.msra.mxu1 %v6692_v33  ;;  %6129 = vmatpush3.bf16.msra.mxu0 %v6693_v34 }
0x1cbe   :  { %6108 = vmatprep.subr.bf16.mxu1 %v6694_v35  ;;  %6130 = vmatprep.subr.bf16.mxu0 %v6695_v36 }
0x1cc1   :  { %6109 = vmatpush3.bf16.msra.mxu1 %v6696_v37  ;;  %6131 = vmatpush3.bf16.msra.mxu0 %v6697_v5 }
0x1cc2   :  { %6110 = vmatprep.subr.bf16.mxu1 %v6698_v11  ;;  %6132 = vmatprep.subr.bf16.mxu0 %v6699_v60 }
0x1cc5   :  { %6111 = vmatpush3.bf16.msra.mxu1 %v6700_v7  ;;  %6133 = vmatpush3.bf16.msra.mxu0 %v6701_v0 }
0x1cc6   :  { %6398 = vmatprep.subr.bf16.mxu1 %v7068_v4  ;;  %6418 = vmatprep.subr.bf16.mxu0 %v7068_v4 }
0x1d68   :  { %v4844_v63 = vpop.f32.mrf.mxu1  ;;  %v4887_v38 = vpop.f32.mrf.mxu0 }
0x1d69   :  { %v7829_v8 = vadd.f32 %v4844_v63, %v4633_v13  ;;  %v7831_v41 = vadd.f32 %v4887_v38, %v4641_v50 }
0x1d6a   :  { %v4846_v42 = vpop.f32.mrf.mxu1  ;;  %v4889_v12 = vpop.f32.mrf.mxu0 }
0x1d6b   :  { %v4896_v43 = vmul.f32 %v7829_v8, %v7829_v8  ;;  %v4898_v57 = vmul.f32 %v7831_v41, %v7831_v41  ;;  %v7837_v58 = vadd.f32 %v4846_v42, %v4637_v22  ;;  %v7839_v55 = vadd.f32 %v4889_v12, %v4645_v48 }
0x1d6c   :  { %v4848_v54 = vpop.f32.mrf.mxu1  ;;  %v4891_v44 = vpop.f32.mrf.mxu0 }
0x1d6d   :  { %v4904_v45 = vmul.f32 %v4896_v43, %v7829_v8  ;;  %v4906_v46 = vmul.f32 %v4898_v57, %v7831_v41  ;;  %v4897_v59 = vmul.f32 %v7837_v58, %v7837_v58  ;;  %v4899_v47 = vmul.f32 %v7839_v55, %v7839_v55 }
0x1d6e   :  { %v7847_v2 = vadd.f32 %v4848_v54, %v4633_v13  ;;  %v7849_v10 = vadd.f32 %v4891_v44, %v4641_v50  ;;  %v4850_v52 = vpop.f32.mrf.mxu1  ;;  %v4893_v53 = vpop.f32.mrf.mxu0 }
0x1d6f   :  { %v4912_v61 = vmul.f32 0.044715, %v4904_v45  ;;  %v4914_v62 = vmul.f32 0.044715, %v4906_v46  ;;  %v4905_v9 = vmul.f32 %v4897_v59, %v7837_v58  ;;  %v4907_v14 = vmul.f32 %v4899_v47, %v7839_v55 }
0x1d70   :  { %v4900_v15 = vmul.f32 %v7847_v2, %v7847_v2  ;;  %v4902_v16 = vmul.f32 %v7849_v10, %v7849_v10  ;;  %v7857_v17 = vadd.f32 %v4850_v52, %v4637_v22  ;;  %v7859_v18 = vadd.f32 %v4893_v53, %v4645_v48 }
0x1d71   :  { %v4920_v27 = vadd.f32 %v4912_v61, %v7829_v8  ;;  %v4922_v19 = vadd.f32 %v4914_v62, %v7831_v41  ;;  %v4913_v20 = vmul.f32 0.044715, %v4905_v9  ;;  %v4915_v21 = vmul.f32 0.044715, %v4907_v14 }
0x1d72   :  { %v4908_v39 = vmul.f32 %v4900_v15, %v7847_v2  ;;  %v4910_v23 = vmul.f32 %v4902_v16, %v7849_v10  ;;  %v4901_v24 = vmul.f32 %v7857_v17, %v7857_v17  ;;  %v4903_v51 = vmul.f32 %v7859_v18, %v7859_v18 }
0x1d73   :  { %v4928_v40 = vmul.f32 0.7978846, %v4920_v27  ;;  %v4930_v25 = vmul.f32 0.7978846, %v4922_v19  ;;  %v4921_v26 = vadd.f32 %v4913_v20, %v7837_v58  ;;  %v4923_v56 = vadd.f32 %v4915_v21, %v7839_v55 }
0x1d74   :  { %v4916_v6 = vmul.f32 0.044715, %v4908_v39  ;;  %v4918_v28 = vmul.f32 0.044715, %v4910_v23  ;;  %v4909_v29 = vmul.f32 %v4901_v24, %v7857_v17  ;;  %v4911_v30 = vmul.f32 %v4903_v51, %v7859_v18 }
0x1d75   :  { %6814 = vtanh.f32 %v4928_v40  ;;  %v4929_v31 = vmul.f32 0.7978846, %v4921_v26  ;;  %v4931_v32 = vmul.f32 0.7978846, %v4923_v56 }
0x1d76   :  { %6816 = vtanh.f32 %v4930_v25  ;;  %v4924_v33 = vadd.f32 %v4916_v6, %v7847_v2  ;;  %v4926_v34 = vadd.f32 %v4918_v28, %v7849_v10  ;;  %v4917_v35 = vmul.f32 0.044715, %v4909_v29 }
0x1d77   :  { %6818 = vtanh.f32 %v4929_v31  ;;  %v4919_v36 = vmul.f32 0.044715, %v4911_v30 }
0x1d78   :  { %6820 = vtanh.f32 %v4931_v32  ;;  %v4932_v37 = vmul.f32 0.7978846, %v4924_v33  ;;  %v4934_v5 = vmul.f32 0.7978846, %v4926_v34  ;;  %v4925_v11 = vadd.f32 %v4917_v35, %v7857_v17 }
0x1d79   :  { %v4927_v60 = vadd.f32 %v4919_v36, %v7859_v18 }
0x1d7a   :  { %6822 = vtanh.f32 %v4932_v37  ;;  %v4933_v7 = vmul.f32 0.7978846, %v4925_v11 }
0x1d7b   :  { %6824 = vtanh.f32 %v4934_v5  ;;  %v4935_v0 = vmul.f32 0.7978846, %v4927_v60 }
0x1d7c   :  { %6826 = vtanh.f32 %v4933_v7 }
0x1d7d   :  { %6828 = vtanh.f32 %v4935_v0 }
0x1d82   :  { %v6815_v49 = vpop.eup %6814 }
0x1d83   :  { %v6817_v13 = vpop.eup %6816  ;;  %v4944_v38 = vadd.f32 1.0, %v6815_v49 }
0x1d84   :  { %v6819_v50 = vpop.eup %6818  ;;  %v4946_v43 = vadd.f32 1.0, %v6817_v13 }
0x1d85   :  { %v6821_v22 = vpop.eup %6820  ;;  %v4945_v48 = vadd.f32 1.0, %v6819_v50  ;;  %v4952_v52 = vmul.f32 0.5, %v4944_v38  ;;  %v6702_v50 = vld [vmem:[%s7953_s15 + $0x38] sm:$0xff]   ;;  %v6708_v38 = vld [vmem:[%s7953_s15 + $0x8] sm:$0xff]  }
0x1d86   :  { %v4947_v42 = vadd.f32 1.0, %v6821_v22  ;;  %v4954_v9 = vmul.f32 0.5, %v4946_v43  ;;  %v6705_v22 = vld [vmem:[%s7953_s15 + $0x20] sm:$0xff]  }
0x1d87   :  { %v6823_v63 = vpop.eup %6822  ;;  %v4953_v47 = vmul.f32 0.5, %v4945_v48  ;;  %v4960_v21 = vmul.f32 %v4952_v52, %v7829_v8  ;;  %v6706_v48 = vld [vmem:[%s7953_s15 + $0x18] sm:$0xff]   ;;  %v6711_v43 = vld [vmem:[#allocation17 + $0x30] sm:$0xff]  }
0x1d88   :  { %v6825_v12 = vpop.eup %6824  ;;  %v4948_v57 = vadd.f32 1.0, %v6823_v63  ;;  %v4955_v62 = vmul.f32 0.5, %v4947_v42  ;;  %v4962_v24 = vmul.f32 %v4954_v9, %v7831_v41  ;;  %v5882_v41 = vld [vmem:[%s7950_s12 + $0x1] ss:$0 sm:$0xff]  ;;  %v6707_v63 = vld [vmem:[%s7953_s15 + $0x10] sm:$0xff]  }
0x1d89   :  { %v6827_v54 = vpop.eup %6826  ;;  %v4950_v44 = vadd.f32 1.0, %v6825_v12  ;;  %v4961_v19 = vmul.f32 %v4953_v47, %v7837_v58  ;;  %v6709_v42 = vld [vmem:[%s7953_s15] sm:$0xff]   ;;  %v6710_v12 = vld [vmem:[#allocation17 + $0x38] sm:$0xff]  }
0x1d8a   :  { %v6829_v45 = vpop.eup %6828  ;;  %v4956_v46 = vmul.f32 0.5, %v4948_v57  ;;  %v4949_v59 = vadd.f32 1.0, %v6827_v54  ;;  %v4963_v39 = vmul.f32 %v4955_v62, %v7839_v55  ;;  %v6712_v57 = vld [vmem:[#allocation17 + $0x28] sm:$0xff]  }
0x1d8b   :  { %v4958_v53 = vmul.f32 0.5, %v4950_v44  ;;  %v4951_v61 = vadd.f32 1.0, %v6829_v45 }
0x1d8c   :  { %v4957_v14 = vmul.f32 0.5, %v4949_v59  ;;  %v4964_v15 = vmul.f32 %v4956_v46, %v7847_v2 }
0x1d8d   :  { %v4959_v16 = vmul.f32 0.5, %v4951_v61  ;;  %v4966_v27 = vmul.f32 %v4958_v53, %v7849_v10  ;;  %v5915_v53 = vld [vmem:[#allocation12 + $0x1] ss:$0 sm:$0xff] }
0x1d8e   :  { %v4965_v20 = vmul.f32 %v4957_v14, %v7857_v17  ;;  %v4968_v25 = vpack.c.bf16 %v4964_v15, %v4960_v21  ;;  %v5916_v14 = vld [vmem:[#allocation14 + $0x1] ss:$0 sm:$0xff] }
0x1d8f   :  { %v4967_v23 = vmul.f32 %v4959_v16, %v7859_v18  ;;  %v4970_v2 = vpack.c.bf16 %v4966_v27, %v4962_v24 }
0x1d90   :  { %v4969_v51 = vpack.c.bf16 %v4965_v20, %v4961_v19 }
0x1d91   :  { %v4971_v40 = vpack.c.bf16 %v4967_v23, %v4963_v39 }
0x1d92   :  { %5269 = vmatprep.mubr.bf16.mxu1 %v4969_v51 }
0x1d93   :  { %5310 = vmatprep.mubr.bf16.mxu0 %v4971_v40  ;;  %5270 = vmatmul.mubr.bf16.vlgmr.msra.gmra.mxu1 %v4968_v25  ;;  %v6713_v25 = vld [vmem:[#allocation17 + $0x20] sm:$0xff]  }
0x1d94   :  { %5311 = vmatmul.mubr.bf16.vlgmr.msra.gmra.mxu0 %v4970_v2  ;;  %6414 = vmatprep.mubr.msk.bf16.mxu1 %vm7070_vm0, %v7068_v4  ;;  %v6714_v2 = vld [vmem:[#allocation17 + $0x18] sm:$0xff]  }
0x1d95   :  { %6434 = vmatprep.mubr.msk.bf16.mxu0 %vm7070_vm0, %v7068_v4  ;;  %6399 = vmatpush3.bf16.msra.mxu1 %v6702_v50 }
0x1d96   :  { %6400 = vmatprep.subr.bf16.mxu1 %v7068_v4  ;;  %6419 = vmatpush3.bf16.msra.mxu0 %v6710_v12 }
0x1d97   :  { %6420 = vmatprep.subr.bf16.mxu0 %v7068_v4 }
0x1d9a   :  { %6421 = vmatpush3.bf16.msra.mxu0 %v6711_v43 }
0x1d9b   :  { %6422 = vmatprep.subr.bf16.mxu0 %v7068_v4 }
0x1d9e   :  { %6423 = vmatpush3.bf16.msra.mxu0 %v6712_v57 }
0x1d9f   :  { %6424 = vmatprep.subr.bf16.mxu0 %v7068_v4 }
0x1da2   :  { %6425 = vmatpush3.bf16.msra.mxu0 %v6713_v25 }
0x1da3   :  { %6426 = vmatprep.subr.bf16.mxu0 %v7068_v4 }
0x1da6   :  { %6427 = vmatpush3.bf16.msra.mxu0 %v6714_v2 }
0x1da7   :  { %6428 = vmatprep.subr.bf16.mxu0 %v7068_v4 }
0x1e53   :  { %v6112_v8 = vpop.f32.mrf.mxu1 }
0x1e54   :  { %v6134_v58 = vpop.f32.mrf.mxu0 }
0x1e55   :  { %v6113_v55 = vpop.f32.mrf.mxu1 }
0x1e56   :  { %v6114_v10 = vadd.f32 %v6113_v55, %v6112_v8  ;;  %v6135_v17 = vpop.f32.mrf.mxu0  ;;  %v6715_v8 = vld [vmem:[#allocation17 + $0x10] sm:$0xff]   ;;  %v5917_v55 = vld [vmem:[#allocation15] ss:$0 sm:$0xff] }
0x1e57   :  { %v6115_v18 = vpop.f32.mrf.mxu1  ;;  %v6136_v56 = vadd.f32 %v6135_v17, %v6134_v58  ;;  %6429 = vmatpush3.bf16.msra.mxu0 %v6715_v8  ;;  %v6716_v58 = vld [vmem:[#allocation17 + $0x8] sm:$0xff]  }
0x1e58   :  { %v5272_v26 = vadd.f32 %v6114_v10, %v5882_v41  ;;  %v6137_v6 = vpop.f32.mrf.mxu0  ;;  %6430 = vmatprep.subr.bf16.mxu0 %v7068_v4 }
0x1e59   :  { %v6116_v28 = vpop.f32.mrf.mxu1 }
0x1e5a   :  { %v5313_v29 = vadd.f32 %v6136_v56, %v5272_v26  ;;  %v6117_v30 = vadd.f32 %v6116_v28, %v6115_v18  ;;  %v6138_v31 = vpop.f32.mrf.mxu0 }
0x1e5b   :  { %v6139_v33 = vadd.f32 %v6138_v31, %v6137_v6  ;;  %6431 = vmatpush3.bf16.msra.mxu0 %v6716_v58 }
0x1e5c   :  { %v5275_v32 = vadd.f32 %v6117_v30, %v5882_v41  ;;  %v5319_v34 = vadd.f32 %v5313_v29, %v7813_v1  ;;  %v6703_v1 = vld [vmem:[%s7953_s15 + $0x30] sm:$0xff]   ;;  %6432 = vmatprep.subr.bf16.mxu0 %v7068_v4  ;;  %v5926_v29 = vld [vmem:[%s7956_s18] ss:$0 sm:$0xff] }
0x1e5d   :  { %6401 = vmatpush3.bf16.msra.mxu1 %v6703_v1  ;;  %v6717_v41 = vld [vmem:[#allocation17] sm:$0xff]  }
0x1e5e   :  { %v5316_v35 = vadd.f32 %v6139_v33, %v5275_v32  ;;  %5325 = vadd.xlane.f32.xlu1 %v5319_v34  ;;  %6402 = vmatprep.subr.bf16.mxu1 %v7068_v4 }
0x1e5f   :  { %6433 = vmatpush3.bf16.msra.mxu0 %v6717_v41 }
0x1e60   :  { %v5320_v36 = vadd.f32 %v5316_v35, %v7815_v3  ;;  %v6704_v3 = vld [vmem:[%s7953_s15 + $0x28] sm:$0xff]  }
0x1e61   :  { %6403 = vmatpush3.bf16.msra.mxu1 %v6704_v3 }
0x1e62   :  { %5327 = vadd.xlane.f32.xlu0 %v5320_v36  ;;  %6404 = vmatprep.subr.bf16.mxu1 %v7068_v4 }
0x1e65   :  { %6405 = vmatpush3.bf16.msra.mxu1 %v6705_v22 }
0x1e66   :  { %6406 = vmatprep.subr.bf16.mxu1 %v7068_v4 }
0x1e69   :  { %6407 = vmatpush3.bf16.msra.mxu1 %v6706_v48 }
0x1e6a   :  { %6408 = vmatprep.subr.bf16.mxu1 %v7068_v4 }
0x1e6d   :  { %6409 = vmatpush3.bf16.msra.mxu1 %v6707_v63 }
0x1e6e   :  { %6410 = vmatprep.subr.bf16.mxu1 %v7068_v4 }
0x1e71   :  { %6411 = vmatpush3.bf16.msra.mxu1 %v6708_v38 }
0x1e72   :  { %6412 = vmatprep.subr.bf16.mxu1 %v7068_v4 }
0x1e75   :  { %6413 = vmatpush3.bf16.msra.mxu1 %v6709_v42 }
0x1ee7   :  { %v5326_v37 = vpop.xlane.xlu1 %5325 }
0x1ee8   :  { %v5329_v5 = vmul.f32 0.0078125, %v5326_v37 }
0x1eea   :  { %v5331_v11 = vsub.f32 %v5319_v34, %v5329_v5 }
0x1eeb   :  { %v5328_v60 = vpop.xlane.xlu0 %5327 }
0x1eec   :  { %v5330_v7 = vmul.f32 0.0078125, %v5328_v60  ;;  %v5333_v0 = vmul.f32 %v5331_v11, %v5331_v11 }
0x1eee   :  { %v5332_v49 = vsub.f32 %v5320_v36, %v5330_v7  ;;  %5335 = vadd.xlane.f32.xlu1 %v5333_v0 }
0x1ef0   :  { %v5334_v13 = vmul.f32 %v5332_v49, %v5332_v49 }
0x1ef2   :  { %5337 = vadd.xlane.f32.xlu0 %v5334_v13 }
0x1f77   :  { %v5336_v54 = vpop.xlane.xlu1 %5335 }
0x1f78   :  { %v5339_v44 = vmul.f32 0.0078125, %v5336_v54 }
0x1f7a   :  { %v5341_v45 = vadd.f32 1e-12, %v5339_v44 }
0x1f7b   :  { %v5338_v46 = vpop.xlane.xlu0 %5337 }
0x1f7c   :  { %6830 = vrsqrt.f32 %v5341_v45  ;;  %v5340_v59 = vmul.f32 0.0078125, %v5338_v46 }
0x1f7e   :  { %v5342_v47 = vadd.f32 1e-12, %v5340_v59 }
0x1f80   :  { %6832 = vrsqrt.f32 %v5342_v47 }
0x1f89   :  { %v6831_v52 = vpop.eup %6830 }
0x1f8a   :  { %v5345_v61 = vmul.f32 %v6831_v52, %v5331_v11 }
0x1f8c   :  { %v5353_v62 = vmul.f32 %v5915_v53, %v5345_v61 }
0x1f8d   :  { %v6833_v9 = vpop.eup %6832 }
0x1f8e   :  { %v5346_v15 = vmul.f32 %v6833_v9, %v5332_v49  ;;  %v5361_v27 = vadd.f32 %v5916_v14, %v5353_v62 }
0x1f90   :  { %v5354_v16 = vmul.f32 %v5915_v53, %v5346_v15  ;;  %v5363_v20 = vpack.c.bf16 %v5361_v27, %v5361_v27 }
0x1f92   :  { %v5362_v19 = vadd.f32 %v5916_v14, %v5354_v16  ;;  %v5390_v23 = vunpack.c.l.b16 %v5363_v20 }
0x1f94   :  { %v5364_v21 = vpack.c.bf16 %v5362_v19, %v5362_v19 }
0x1f96   :  { %v5391_v39 = vunpack.c.l.b16 %v5364_v21 }
0x1f98   :  { %v5392_v24 = vrot.slane %v5391_v39, 7 }
0x1f9a   :  { %v5394_v51 = vsel %vm5393_vm7, %v5392_v24, %v5390_v23 }
0x1f9b   :  { %v5395_v40 = vpack.c.b16 %v5394_v51, %v5394_v51 }
0x1f9d   :  { %6415 = vmatmul.mubr.bf16.vlgmr.msra.gmra.mxu1 %v5395_v40 }
0x205d   :  { %v5479_v10 = vpop.f32.mrf.mxu1 }
0x205e   :  { %v5480_v17 = vadd.f32 %v5917_v55, %v5479_v10 }
0x205f   :  { %v6416_v18 = vpop.f32.mrf.mxu1 }
0x2060   :  { %6834 = vtanh.f32 %v5480_v17 }
0x2061   :  { %v5482_v26 = vpop.f32.mrf.mxu1 }
0x2063   :  { %v6417_v56 = vpop.f32.mrf.mxu1 }
0x206d   :  { %v6835_v6 = vpop.eup %6834 }
0x206e   :  { %v5486_v28 = vpack.c.bf16 %v6835_v6, %v6835_v6 }
0x2070   :  { %6435 = vmatmul.mubr.bf16.vlgmr.msra.gmra.mxu0 %v5486_v28 }
0x2130   :  { %v5592_v30 = vpop.f32.mrf.mxu0 }
0x2131   :  { %v5593_v31 = vadd.f32 %v5926_v29, %v5592_v30 }
0x2132   :  { %v6436_v32 = vpop.f32.mrf.mxu0 }
0x2133   :  { %v5935_v4 = vmul.f32 -1.442695, %v5593_v31 }
0x2134   :  { %v5595_v33 = vpop.f32.mrf.mxu0 }
0x2135   :  { %6836 = vpow2.f32 %v5935_v4 }
0x2136   :  { %v6437_v34 = vpop.f32.mrf.mxu0 }
0x2142   :  { %v6837_v35 = vpop.eup %6836 }
0x2143   :  { %v5601_v36 = vadd.f32 1.0, %v6837_v35 }
0x2145   :  { %6838 = vrcp.f32 %v5601_v36 }
0x2152   :  { %v6839_v37 = vpop.eup %6838 }
0x2153   :  { %5604 = vst [vmem:[#allocation18] sm:$0x3] %v6839_v37 }
0x2154   :  { %7031 = shalt.err (!%p7028_p7)
}
0x2155   :  { %5614 = dma.vmem_to_hbm [thread:$0]  %s5612_s28, 32, %s7957_s19, [#allocation5]  }
0x2156   :  { %7050 = dma.done.wait [#allocation5], 32  }
0x2157   :  { %7051 = vsyncadd [#allocation5], 4294967264 }
0x2158   :  { %5618 = vsyncpa [#allocation4], 1 }
0x2159   :  { %5619 = vsyncpa [#allocation7], 1 }
0x215a   :  { %5620 = vsyncpa [#allocation10], 1 }
0x215b   :  { %5621 = vsyncpa [#allocation13], 1 }
0x215c   :  { %5622 = vsyncpa [#allocation16], 1 }
0x215d   :  { %5623 = vsyncpa [#allocation5], 1 }

</bundles_post_ra>
